<compile_context>
chip_gen: v5e
topology: v5e:2x2
jax: 0.10.0
libtpu: 0.0.40
codegen_flags: <defaults>
</compile_context>

<pallas_src>
import jax
import jax.numpy as jnp
import numpy as np
from jax.experimental import pallas as pl
from jax.experimental.pallas import tpu as pltpu  # noqa: F401  (no TPU-specific params needed at this size)

# ----------------------------- sizes ---------------------------------------
B = 2          # batch
T = 8          # decode steps (questions.size(1))
S = 16         # number of encoder nodes
H = 32         # hid_size
D_IN = 8       # input_dim (question embedding size)
V = 32         # output_size
OOV = 50       # max_oov_num
VTOT = V + OOV
VPAD = 128     # lane-dense padded vocab axis (VTOT=82 -> 128)


# ----------------------------- kernel --------------------------------------
def decoder_kernel(
    xq_ref,                 # (T, B, H)      precomputed questions@w_pq + b_p
    hc0_ref,                # (2B, H)        [h0 ; c0]
    nodes_ref,              # (B, S, H)
    kproj_ref,              # (B, S, 2H)     nodes@[wk_a|wk_c] + [b_a|b_c]
    mb_ref,                 # (2B, S)        [attn mask bias ; copy mask bias] (-1e9)
    sel_ref,                # (T*B, B*S)     row->batch block selector (0/1)
    scat_ref,               # (B*S, VPAD)    flattened one-hot scatter matrix
    wq_ref,                 # (H, 2H)        [wq_a | wq_c]
    vpack_ref,              # (2, 2H)        [v_a|0 ; 0|v_c]
    w_pc_ref,               # (H, H)         ctx part of input_prj
    w_ih_ref, w_hh_ref,     # (H, 4H)        fused LSTM, gate order i,f,o,g
    bpack_ref,              # (2, VPAD)      [b_lstm (i,f,o,g lanes 0:128) ; b_out_pad]
    w_out_ref,              # (H, VPAD)      out projection, lane-padded
    wswb_ref,               # (1, H+1)       [w_sw | b_sw]
    out_ref,                # (T*B, VPAD)    rows ordered r = t*B + b
    hcN_ref,                # (2B, H)        [h_final ; c_final]
):
    f32 = jnp.float32

    # ---- small loop-invariant values (hoisted once; big matrices are read from
    #      VMEM refs inside the loop to keep vreg residency low across 8 steps) ----
    mbias = mb_ref[0:B]            # (B,S) additive -1e9 attention mask bias
    cbias = mb_ref[B:2 * B]        # (B,S) additive -1e9 copy mask bias
    v_a = vpack_ref[0:1]           # (1,2H)   [v_a | 0]
    v_c = vpack_ref[1:2]           # (1,2H)   [0 | v_c]
    b_l = bpack_ref[0:1]           # (1,4H)   LSTM bias, gate order i,f,o,g

    h = hc0_ref[0:B]               # (B,H)
    c = hc0_ref[B:2 * B]           # (B,H)

    h_steps = []                   # new hidden after each step
    hid_steps = []                 # hidden BEFORE each step (feeds p_gen / attention)
    attnc_steps = []               # copy-attention weights per step

    for t in range(T):             # fully unrolled static time loop (T=8)
        hid = h
        hid_steps.append(hid)

        # ---- both Bahdanau attentions in one stacked pass --------------------
        q_proj = jnp.dot(hid, wq_ref[...], preferred_element_type=f32)   # (B,2H)
        e = jnp.tanh(q_proj[:, None, :] + kproj_ref[...])                # (B,S,2H)
        # scores are tanh-bounded (|score| <= sum|v|), so the max-subtraction is
        # dropped on this serial path; the -1e9 bias underflows exp() to exactly 0.
        pa = jnp.exp(jnp.sum(e * v_a[:, None, :], axis=-1) + mbias)      # (B,S)
        pc = jnp.exp(jnp.sum(e * v_c[:, None, :], axis=-1) + cbias)      # (B,S)
        attn_a = pa * pl.reciprocal(jnp.sum(pa, axis=-1, keepdims=True), approx=True)
        attn_c = pc * pl.reciprocal(jnp.sum(pc, axis=-1, keepdims=True), approx=True)
        attnc_steps.append(attn_c)

        # context vector via MXU batched matvec
        ctx = jnp.einsum('bqs,bsh->bqh', attn_a[:, None, :], nodes_ref[...],
                         preferred_element_type=f32)[:, 0]               # (B,H)

        # ---- input projection (question part precomputed in the wrapper) -----
        x = xq_ref[t] + jnp.dot(ctx, w_pc_ref[...], preferred_element_type=f32)

        # ---- fused LSTM cell: gate columns ordered [i, f, o | g] --------------
        gates = (jnp.dot(x, w_ih_ref[...], preferred_element_type=f32)
                 + jnp.dot(hid, w_hh_ref[...], preferred_element_type=f32)
                 + b_l)                                                   # (B,4H=128)
        sig = jax.nn.sigmoid(gates[:, :3 * H])                           # i,f,o
        g_g = jnp.tanh(gates[:, 3 * H:])                                 # g
        c = sig[:, H:2 * H] * c + sig[:, :H] * g_g
        h = sig[:, 2 * H:3 * H] * jnp.tanh(c)
        h_steps.append(h)

    # ---------------- epilogue: everything off the serial recurrence ----------
    h_all = jnp.concatenate(h_steps, axis=0)        # (T*B, H)  rows r = t*B + b
    hid_all = jnp.concatenate(hid_steps, axis=0)    # (T*B, H)
    attn_all = jnp.concatenate(attnc_steps, axis=0) # (T*B, S)

    # generation distribution: one dense (T*B, VPAD) = (16,128) softmax
    logits = (jnp.dot(h_all, w_out_ref[...], preferred_element_type=f32)
              + bpack_ref[1:2])                                           # (T*B,VPAD)
    logits = logits - jnp.max(logits, axis=-1, keepdims=True)
    pe = jnp.exp(logits)
    gen = pe * pl.reciprocal(jnp.sum(pe, axis=-1, keepdims=True), approx=True)

    # copy distribution: block-diagonal widening -> one (T*B,B*S)@(B*S,VPAD) matmul
    attn_wide = jnp.concatenate([attn_all] * B, axis=1) * sel_ref[...]    # (T*B,B*S)
    copy_dist = jnp.dot(attn_wide, scat_ref[...], preferred_element_type=f32)

    # pointer-generator gate from the pre-step hidden states
    wswb = wswb_ref[...]                                                  # (1,H+1)
    p_gen = jax.nn.sigmoid(
        jnp.sum(hid_all * wswb[:, :H], axis=-1, keepdims=True) + wswb[:, H:])

    out_ref[...] = p_gen * gen + (1.0 - p_gen) * copy_dist                # (16,128)
    hcN_ref[...] = jnp.concatenate([h, c], axis=0)                        # (2B,H)


# ----------------------------- wrapper --------------------------------------
def simple_lstm_decoder(questions, h0, c0, nodes, mask, copy_mask, src2trg_map, P):
    """questions: (B,T,D_IN); h0,c0: (B,H); nodes: (B,S,H); masks: (B,S);
    src2trg_map: (B,S) int32.  Returns (dec_outputs (B,T,VTOT), (h_final, c_final))."""
    f32 = jnp.float32

    # ---- loop-invariant precompute (plain XLA, outside the recurrence) -------
    # question projection hoisted out of the per-step path (includes b_p)
    q_tb = jnp.transpose(questions, (1, 0, 2)).astype(f32)                # (T,B,D_IN)
    xq = (q_tb.reshape(T * B, D_IN) @ P["w_pq"] + P["b_p"]).reshape(T, B, H)

    hc0 = jnp.concatenate([h0, c0], axis=0).astype(f32)                   # (2B,H)

    wk_stack = jnp.concatenate([P["wk_a"], P["wk_c"]], axis=1)            # (H,2H)
    b_stack = jnp.concatenate([P["b_a"], P["b_c"]], axis=-1)              # (1,2H)
    kproj = jnp.einsum('bsh,hk->bsk', nodes, wk_stack) + b_stack          # (B,S,2H)
    wq_stack = jnp.concatenate([P["wq_a"], P["wq_c"]], axis=1)            # (H,2H)
    zeros_h = jnp.zeros((1, H), f32)
    vpack = jnp.concatenate(
        [jnp.concatenate([P["v_a"], zeros_h], axis=-1),
         jnp.concatenate([zeros_h, P["v_c"]], axis=-1)], axis=0)          # (2,2H)

    # additive -1e9 mask biases (replace per-step where/select in the kernel)
    mb = jnp.concatenate(
        [jnp.where(mask > 0.0, 0.0, -1e9).astype(f32),
         jnp.where(copy_mask > 0.0, 0.0, -1e9).astype(f32)], axis=0)      # (2B,S)

    # flattened copy-scatter matrix + row->batch block selector for the epilogue
    scat2d = jax.nn.one_hot(src2trg_map, VPAD, dtype=f32).reshape(B * S, VPAD)
    sel = jnp.tile(jnp.repeat(jnp.eye(B, dtype=f32), S, axis=1), (T, 1))  # (T*B,B*S)

    # output projection padded to 128 lanes (-1e30 bias kills the pad columns)
    w_out_pad = jnp.concatenate(
        [P["w_out"], jnp.zeros((H, VPAD - V), f32)], axis=1)              # (H,VPAD)
    b_out_pad = jnp.concatenate(
        [P["b_out"], jnp.full((1, VPAD - V), -1e30, f32)], axis=1)        # (1,VPAD)

    # fused LSTM weights; gate columns reordered to [i, f, o | g]
    order = (0, 1, 3, 2)                      # source gate order is (i, f, g, o)
    w_ih_cat = jnp.concatenate([P["w_ih"][i] for i in order], axis=1)     # (H,4H)
    w_hh_cat = jnp.concatenate([P["w_hh"][i] for i in order], axis=1)     # (H,4H)
    b_l_cat = jnp.concatenate([P["b_l"][i] for i in order], axis=1)       # (1,4H)

    bpack = jnp.concatenate([b_l_cat, b_out_pad], axis=0)                 # (2,VPAD)
    wswb = jnp.concatenate([P["w_sw"], P["b_sw"]], axis=1)                # (1,H+1)

    # single invocation, no grid: every array is a whole VMEM-resident block.
    out2d, hcN = pl.pallas_call(
        decoder_kernel,
        out_shape=(jax.ShapeDtypeStruct((T * B, VPAD), f32),
                   jax.ShapeDtypeStruct((2 * B, H), f32)),
    )(xq, hc0, nodes.astype(f32), kproj, mb, sel, scat2d,
      wq_stack, vpack, P["w_pc"], w_ih_cat, w_hh_cat,
      bpack, w_out_pad, wswb)

    dec = out2d.reshape(T, B, VPAD).transpose(1, 0, 2)[..., :VTOT]        # (B,T,VTOT)
    return dec, (hcN[:B], hcN[B:])


# ----------------------------- pure-JAX reference ----------------------------
def _bahdanau_ref(hid, nodes, mask, wq, wk, b, v):
    q_proj = hid @ wq
    k_proj = jnp.einsum('bsh,hk->bsk', nodes, wk)
    e = jnp.tanh(q_proj[:, None, :] + k_proj + b)
    scores = jnp.sum(e * v, axis=-1)
    scores = jnp.where(mask > 0.0, scores, -1e9)
    attn = jax.nn.softmax(scores, axis=-1)
    ctx = jnp.einsum('bs,bsh->bh', attn, nodes)
    return ctx, attn


def reference_forward(questions, h0, c0, nodes, mask, cmask, src2trg_map, P):
    scatter = jax.nn.one_hot(src2trg_map, VTOT, dtype=jnp.float32)
    h, c = h0, c0
    outs = []
    for t in range(T):
        hid = h
        ctx, _ = _bahdanau_ref(hid, nodes, mask, P["wq_a"], P["wk_a"], P["b_a"], P["v_a"])
        _, cattn = _bahdanau_ref(hid, nodes, cmask, P["wq_c"], P["wk_c"], P["b_c"], P["v_c"])
        x = questions[:, t] @ P["w_pq"] + ctx @ P["w_pc"] + P["b_p"]
        g = [x @ P["w_ih"][i] + hid @ P["w_hh"][i] + P["b_l"][i] for i in range(4)]
        i_g, f_g = jax.nn.sigmoid(g[0]), jax.nn.sigmoid(g[1])
        g_g, o_g = jnp.tanh(g[2]), jax.nn.sigmoid(g[3])
        c = f_g * c + i_g * g_g
        h = o_g * jnp.tanh(c)
        gen = jax.nn.softmax(h @ P["w_out"] + P["b_out"], axis=-1)        # (B, V)
        gen_full = jnp.concatenate([gen, jnp.zeros((B, OOV), jnp.float32)], axis=-1)
        copy_dist = jnp.einsum('bs,bsv->bv', cattn, scatter)
        p_gen = jax.nn.sigmoid(jnp.sum(hid * P["w_sw"], -1, keepdims=True) + P["b_sw"])
        outs.append(p_gen * gen_full + (1.0 - p_gen) * copy_dist)
    return jnp.stack(outs, axis=1), h, c


# ----------------------------- main ------------------------------------------
if __name__ == "__main__":
    key = jax.random.PRNGKey(0)
    ks = list(jax.random.split(key, 32))
    nrm = lambda k, shp, s=0.2: (jax.random.normal(k, shp) * s).astype(jnp.float32)

    # deterministic parameter init (shapes from the module's __init__)
    P = {
        "wq_a": nrm(ks[0], (H, H)), "wk_a": nrm(ks[1], (H, H)),
        "b_a": nrm(ks[2], (1, H)),  "v_a": nrm(ks[3], (1, H)),
        "wq_c": nrm(ks[4], (H, H)), "wk_c": nrm(ks[5], (H, H)),
        "b_c": nrm(ks[6], (1, H)),  "v_c": nrm(ks[7], (1, H)),
        "w_sw": nrm(ks[8], (1, H)), "b_sw": nrm(ks[9], (1, 1)),
        "w_out": nrm(ks[10], (H, V)), "b_out": nrm(ks[11], (1, V)),
        "w_pq": nrm(ks[12], (D_IN, H)), "w_pc": nrm(ks[13], (H, H)),
        "b_p": nrm(ks[14], (1, H)),
        "w_ih": nrm(ks[15], (4, H, H)), "w_hh": nrm(ks[16], (4, H, H)),
        "b_l": nrm(ks[17], (4, 1, H)),
    }

    # deterministic example inputs
    questions = nrm(ks[18], (B, T, D_IN), 1.0)
    h0 = nrm(ks[19], (B, H), 0.5)          # PyTorch hidden is (1,B,H); layer dim squeezed
    c0 = nrm(ks[20], (B, H), 0.5)
    nodes = nrm(ks[21], (B, S, H), 0.5)
    mask = jnp.ones((B, S), jnp.float32).at[1, S - 4:].set(0.0)
    copy_mask = jnp.ones((B, S), jnp.float32).at[0, S - 3:].set(0.0)
    src2trg_map = jax.random.randint(ks[22], (B, S), 0, VTOT).astype(jnp.int32)

    dec_out, (h_fin, c_fin) = jax.block_until_ready(
        simple_lstm_decoder(questions, h0, c0, nodes, mask, copy_mask, src2trg_map, P))

    ref_out, ref_h, ref_c = reference_forward(
        questions, h0, c0, nodes, mask, copy_mask, src2trg_map, P)

    np.testing.assert_allclose(np.asarray(dec_out), np.asarray(ref_out), atol=1e-2, rtol=1e-2)
    np.testing.assert_allclose(np.asarray(h_fin), np.asarray(ref_h), atol=2e-2, rtol=2e-2)
    np.testing.assert_allclose(np.asarray(c_fin), np.asarray(ref_c), atol=2e-2, rtol=2e-2)
    assert dec_out.shape == (B, T, VTOT)

    print("KERNEL_OK")
</pallas_src>

<mosaic_0001>
module attributes {stable_mosaic.version = 11 : i64} {
  func.func @decoder_kernel(%arg0: memref<8x2x32xf32, #tpu.memory_space<vmem>>, %arg1: memref<4x32xf32, #tpu.memory_space<vmem>>, %arg2: memref<2x16x32xf32, #tpu.memory_space<vmem>>, %arg3: memref<2x16x64xf32, #tpu.memory_space<vmem>>, %arg4: memref<4x16xf32, #tpu.memory_space<vmem>>, %arg5: memref<16x32xf32, #tpu.memory_space<vmem>>, %arg6: memref<32x128xf32, #tpu.memory_space<vmem>>, %arg7: memref<32x64xf32, #tpu.memory_space<vmem>>, %arg8: memref<2x64xf32, #tpu.memory_space<vmem>>, %arg9: memref<32x32xf32, #tpu.memory_space<vmem>>, %arg10: memref<32x128xf32, #tpu.memory_space<vmem>>, %arg11: memref<32x128xf32, #tpu.memory_space<vmem>>, %arg12: memref<2x128xf32, #tpu.memory_space<vmem>>, %arg13: memref<32x128xf32, #tpu.memory_space<vmem>>, %arg14: memref<1x33xf32, #tpu.memory_space<vmem>>, %arg15: memref<16x128xf32, #tpu.memory_space<vmem>>, %arg16: memref<4x32xf32, #tpu.memory_space<vmem>>) attributes {dimension_semantics = [], scalar_prefetch = 0 : i64, scratch_operands = 0 : i64, tpu.core_type = #tpu.core_type<tc>} {
    %c0 = arith.constant 0 : index
    %c0_0 = arith.constant 0 : index
    %0 = vector.load %arg4[%c0, %c0_0] : memref<4x16xf32, #tpu.memory_space<vmem>>, vector<2x16xf32>
    %c2 = arith.constant 2 : index
    %c0_1 = arith.constant 0 : index
    %1 = vector.load %arg4[%c2, %c0_1] : memref<4x16xf32, #tpu.memory_space<vmem>>, vector<2x16xf32>
    %c0_2 = arith.constant 0 : index
    %c0_3 = arith.constant 0 : index
    %2 = vector.load %arg8[%c0_2, %c0_3] : memref<2x64xf32, #tpu.memory_space<vmem>>, vector<1x64xf32>
    %c1 = arith.constant 1 : index
    %c0_4 = arith.constant 0 : index
    %3 = vector.load %arg8[%c1, %c0_4] : memref<2x64xf32, #tpu.memory_space<vmem>>, vector<1x64xf32>
    %c0_5 = arith.constant 0 : index
    %c0_6 = arith.constant 0 : index
    %4 = vector.load %arg12[%c0_5, %c0_6] : memref<2x128xf32, #tpu.memory_space<vmem>>, vector<1x128xf32>
    %c0_7 = arith.constant 0 : index
    %c0_8 = arith.constant 0 : index
    %5 = vector.load %arg1[%c0_7, %c0_8] : memref<4x32xf32, #tpu.memory_space<vmem>>, vector<2x32xf32>
    %c2_9 = arith.constant 2 : index
    %c0_10 = arith.constant 0 : index
    %6 = vector.load %arg1[%c2_9, %c0_10] : memref<4x32xf32, #tpu.memory_space<vmem>>, vector<2x32xf32>
    %c0_11 = arith.constant 0 : index
    %c0_12 = arith.constant 0 : index
    %7 = vector.load %arg7[%c0_11, %c0_12] : memref<32x64xf32, #tpu.memory_space<vmem>>, vector<32x64xf32>
    %cst = arith.constant dense<0.000000e+00> : vector<2x64xf32>
    %8 = tpu.matmul %5, %7, %cst {dimension_numbers = #tpu.dot_dimension_numbers<[1], [0], [0], [1], [0, 0, 1, 1], [], []>} : vector<2x32xf32>, vector<32x64xf32>, vector<2x64xf32> -> vector<2x64xf32>
    %9 = vector.shape_cast %8 : vector<2x64xf32> to vector<2x1x64xf32>
    %c0_13 = arith.constant 0 : index
    %c0_14 = arith.constant 0 : index
    %c0_15 = arith.constant 0 : index
    %10 = vector.load %arg3[%c0_13, %c0_14, %c0_15] : memref<2x16x64xf32, #tpu.memory_space<vmem>>, vector<2x16x64xf32>
    %11 = vector.broadcast %9 : vector<2x1x64xf32> to vector<2x16x64xf32>
    %12 = arith.addf %11, %10 : vector<2x16x64xf32>
    %13 = math.tanh %12 : vector<2x16x64xf32>
    %14 = vector.shape_cast %2 : vector<1x64xf32> to vector<1x1x64xf32>
    %15 = vector.broadcast %14 : vector<1x1x64xf32> to vector<2x16x64xf32>
    %16 = arith.mulf %13, %15 : vector<2x16x64xf32>
    %cst_16 = arith.constant dense<0.000000e+00> : vector<2x16xf32>
    %17 = vector.multi_reduction <add>, %16, %cst_16 [2] : vector<2x16x64xf32> to vector<2x16xf32>
    %18 = arith.addf %17, %0 : vector<2x16xf32>
    %19 = math.exp %18 : vector<2x16xf32>
    %20 = vector.shape_cast %3 : vector<1x64xf32> to vector<1x1x64xf32>
    %21 = vector.broadcast %20 : vector<1x1x64xf32> to vector<2x16x64xf32>
    %22 = arith.mulf %13, %21 : vector<2x16x64xf32>
    %cst_17 = arith.constant dense<0.000000e+00> : vector<2x16xf32>
    %23 = vector.multi_reduction <add>, %22, %cst_17 [2] : vector<2x16x64xf32> to vector<2x16xf32>
    %24 = arith.addf %23, %1 : vector<2x16xf32>
    %25 = math.exp %24 : vector<2x16xf32>
    %cst_18 = arith.constant dense<0.000000e+00> : vector<2xf32>
    %26 = vector.multi_reduction <add>, %19, %cst_18 [1] : vector<2x16xf32> to vector<2xf32>
    %27 = vector.shape_cast %26 : vector<2xf32> to vector<2x1xf32>
    %28 = tpu.reciprocal %27 {approx = true} : vector<2x1xf32> -> vector<2x1xf32>
    %29 = vector.broadcast %28 : vector<2x1xf32> to vector<2x16xf32>
    %30 = arith.mulf %19, %29 : vector<2x16xf32>
    %cst_19 = arith.constant dense<0.000000e+00> : vector<2xf32>
    %31 = vector.multi_reduction <add>, %25, %cst_19 [1] : vector<2x16xf32> to vector<2xf32>
    %32 = vector.shape_cast %31 : vector<2xf32> to vector<2x1xf32>
    %33 = tpu.reciprocal %32 {approx = true} : vector<2x1xf32> -> vector<2x1xf32>
    %34 = vector.broadcast %33 : vector<2x1xf32> to vector<2x16xf32>
    %35 = arith.mulf %25, %34 : vector<2x16xf32>
    %36 = vector.shape_cast %30 : vector<2x16xf32> to vector<2x1x16xf32>
    %c0_20 = arith.constant 0 : index
    %c0_21 = arith.constant 0 : index
    %c0_22 = arith.constant 0 : index
    %37 = vector.load %arg2[%c0_20, %c0_21, %c0_22] : memref<2x16x32xf32, #tpu.memory_space<vmem>>, vector<2x16x32xf32>
    "tpu.trace_start"() <{level = 10 : i32, message = "bqs,bsh->bqh"}> : () -> ()
    %cst_23 = arith.constant dense<0.000000e+00> : vector<2x1x32xf32>
    %38 = tpu.matmul %36, %37, %cst_23 {dimension_numbers = #tpu.dot_dimension_numbers<[2], [1], [1], [2], [0, 0, 0, 1, 1, 2], [0], [0]>} : vector<2x1x16xf32>, vector<2x16x32xf32>, vector<2x1x32xf32> -> vector<2x1x32xf32>
    "tpu.trace_stop"() : () -> ()
    %39 = vector.shape_cast %38 : vector<2x1x32xf32> to vector<2x32xf32>
    %c0_24 = arith.constant 0 : index
    %c0_25 = arith.constant 0 : index
    %c0_26 = arith.constant 0 : index
    %40 = vector.load %arg0[%c0_24, %c0_25, %c0_26] : memref<8x2x32xf32, #tpu.memory_space<vmem>>, vector<1x2x32xf32>
    %41 = vector.shape_cast %40 : vector<1x2x32xf32> to vector<2x32xf32>
    %c0_27 = arith.constant 0 : index
    %c0_28 = arith.constant 0 : index
    %42 = vector.load %arg9[%c0_27, %c0_28] : memref<32x32xf32, #tpu.memory_space<vmem>>, vector<32x32xf32>
    %cst_29 = arith.constant dense<0.000000e+00> : vector<2x32xf32>
    %43 = tpu.matmul %39, %42, %cst_29 {dimension_numbers = #tpu.dot_dimension_numbers<[1], [0], [0], [1], [0, 0, 1, 1], [], []>} : vector<2x32xf32>, vector<32x32xf32>, vector<2x32xf32> -> vector<2x32xf32>
    %44 = arith.addf %41, %43 : vector<2x32xf32>
    %c0_30 = arith.constant 0 : index
    %c0_31 = arith.constant 0 : index
    %45 = vector.load %arg10[%c0_30, %c0_31] : memref<32x128xf32, #tpu.memory_space<vmem>>, vector<32x128xf32>
    %cst_32 = arith.constant dense<0.000000e+00> : vector<2x128xf32>
    %46 = tpu.matmul %44, %45, %cst_32 {dimension_numbers = #tpu.dot_dimension_numbers<[1], [0], [0], [1], [0, 0, 1, 1], [], []>} : vector<2x32xf32>, vector<32x128xf32>, vector<2x128xf32> -> vector<2x128xf32>
    %c0_33 = arith.constant 0 : index
    %c0_34 = arith.constant 0 : index
    %47 = vector.load %arg11[%c0_33, %c0_34] : memref<32x128xf32, #tpu.memory_space<vmem>>, vector<32x128xf32>
    %cst_35 = arith.constant dense<0.000000e+00> : vector<2x128xf32>
    %48 = tpu.matmul %5, %47, %cst_35 {dimension_numbers = #tpu.dot_dimension_numbers<[1], [0], [0], [1], [0, 0, 1, 1], [], []>} : vector<2x32xf32>, vector<32x128xf32>, vector<2x128xf32> -> vector<2x128xf32>
    %49 = arith.addf %46, %48 : vector<2x128xf32>
    %50 = vector.broadcast %4 : vector<1x128xf32> to vector<2x128xf32>
    %51 = arith.addf %49, %50 : vector<2x128xf32>
    %52 = vector.extract_strided_slice %51 {offsets = [0, 0], sizes = [2, 96], strides = [1, 1]} : vector<2x128xf32> to vector<2x96xf32>
    %53 = arith.negf %52 : vector<2x96xf32>
    %54 = math.exp %53 : vector<2x96xf32>
    %cst_36 = arith.constant 1.000000e+00 : f32
    %55 = vector.broadcast %cst_36 : f32 to vector<2x96xf32>
    %56 = arith.addf %55, %54 : vector<2x96xf32>
    %57 = arith.divf %55, %56 : vector<2x96xf32>
    %58 = vector.extract_strided_slice %51 {offsets = [0, 96], sizes = [2, 32], strides = [1, 1]} : vector<2x128xf32> to vector<2x32xf32>
    %59 = math.tanh %58 : vector<2x32xf32>
    %60 = vector.extract_strided_slice %57 {offsets = [0, 32], sizes = [2, 32], strides = [1, 1]} : vector<2x96xf32> to vector<2x32xf32>
    %61 = arith.mulf %60, %6 : vector<2x32xf32>
    %62 = vector.extract_strided_slice %57 {offsets = [0, 0], sizes = [2, 32], strides = [1, 1]} : vector<2x96xf32> to vector<2x32xf32>
    %63 = arith.mulf %62, %59 : vector<2x32xf32>
    %64 = arith.addf %61, %63 : vector<2x32xf32>
    %65 = vector.extract_strided_slice %57 {offsets = [0, 64], sizes = [2, 32], strides = [1, 1]} : vector<2x96xf32> to vector<2x32xf32>
    %66 = math.tanh %64 : vector<2x32xf32>
    %67 = arith.mulf %65, %66 : vector<2x32xf32>
    %c0_37 = arith.constant 0 : index
    %c0_38 = arith.constant 0 : index
    %68 = vector.load %arg7[%c0_37, %c0_38] : memref<32x64xf32, #tpu.memory_space<vmem>>, vector<32x64xf32>
    %cst_39 = arith.constant dense<0.000000e+00> : vector<2x64xf32>
    %69 = tpu.matmul %67, %68, %cst_39 {dimension_numbers = #tpu.dot_dimension_numbers<[1], [0], [0], [1], [0, 0, 1, 1], [], []>} : vector<2x32xf32>, vector<32x64xf32>, vector<2x64xf32> -> vector<2x64xf32>
    %70 = vector.shape_cast %69 : vector<2x64xf32> to vector<2x1x64xf32>
    %c0_40 = arith.constant 0 : index
    %c0_41 = arith.constant 0 : index
    %c0_42 = arith.constant 0 : index
    %71 = vector.load %arg3[%c0_40, %c0_41, %c0_42] : memref<2x16x64xf32, #tpu.memory_space<vmem>>, vector<2x16x64xf32>
    %72 = vector.broadcast %70 : vector<2x1x64xf32> to vector<2x16x64xf32>
    %73 = arith.addf %72, %71 : vector<2x16x64xf32>
    %74 = math.tanh %73 : vector<2x16x64xf32>
    %75 = vector.shape_cast %2 : vector<1x64xf32> to vector<1x1x64xf32>
    %76 = vector.broadcast %75 : vector<1x1x64xf32> to vector<2x16x64xf32>
    %77 = arith.mulf %74, %76 : vector<2x16x64xf32>
    %cst_43 = arith.constant dense<0.000000e+00> : vector<2x16xf32>
    %78 = vector.multi_reduction <add>, %77, %cst_43 [2] : vector<2x16x64xf32> to vector<2x16xf32>
    %79 = arith.addf %78, %0 : vector<2x16xf32>
    %80 = math.exp %79 : vector<2x16xf32>
    %81 = vector.shape_cast %3 : vector<1x64xf32> to vector<1x1x64xf32>
    %82 = vector.broadcast %81 : vector<1x1x64xf32> to vector<2x16x64xf32>
    %83 = arith.mulf %74, %82 : vector<2x16x64xf32>
    %cst_44 = arith.constant dense<0.000000e+00> : vector<2x16xf32>
    %84 = vector.multi_reduction <add>, %83, %cst_44 [2] : vector<2x16x64xf32> to vector<2x16xf32>
    %85 = arith.addf %84, %1 : vector<2x16xf32>
    %86 = math.exp %85 : vector<2x16xf32>
    %cst_45 = arith.constant dense<0.000000e+00> : vector<2xf32>
    %87 = vector.multi_reduction <add>, %80, %cst_45 [1] : vector<2x16xf32> to vector<2xf32>
    %88 = vector.shape_cast %87 : vector<2xf32> to vector<2x1xf32>
    %89 = tpu.reciprocal %88 {approx = true} : vector<2x1xf32> -> vector<2x1xf32>
    %90 = vector.broadcast %89 : vector<2x1xf32> to vector<2x16xf32>
    %91 = arith.mulf %80, %90 : vector<2x16xf32>
    %cst_46 = arith.constant dense<0.000000e+00> : vector<2xf32>
    %92 = vector.multi_reduction <add>, %86, %cst_46 [1] : vector<2x16xf32> to vector<2xf32>
    %93 = vector.shape_cast %92 : vector<2xf32> to vector<2x1xf32>
    %94 = tpu.reciprocal %93 {approx = true} : vector<2x1xf32> -> vector<2x1xf32>
    %95 = vector.broadcast %94 : vector<2x1xf32> to vector<2x16xf32>
    %96 = arith.mulf %86, %95 : vector<2x16xf32>
    %97 = vector.shape_cast %91 : vector<2x16xf32> to vector<2x1x16xf32>
    %c0_47 = arith.constant 0 : index
    %c0_48 = arith.constant 0 : index
    %c0_49 = arith.constant 0 : index
    %98 = vector.load %arg2[%c0_47, %c0_48, %c0_49] : memref<2x16x32xf32, #tpu.memory_space<vmem>>, vector<2x16x32xf32>
    "tpu.trace_start"() <{level = 10 : i32, message = "bqs,bsh->bqh"}> : () -> ()
    %cst_50 = arith.constant dense<0.000000e+00> : vector<2x1x32xf32>
    %99 = tpu.matmul %97, %98, %cst_50 {dimension_numbers = #tpu.dot_dimension_numbers<[2], [1], [1], [2], [0, 0, 0, 1, 1, 2], [0], [0]>} : vector<2x1x16xf32>, vector<2x16x32xf32>, vector<2x1x32xf32> -> vector<2x1x32xf32>
    "tpu.trace_stop"() : () -> ()
    %100 = vector.shape_cast %99 : vector<2x1x32xf32> to vector<2x32xf32>
    %c1_51 = arith.constant 1 : index
    %c0_52 = arith.constant 0 : index
    %c0_53 = arith.constant 0 : index
    %101 = vector.load %arg0[%c1_51, %c0_52, %c0_53] : memref<8x2x32xf32, #tpu.memory_space<vmem>>, vector<1x2x32xf32>
    %102 = vector.shape_cast %101 : vector<1x2x32xf32> to vector<2x32xf32>
    %c0_54 = arith.constant 0 : index
    %c0_55 = arith.constant 0 : index
    %103 = vector.load %arg9[%c0_54, %c0_55] : memref<32x32xf32, #tpu.memory_space<vmem>>, vector<32x32xf32>
    %cst_56 = arith.constant dense<0.000000e+00> : vector<2x32xf32>
    %104 = tpu.matmul %100, %103, %cst_56 {dimension_numbers = #tpu.dot_dimension_numbers<[1], [0], [0], [1], [0, 0, 1, 1], [], []>} : vector<2x32xf32>, vector<32x32xf32>, vector<2x32xf32> -> vector<2x32xf32>
    %105 = arith.addf %102, %104 : vector<2x32xf32>
    %c0_57 = arith.constant 0 : index
    %c0_58 = arith.constant 0 : index
    %106 = vector.load %arg10[%c0_57, %c0_58] : memref<32x128xf32, #tpu.memory_space<vmem>>, vector<32x128xf32>
    %cst_59 = arith.constant dense<0.000000e+00> : vector<2x128xf32>
    %107 = tpu.matmul %105, %106, %cst_59 {dimension_numbers = #tpu.dot_dimension_numbers<[1], [0], [0], [1], [0, 0, 1, 1], [], []>} : vector<2x32xf32>, vector<32x128xf32>, vector<2x128xf32> -> vector<2x128xf32>
    %c0_60 = arith.constant 0 : index
    %c0_61 = arith.constant 0 : index
    %108 = vector.load %arg11[%c0_60, %c0_61] : memref<32x128xf32, #tpu.memory_space<vmem>>, vector<32x128xf32>
    %cst_62 = arith.constant dense<0.000000e+00> : vector<2x128xf32>
    %109 = tpu.matmul %67, %108, %cst_62 {dimension_numbers = #tpu.dot_dimension_numbers<[1], [0], [0], [1], [0, 0, 1, 1], [], []>} : vector<2x32xf32>, vector<32x128xf32>, vector<2x128xf32> -> vector<2x128xf32>
    %110 = arith.addf %107, %109 : vector<2x128xf32>
    %111 = vector.broadcast %4 : vector<1x128xf32> to vector<2x128xf32>
    %112 = arith.addf %110, %111 : vector<2x128xf32>
    %113 = vector.extract_strided_slice %112 {offsets = [0, 0], sizes = [2, 96], strides = [1, 1]} : vector<2x128xf32> to vector<2x96xf32>
    %114 = arith.negf %113 : vector<2x96xf32>
    %115 = math.exp %114 : vector<2x96xf32>
    %cst_63 = arith.constant 1.000000e+00 : f32
    %116 = vector.broadcast %cst_63 : f32 to vector<2x96xf32>
    %117 = arith.addf %116, %115 : vector<2x96xf32>
    %118 = arith.divf %116, %117 : vector<2x96xf32>
    %119 = vector.extract_strided_slice %112 {offsets = [0, 96], sizes = [2, 32], strides = [1, 1]} : vector<2x128xf32> to vector<2x32xf32>
    %120 = math.tanh %119 : vector<2x32xf32>
    %121 = vector.extract_strided_slice %118 {offsets = [0, 32], sizes = [2, 32], strides = [1, 1]} : vector<2x96xf32> to vector<2x32xf32>
    %122 = arith.mulf %121, %64 : vector<2x32xf32>
    %123 = vector.extract_strided_slice %118 {offsets = [0, 0], sizes = [2, 32], strides = [1, 1]} : vector<2x96xf32> to vector<2x32xf32>
    %124 = arith.mulf %123, %120 : vector<2x32xf32>
    %125 = arith.addf %122, %124 : vector<2x32xf32>
    %126 = vector.extract_strided_slice %118 {offsets = [0, 64], sizes = [2, 32], strides = [1, 1]} : vector<2x96xf32> to vector<2x32xf32>
    %127 = math.tanh %125 : vector<2x32xf32>
    %128 = arith.mulf %126, %127 : vector<2x32xf32>
    %c0_64 = arith.constant 0 : index
    %c0_65 = arith.constant 0 : index
    %129 = vector.load %arg7[%c0_64, %c0_65] : memref<32x64xf32, #tpu.memory_space<vmem>>, vector<32x64xf32>
    %cst_66 = arith.constant dense<0.000000e+00> : vector<2x64xf32>
    %130 = tpu.matmul %128, %129, %cst_66 {dimension_numbers = #tpu.dot_dimension_numbers<[1], [0], [0], [1], [0, 0, 1, 1], [], []>} : vector<2x32xf32>, vector<32x64xf32>, vector<2x64xf32> -> vector<2x64xf32>
    %131 = vector.shape_cast %130 : vector<2x64xf32> to vector<2x1x64xf32>
    %c0_67 = arith.constant 0 : index
    %c0_68 = arith.constant 0 : index
    %c0_69 = arith.constant 0 : index
    %132 = vector.load %arg3[%c0_67, %c0_68, %c0_69] : memref<2x16x64xf32, #tpu.memory_space<vmem>>, vector<2x16x64xf32>
    %133 = vector.broadcast %131 : vector<2x1x64xf32> to vector<2x16x64xf32>
    %134 = arith.addf %133, %132 : vector<2x16x64xf32>
    %135 = math.tanh %134 : vector<2x16x64xf32>
    %136 = vector.shape_cast %2 : vector<1x64xf32> to vector<1x1x64xf32>
    %137 = vector.broadcast %136 : vector<1x1x64xf32> to vector<2x16x64xf32>
    %138 = arith.mulf %135, %137 : vector<2x16x64xf32>
    %cst_70 = arith.constant dense<0.000000e+00> : vector<2x16xf32>
    %139 = vector.multi_reduction <add>, %138, %cst_70 [2] : vector<2x16x64xf32> to vector<2x16xf32>
    %140 = arith.addf %139, %0 : vector<2x16xf32>
    %141 = math.exp %140 : vector<2x16xf32>
    %142 = vector.shape_cast %3 : vector<1x64xf32> to vector<1x1x64xf32>
    %143 = vector.broadcast %142 : vector<1x1x64xf32> to vector<2x16x64xf32>
    %144 = arith.mulf %135, %143 : vector<2x16x64xf32>
    %cst_71 = arith.constant dense<0.000000e+00> : vector<2x16xf32>
    %145 = vector.multi_reduction <add>, %144, %cst_71 [2] : vector<2x16x64xf32> to vector<2x16xf32>
    %146 = arith.addf %145, %1 : vector<2x16xf32>
    %147 = math.exp %146 : vector<2x16xf32>
    %cst_72 = arith.constant dense<0.000000e+00> : vector<2xf32>
    %148 = vector.multi_reduction <add>, %141, %cst_72 [1] : vector<2x16xf32> to vector<2xf32>
    %149 = vector.shape_cast %148 : vector<2xf32> to vector<2x1xf32>
    %150 = tpu.reciprocal %149 {approx = true} : vector<2x1xf32> -> vector<2x1xf32>
    %151 = vector.broadcast %150 : vector<2x1xf32> to vector<2x16xf32>
    %152 = arith.mulf %141, %151 : vector<2x16xf32>
    %cst_73 = arith.constant dense<0.000000e+00> : vector<2xf32>
    %153 = vector.multi_reduction <add>, %147, %cst_73 [1] : vector<2x16xf32> to vector<2xf32>
    %154 = vector.shape_cast %153 : vector<2xf32> to vector<2x1xf32>
    %155 = tpu.reciprocal %154 {approx = true} : vector<2x1xf32> -> vector<2x1xf32>
    %156 = vector.broadcast %155 : vector<2x1xf32> to vector<2x16xf32>
    %157 = arith.mulf %147, %156 : vector<2x16xf32>
    %158 = vector.shape_cast %152 : vector<2x16xf32> to vector<2x1x16xf32>
    %c0_74 = arith.constant 0 : index
    %c0_75 = arith.constant 0 : index
    %c0_76 = arith.constant 0 : index
    %159 = vector.load %arg2[%c0_74, %c0_75, %c0_76] : memref<2x16x32xf32, #tpu.memory_space<vmem>>, vector<2x16x32xf32>
    "tpu.trace_start"() <{level = 10 : i32, message = "bqs,bsh->bqh"}> : () -> ()
    %cst_77 = arith.constant dense<0.000000e+00> : vector<2x1x32xf32>
    %160 = tpu.matmul %158, %159, %cst_77 {dimension_numbers = #tpu.dot_dimension_numbers<[2], [1], [1], [2], [0, 0, 0, 1, 1, 2], [0], [0]>} : vector<2x1x16xf32>, vector<2x16x32xf32>, vector<2x1x32xf32> -> vector<2x1x32xf32>
    "tpu.trace_stop"() : () -> ()
    %161 = vector.shape_cast %160 : vector<2x1x32xf32> to vector<2x32xf32>
    %c2_78 = arith.constant 2 : index
    %c0_79 = arith.constant 0 : index
    %c0_80 = arith.constant 0 : index
    %162 = vector.load %arg0[%c2_78, %c0_79, %c0_80] : memref<8x2x32xf32, #tpu.memory_space<vmem>>, vector<1x2x32xf32>
    %163 = vector.shape_cast %162 : vector<1x2x32xf32> to vector<2x32xf32>
    %c0_81 = arith.constant 0 : index
    %c0_82 = arith.constant 0 : index
    %164 = vector.load %arg9[%c0_81, %c0_82] : memref<32x32xf32, #tpu.memory_space<vmem>>, vector<32x32xf32>
    %cst_83 = arith.constant dense<0.000000e+00> : vector<2x32xf32>
    %165 = tpu.matmul %161, %164, %cst_83 {dimension_numbers = #tpu.dot_dimension_numbers<[1], [0], [0], [1], [0, 0, 1, 1], [], []>} : vector<2x32xf32>, vector<32x32xf32>, vector<2x32xf32> -> vector<2x32xf32>
    %166 = arith.addf %163, %165 : vector<2x32xf32>
    %c0_84 = arith.constant 0 : index
    %c0_85 = arith.constant 0 : index
    %167 = vector.load %arg10[%c0_84, %c0_85] : memref<32x128xf32, #tpu.memory_space<vmem>>, vector<32x128xf32>
    %cst_86 = arith.constant dense<0.000000e+00> : vector<2x128xf32>
    %168 = tpu.matmul %166, %167, %cst_86 {dimension_numbers = #tpu.dot_dimension_numbers<[1], [0], [0], [1], [0, 0, 1, 1], [], []>} : vector<2x32xf32>, vector<32x128xf32>, vector<2x128xf32> -> vector<2x128xf32>
    %c0_87 = arith.constant 0 : index
    %c0_88 = arith.constant 0 : index
    %169 = vector.load %arg11[%c0_87, %c0_88] : memref<32x128xf32, #tpu.memory_space<vmem>>, vector<32x128xf32>
    %cst_89 = arith.constant dense<0.000000e+00> : vector<2x128xf32>
    %170 = tpu.matmul %128, %169, %cst_89 {dimension_numbers = #tpu.dot_dimension_numbers<[1], [0], [0], [1], [0, 0, 1, 1], [], []>} : vector<2x32xf32>, vector<32x128xf32>, vector<2x128xf32> -> vector<2x128xf32>
    %171 = arith.addf %168, %170 : vector<2x128xf32>
    %172 = vector.broadcast %4 : vector<1x128xf32> to vector<2x128xf32>
    %173 = arith.addf %171, %172 : vector<2x128xf32>
    %174 = vector.extract_strided_slice %173 {offsets = [0, 0], sizes = [2, 96], strides = [1, 1]} : vector<2x128xf32> to vector<2x96xf32>
    %175 = arith.negf %174 : vector<2x96xf32>
    %176 = math.exp %175 : vector<2x96xf32>
    %cst_90 = arith.constant 1.000000e+00 : f32
    %177 = vector.broadcast %cst_90 : f32 to vector<2x96xf32>
    %178 = arith.addf %177, %176 : vector<2x96xf32>
    %179 = arith.divf %177, %178 : vector<2x96xf32>
    %180 = vector.extract_strided_slice %173 {offsets = [0, 96], sizes = [2, 32], strides = [1, 1]} : vector<2x128xf32> to vector<2x32xf32>
    %181 = math.tanh %180 : vector<2x32xf32>
    %182 = vector.extract_strided_slice %179 {offsets = [0, 32], sizes = [2, 32], strides = [1, 1]} : vector<2x96xf32> to vector<2x32xf32>
    %183 = arith.mulf %182, %125 : vector<2x32xf32>
    %184 = vector.extract_strided_slice %179 {offsets = [0, 0], sizes = [2, 32], strides = [1, 1]} : vector<2x96xf32> to vector<2x32xf32>
    %185 = arith.mulf %184, %181 : vector<2x32xf32>
    %186 = arith.addf %183, %185 : vector<2x32xf32>
    %187 = vector.extract_strided_slice %179 {offsets = [0, 64], sizes = [2, 32], strides = [1, 1]} : vector<2x96xf32> to vector<2x32xf32>
    %188 = math.tanh %186 : vector<2x32xf32>
    %189 = arith.mulf %187, %188 : vector<2x32xf32>
    %c0_91 = arith.constant 0 : index
    %c0_92 = arith.constant 0 : index
    %190 = vector.load %arg7[%c0_91, %c0_92] : memref<32x64xf32, #tpu.memory_space<vmem>>, vector<32x64xf32>
    %cst_93 = arith.constant dense<0.000000e+00> : vector<2x64xf32>
    %191 = tpu.matmul %189, %190, %cst_93 {dimension_numbers = #tpu.dot_dimension_numbers<[1], [0], [0], [1], [0, 0, 1, 1], [], []>} : vector<2x32xf32>, vector<32x64xf32>, vector<2x64xf32> -> vector<2x64xf32>
    %192 = vector.shape_cast %191 : vector<2x64xf32> to vector<2x1x64xf32>
    %c0_94 = arith.constant 0 : index
    %c0_95 = arith.constant 0 : index
    %c0_96 = arith.constant 0 : index
    %193 = vector.load %arg3[%c0_94, %c0_95, %c0_96] : memref<2x16x64xf32, #tpu.memory_space<vmem>>, vector<2x16x64xf32>
    %194 = vector.broadcast %192 : vector<2x1x64xf32> to vector<2x16x64xf32>
    %195 = arith.addf %194, %193 : vector<2x16x64xf32>
    %196 = math.tanh %195 : vector<2x16x64xf32>
    %197 = vector.shape_cast %2 : vector<1x64xf32> to vector<1x1x64xf32>
    %198 = vector.broadcast %197 : vector<1x1x64xf32> to vector<2x16x64xf32>
    %199 = arith.mulf %196, %198 : vector<2x16x64xf32>
    %cst_97 = arith.constant dense<0.000000e+00> : vector<2x16xf32>
    %200 = vector.multi_reduction <add>, %199, %cst_97 [2] : vector<2x16x64xf32> to vector<2x16xf32>
    %201 = arith.addf %200, %0 : vector<2x16xf32>
    %202 = math.exp %201 : vector<2x16xf32>
    %203 = vector.shape_cast %3 : vector<1x64xf32> to vector<1x1x64xf32>
    %204 = vector.broadcast %203 : vector<1x1x64xf32> to vector<2x16x64xf32>
    %205 = arith.mulf %196, %204 : vector<2x16x64xf32>
    %cst_98 = arith.constant dense<0.000000e+00> : vector<2x16xf32>
    %206 = vector.multi_reduction <add>, %205, %cst_98 [2] : vector<2x16x64xf32> to vector<2x16xf32>
    %207 = arith.addf %206, %1 : vector<2x16xf32>
    %208 = math.exp %207 : vector<2x16xf32>
    %cst_99 = arith.constant dense<0.000000e+00> : vector<2xf32>
    %209 = vector.multi_reduction <add>, %202, %cst_99 [1] : vector<2x16xf32> to vector<2xf32>
    %210 = vector.shape_cast %209 : vector<2xf32> to vector<2x1xf32>
    %211 = tpu.reciprocal %210 {approx = true} : vector<2x1xf32> -> vector<2x1xf32>
    %212 = vector.broadcast %211 : vector<2x1xf32> to vector<2x16xf32>
    %213 = arith.mulf %202, %212 : vector<2x16xf32>
    %cst_100 = arith.constant dense<0.000000e+00> : vector<2xf32>
    %214 = vector.multi_reduction <add>, %208, %cst_100 [1] : vector<2x16xf32> to vector<2xf32>
    %215 = vector.shape_cast %214 : vector<2xf32> to vector<2x1xf32>
    %216 = tpu.reciprocal %215 {approx = true} : vector<2x1xf32> -> vector<2x1xf32>
    %217 = vector.broadcast %216 : vector<2x1xf32> to vector<2x16xf32>
    %218 = arith.mulf %208, %217 : vector<2x16xf32>
    %219 = vector.shape_cast %213 : vector<2x16xf32> to vector<2x1x16xf32>
    %c0_101 = arith.constant 0 : index
    %c0_102 = arith.constant 0 : index
    %c0_103 = arith.constant 0 : index
    %220 = vector.load %arg2[%c0_101, %c0_102, %c0_103] : memref<2x16x32xf32, #tpu.memory_space<vmem>>, vector<2x16x32xf32>
    "tpu.trace_start"() <{level = 10 : i32, message = "bqs,bsh->bqh"}> : () -> ()
    %cst_104 = arith.constant dense<0.000000e+00> : vector<2x1x32xf32>
    %221 = tpu.matmul %219, %220, %cst_104 {dimension_numbers = #tpu.dot_dimension_numbers<[2], [1], [1], [2], [0, 0, 0, 1, 1, 2], [0], [0]>} : vector<2x1x16xf32>, vector<2x16x32xf32>, vector<2x1x32xf32> -> vector<2x1x32xf32>
    "tpu.trace_stop"() : () -> ()
    %222 = vector.shape_cast %221 : vector<2x1x32xf32> to vector<2x32xf32>
    %c3 = arith.constant 3 : index
    %c0_105 = arith.constant 0 : index
    %c0_106 = arith.constant 0 : index
    %223 = vector.load %arg0[%c3, %c0_105, %c0_106] : memref<8x2x32xf32, #tpu.memory_space<vmem>>, vector<1x2x32xf32>
    %224 = vector.shape_cast %223 : vector<1x2x32xf32> to vector<2x32xf32>
    %c0_107 = arith.constant 0 : index
    %c0_108 = arith.constant 0 : index
    %225 = vector.load %arg9[%c0_107, %c0_108] : memref<32x32xf32, #tpu.memory_space<vmem>>, vector<32x32xf32>
    %cst_109 = arith.constant dense<0.000000e+00> : vector<2x32xf32>
    %226 = tpu.matmul %222, %225, %cst_109 {dimension_numbers = #tpu.dot_dimension_numbers<[1], [0], [0], [1], [0, 0, 1, 1], [], []>} : vector<2x32xf32>, vector<32x32xf32>, vector<2x32xf32> -> vector<2x32xf32>
    %227 = arith.addf %224, %226 : vector<2x32xf32>
    %c0_110 = arith.constant 0 : index
    %c0_111 = arith.constant 0 : index
    %228 = vector.load %arg10[%c0_110, %c0_111] : memref<32x128xf32, #tpu.memory_space<vmem>>, vector<32x128xf32>
    %cst_112 = arith.constant dense<0.000000e+00> : vector<2x128xf32>
    %229 = tpu.matmul %227, %228, %cst_112 {dimension_numbers = #tpu.dot_dimension_numbers<[1], [0], [0], [1], [0, 0, 1, 1], [], []>} : vector<2x32xf32>, vector<32x128xf32>, vector<2x128xf32> -> vector<2x128xf32>
    %c0_113 = arith.constant 0 : index
    %c0_114 = arith.constant 0 : index
    %230 = vector.load %arg11[%c0_113, %c0_114] : memref<32x128xf32, #tpu.memory_space<vmem>>, vector<32x128xf32>
    %cst_115 = arith.constant dense<0.000000e+00> : vector<2x128xf32>
    %231 = tpu.matmul %189, %230, %cst_115 {dimension_numbers = #tpu.dot_dimension_numbers<[1], [0], [0], [1], [0, 0, 1, 1], [], []>} : vector<2x32xf32>, vector<32x128xf32>, vector<2x128xf32> -> vector<2x128xf32>
    %232 = arith.addf %229, %231 : vector<2x128xf32>
    %233 = vector.broadcast %4 : vector<1x128xf32> to vector<2x128xf32>
    %234 = arith.addf %232, %233 : vector<2x128xf32>
    %235 = vector.extract_strided_slice %234 {offsets = [0, 0], sizes = [2, 96], strides = [1, 1]} : vector<2x128xf32> to vector<2x96xf32>
    %236 = arith.negf %235 : vector<2x96xf32>
    %237 = math.exp %236 : vector<2x96xf32>
    %cst_116 = arith.constant 1.000000e+00 : f32
    %238 = vector.broadcast %cst_116 : f32 to vector<2x96xf32>
    %239 = arith.addf %238, %237 : vector<2x96xf32>
    %240 = arith.divf %238, %239 : vector<2x96xf32>
    %241 = vector.extract_strided_slice %234 {offsets = [0, 96], sizes = [2, 32], strides = [1, 1]} : vector<2x128xf32> to vector<2x32xf32>
    %242 = math.tanh %241 : vector<2x32xf32>
    %243 = vector.extract_strided_slice %240 {offsets = [0, 32], sizes = [2, 32], strides = [1, 1]} : vector<2x96xf32> to vector<2x32xf32>
    %244 = arith.mulf %243, %186 : vector<2x32xf32>
    %245 = vector.extract_strided_slice %240 {offsets = [0, 0], sizes = [2, 32], strides = [1, 1]} : vector<2x96xf32> to vector<2x32xf32>
    %246 = arith.mulf %245, %242 : vector<2x32xf32>
    %247 = arith.addf %244, %246 : vector<2x32xf32>
    %248 = vector.extract_strided_slice %240 {offsets = [0, 64], sizes = [2, 32], strides = [1, 1]} : vector<2x96xf32> to vector<2x32xf32>
    %249 = math.tanh %247 : vector<2x32xf32>
    %250 = arith.mulf %248, %249 : vector<2x32xf32>
    %c0_117 = arith.constant 0 : index
    %c0_118 = arith.constant 0 : index
    %251 = vector.load %arg7[%c0_117, %c0_118] : memref<32x64xf32, #tpu.memory_space<vmem>>, vector<32x64xf32>
    %cst_119 = arith.constant dense<0.000000e+00> : vector<2x64xf32>
    %252 = tpu.matmul %250, %251, %cst_119 {dimension_numbers = #tpu.dot_dimension_numbers<[1], [0], [0], [1], [0, 0, 1, 1], [], []>} : vector<2x32xf32>, vector<32x64xf32>, vector<2x64xf32> -> vector<2x64xf32>
    %253 = vector.shape_cast %252 : vector<2x64xf32> to vector<2x1x64xf32>
    %c0_120 = arith.constant 0 : index
    %c0_121 = arith.constant 0 : index
    %c0_122 = arith.constant 0 : index
    %254 = vector.load %arg3[%c0_120, %c0_121, %c0_122] : memref<2x16x64xf32, #tpu.memory_space<vmem>>, vector<2x16x64xf32>
    %255 = vector.broadcast %253 : vector<2x1x64xf32> to vector<2x16x64xf32>
    %256 = arith.addf %255, %254 : vector<2x16x64xf32>
    %257 = math.tanh %256 : vector<2x16x64xf32>
    %258 = vector.shape_cast %2 : vector<1x64xf32> to vector<1x1x64xf32>
    %259 = vector.broadcast %258 : vector<1x1x64xf32> to vector<2x16x64xf32>
    %260 = arith.mulf %257, %259 : vector<2x16x64xf32>
    %cst_123 = arith.constant dense<0.000000e+00> : vector<2x16xf32>
    %261 = vector.multi_reduction <add>, %260, %cst_123 [2] : vector<2x16x64xf32> to vector<2x16xf32>
    %262 = arith.addf %261, %0 : vector<2x16xf32>
    %263 = math.exp %262 : vector<2x16xf32>
    %264 = vector.shape_cast %3 : vector<1x64xf32> to vector<1x1x64xf32>
    %265 = vector.broadcast %264 : vector<1x1x64xf32> to vector<2x16x64xf32>
    %266 = arith.mulf %257, %265 : vector<2x16x64xf32>
    %cst_124 = arith.constant dense<0.000000e+00> : vector<2x16xf32>
    %267 = vector.multi_reduction <add>, %266, %cst_124 [2] : vector<2x16x64xf32> to vector<2x16xf32>
    %268 = arith.addf %267, %1 : vector<2x16xf32>
    %269 = math.exp %268 : vector<2x16xf32>
    %cst_125 = arith.constant dense<0.000000e+00> : vector<2xf32>
    %270 = vector.multi_reduction <add>, %263, %cst_125 [1] : vector<2x16xf32> to vector<2xf32>
    %271 = vector.shape_cast %270 : vector<2xf32> to vector<2x1xf32>
    %272 = tpu.reciprocal %271 {approx = true} : vector<2x1xf32> -> vector<2x1xf32>
    %273 = vector.broadcast %272 : vector<2x1xf32> to vector<2x16xf32>
    %274 = arith.mulf %263, %273 : vector<2x16xf32>
    %cst_126 = arith.constant dense<0.000000e+00> : vector<2xf32>
    %275 = vector.multi_reduction <add>, %269, %cst_126 [1] : vector<2x16xf32> to vector<2xf32>
    %276 = vector.shape_cast %275 : vector<2xf32> to vector<2x1xf32>
    %277 = tpu.reciprocal %276 {approx = true} : vector<2x1xf32> -> vector<2x1xf32>
    %278 = vector.broadcast %277 : vector<2x1xf32> to vector<2x16xf32>
    %279 = arith.mulf %269, %278 : vector<2x16xf32>
    %280 = vector.shape_cast %274 : vector<2x16xf32> to vector<2x1x16xf32>
    %c0_127 = arith.constant 0 : index
    %c0_128 = arith.constant 0 : index
    %c0_129 = arith.constant 0 : index
    %281 = vector.load %arg2[%c0_127, %c0_128, %c0_129] : memref<2x16x32xf32, #tpu.memory_space<vmem>>, vector<2x16x32xf32>
    "tpu.trace_start"() <{level = 10 : i32, message = "bqs,bsh->bqh"}> : () -> ()
    %cst_130 = arith.constant dense<0.000000e+00> : vector<2x1x32xf32>
    %282 = tpu.matmul %280, %281, %cst_130 {dimension_numbers = #tpu.dot_dimension_numbers<[2], [1], [1], [2], [0, 0, 0, 1, 1, 2], [0], [0]>} : vector<2x1x16xf32>, vector<2x16x32xf32>, vector<2x1x32xf32> -> vector<2x1x32xf32>
    "tpu.trace_stop"() : () -> ()
    %283 = vector.shape_cast %282 : vector<2x1x32xf32> to vector<2x32xf32>
    %c4 = arith.constant 4 : index
    %c0_131 = arith.constant 0 : index
    %c0_132 = arith.constant 0 : index
    %284 = vector.load %arg0[%c4, %c0_131, %c0_132] : memref<8x2x32xf32, #tpu.memory_space<vmem>>, vector<1x2x32xf32>
    %285 = vector.shape_cast %284 : vector<1x2x32xf32> to vector<2x32xf32>
    %c0_133 = arith.constant 0 : index
    %c0_134 = arith.constant 0 : index
    %286 = vector.load %arg9[%c0_133, %c0_134] : memref<32x32xf32, #tpu.memory_space<vmem>>, vector<32x32xf32>
    %cst_135 = arith.constant dense<0.000000e+00> : vector<2x32xf32>
    %287 = tpu.matmul %283, %286, %cst_135 {dimension_numbers = #tpu.dot_dimension_numbers<[1], [0], [0], [1], [0, 0, 1, 1], [], []>} : vector<2x32xf32>, vector<32x32xf32>, vector<2x32xf32> -> vector<2x32xf32>
    %288 = arith.addf %285, %287 : vector<2x32xf32>
    %c0_136 = arith.constant 0 : index
    %c0_137 = arith.constant 0 : index
    %289 = vector.load %arg10[%c0_136, %c0_137] : memref<32x128xf32, #tpu.memory_space<vmem>>, vector<32x128xf32>
    %cst_138 = arith.constant dense<0.000000e+00> : vector<2x128xf32>
    %290 = tpu.matmul %288, %289, %cst_138 {dimension_numbers = #tpu.dot_dimension_numbers<[1], [0], [0], [1], [0, 0, 1, 1], [], []>} : vector<2x32xf32>, vector<32x128xf32>, vector<2x128xf32> -> vector<2x128xf32>
    %c0_139 = arith.constant 0 : index
    %c0_140 = arith.constant 0 : index
    %291 = vector.load %arg11[%c0_139, %c0_140] : memref<32x128xf32, #tpu.memory_space<vmem>>, vector<32x128xf32>
    %cst_141 = arith.constant dense<0.000000e+00> : vector<2x128xf32>
    %292 = tpu.matmul %250, %291, %cst_141 {dimension_numbers = #tpu.dot_dimension_numbers<[1], [0], [0], [1], [0, 0, 1, 1], [], []>} : vector<2x32xf32>, vector<32x128xf32>, vector<2x128xf32> -> vector<2x128xf32>
    %293 = arith.addf %290, %292 : vector<2x128xf32>
    %294 = vector.broadcast %4 : vector<1x128xf32> to vector<2x128xf32>
    %295 = arith.addf %293, %294 : vector<2x128xf32>
    %296 = vector.extract_strided_slice %295 {offsets = [0, 0], sizes = [2, 96], strides = [1, 1]} : vector<2x128xf32> to vector<2x96xf32>
    %297 = arith.negf %296 : vector<2x96xf32>
    %298 = math.exp %297 : vector<2x96xf32>
    %cst_142 = arith.constant 1.000000e+00 : f32
    %299 = vector.broadcast %cst_142 : f32 to vector<2x96xf32>
    %300 = arith.addf %299, %298 : vector<2x96xf32>
    %301 = arith.divf %299, %300 : vector<2x96xf32>
    %302 = vector.extract_strided_slice %295 {offsets = [0, 96], sizes = [2, 32], strides = [1, 1]} : vector<2x128xf32> to vector<2x32xf32>
    %303 = math.tanh %302 : vector<2x32xf32>
    %304 = vector.extract_strided_slice %301 {offsets = [0, 32], sizes = [2, 32], strides = [1, 1]} : vector<2x96xf32> to vector<2x32xf32>
    %305 = arith.mulf %304, %247 : vector<2x32xf32>
    %306 = vector.extract_strided_slice %301 {offsets = [0, 0], sizes = [2, 32], strides = [1, 1]} : vector<2x96xf32> to vector<2x32xf32>
    %307 = arith.mulf %306, %303 : vector<2x32xf32>
    %308 = arith.addf %305, %307 : vector<2x32xf32>
    %309 = vector.extract_strided_slice %301 {offsets = [0, 64], sizes = [2, 32], strides = [1, 1]} : vector<2x96xf32> to vector<2x32xf32>
    %310 = math.tanh %308 : vector<2x32xf32>
    %311 = arith.mulf %309, %310 : vector<2x32xf32>
    %c0_143 = arith.constant 0 : index
    %c0_144 = arith.constant 0 : index
    %312 = vector.load %arg7[%c0_143, %c0_144] : memref<32x64xf32, #tpu.memory_space<vmem>>, vector<32x64xf32>
    %cst_145 = arith.constant dense<0.000000e+00> : vector<2x64xf32>
    %313 = tpu.matmul %311, %312, %cst_145 {dimension_numbers = #tpu.dot_dimension_numbers<[1], [0], [0], [1], [0, 0, 1, 1], [], []>} : vector<2x32xf32>, vector<32x64xf32>, vector<2x64xf32> -> vector<2x64xf32>
    %314 = vector.shape_cast %313 : vector<2x64xf32> to vector<2x1x64xf32>
    %c0_146 = arith.constant 0 : index
    %c0_147 = arith.constant 0 : index
    %c0_148 = arith.constant 0 : index
    %315 = vector.load %arg3[%c0_146, %c0_147, %c0_148] : memref<2x16x64xf32, #tpu.memory_space<vmem>>, vector<2x16x64xf32>
    %316 = vector.broadcast %314 : vector<2x1x64xf32> to vector<2x16x64xf32>
    %317 = arith.addf %316, %315 : vector<2x16x64xf32>
    %318 = math.tanh %317 : vector<2x16x64xf32>
    %319 = vector.shape_cast %2 : vector<1x64xf32> to vector<1x1x64xf32>
    %320 = vector.broadcast %319 : vector<1x1x64xf32> to vector<2x16x64xf32>
    %321 = arith.mulf %318, %320 : vector<2x16x64xf32>
    %cst_149 = arith.constant dense<0.000000e+00> : vector<2x16xf32>
    %322 = vector.multi_reduction <add>, %321, %cst_149 [2] : vector<2x16x64xf32> to vector<2x16xf32>
    %323 = arith.addf %322, %0 : vector<2x16xf32>
    %324 = math.exp %323 : vector<2x16xf32>
    %325 = vector.shape_cast %3 : vector<1x64xf32> to vector<1x1x64xf32>
    %326 = vector.broadcast %325 : vector<1x1x64xf32> to vector<2x16x64xf32>
    %327 = arith.mulf %318, %326 : vector<2x16x64xf32>
    %cst_150 = arith.constant dense<0.000000e+00> : vector<2x16xf32>
    %328 = vector.multi_reduction <add>, %327, %cst_150 [2] : vector<2x16x64xf32> to vector<2x16xf32>
    %329 = arith.addf %328, %1 : vector<2x16xf32>
    %330 = math.exp %329 : vector<2x16xf32>
    %cst_151 = arith.constant dense<0.000000e+00> : vector<2xf32>
    %331 = vector.multi_reduction <add>, %324, %cst_151 [1] : vector<2x16xf32> to vector<2xf32>
    %332 = vector.shape_cast %331 : vector<2xf32> to vector<2x1xf32>
    %333 = tpu.reciprocal %332 {approx = true} : vector<2x1xf32> -> vector<2x1xf32>
    %334 = vector.broadcast %333 : vector<2x1xf32> to vector<2x16xf32>
    %335 = arith.mulf %324, %334 : vector<2x16xf32>
    %cst_152 = arith.constant dense<0.000000e+00> : vector<2xf32>
    %336 = vector.multi_reduction <add>, %330, %cst_152 [1] : vector<2x16xf32> to vector<2xf32>
    %337 = vector.shape_cast %336 : vector<2xf32> to vector<2x1xf32>
    %338 = tpu.reciprocal %337 {approx = true} : vector<2x1xf32> -> vector<2x1xf32>
    %339 = vector.broadcast %338 : vector<2x1xf32> to vector<2x16xf32>
    %340 = arith.mulf %330, %339 : vector<2x16xf32>
    %341 = vector.shape_cast %335 : vector<2x16xf32> to vector<2x1x16xf32>
    %c0_153 = arith.constant 0 : index
    %c0_154 = arith.constant 0 : index
    %c0_155 = arith.constant 0 : index
    %342 = vector.load %arg2[%c0_153, %c0_154, %c0_155] : memref<2x16x32xf32, #tpu.memory_space<vmem>>, vector<2x16x32xf32>
    "tpu.trace_start"() <{level = 10 : i32, message = "bqs,bsh->bqh"}> : () -> ()
    %cst_156 = arith.constant dense<0.000000e+00> : vector<2x1x32xf32>
    %343 = tpu.matmul %341, %342, %cst_156 {dimension_numbers = #tpu.dot_dimension_numbers<[2], [1], [1], [2], [0, 0, 0, 1, 1, 2], [0], [0]>} : vector<2x1x16xf32>, vector<2x16x32xf32>, vector<2x1x32xf32> -> vector<2x1x32xf32>
    "tpu.trace_stop"() : () -> ()
    %344 = vector.shape_cast %343 : vector<2x1x32xf32> to vector<2x32xf32>
    %c5 = arith.constant 5 : index
    %c0_157 = arith.constant 0 : index
    %c0_158 = arith.constant 0 : index
    %345 = vector.load %arg0[%c5, %c0_157, %c0_158] : memref<8x2x32xf32, #tpu.memory_space<vmem>>, vector<1x2x32xf32>
    %346 = vector.shape_cast %345 : vector<1x2x32xf32> to vector<2x32xf32>
    %c0_159 = arith.constant 0 : index
    %c0_160 = arith.constant 0 : index
    %347 = vector.load %arg9[%c0_159, %c0_160] : memref<32x32xf32, #tpu.memory_space<vmem>>, vector<32x32xf32>
    %cst_161 = arith.constant dense<0.000000e+00> : vector<2x32xf32>
    %348 = tpu.matmul %344, %347, %cst_161 {dimension_numbers = #tpu.dot_dimension_numbers<[1], [0], [0], [1], [0, 0, 1, 1], [], []>} : vector<2x32xf32>, vector<32x32xf32>, vector<2x32xf32> -> vector<2x32xf32>
    %349 = arith.addf %346, %348 : vector<2x32xf32>
    %c0_162 = arith.constant 0 : index
    %c0_163 = arith.constant 0 : index
    %350 = vector.load %arg10[%c0_162, %c0_163] : memref<32x128xf32, #tpu.memory_space<vmem>>, vector<32x128xf32>
    %cst_164 = arith.constant dense<0.000000e+00> : vector<2x128xf32>
    %351 = tpu.matmul %349, %350, %cst_164 {dimension_numbers = #tpu.dot_dimension_numbers<[1], [0], [0], [1], [0, 0, 1, 1], [], []>} : vector<2x32xf32>, vector<32x128xf32>, vector<2x128xf32> -> vector<2x128xf32>
    %c0_165 = arith.constant 0 : index
    %c0_166 = arith.constant 0 : index
    %352 = vector.load %arg11[%c0_165, %c0_166] : memref<32x128xf32, #tpu.memory_space<vmem>>, vector<32x128xf32>
    %cst_167 = arith.constant dense<0.000000e+00> : vector<2x128xf32>
    %353 = tpu.matmul %311, %352, %cst_167 {dimension_numbers = #tpu.dot_dimension_numbers<[1], [0], [0], [1], [0, 0, 1, 1], [], []>} : vector<2x32xf32>, vector<32x128xf32>, vector<2x128xf32> -> vector<2x128xf32>
    %354 = arith.addf %351, %353 : vector<2x128xf32>
    %355 = vector.broadcast %4 : vector<1x128xf32> to vector<2x128xf32>
    %356 = arith.addf %354, %355 : vector<2x128xf32>
    %357 = vector.extract_strided_slice %356 {offsets = [0, 0], sizes = [2, 96], strides = [1, 1]} : vector<2x128xf32> to vector<2x96xf32>
    %358 = arith.negf %357 : vector<2x96xf32>
    %359 = math.exp %358 : vector<2x96xf32>
    %cst_168 = arith.constant 1.000000e+00 : f32
    %360 = vector.broadcast %cst_168 : f32 to vector<2x96xf32>
    %361 = arith.addf %360, %359 : vector<2x96xf32>
    %362 = arith.divf %360, %361 : vector<2x96xf32>
    %363 = vector.extract_strided_slice %356 {offsets = [0, 96], sizes = [2, 32], strides = [1, 1]} : vector<2x128xf32> to vector<2x32xf32>
    %364 = math.tanh %363 : vector<2x32xf32>
    %365 = vector.extract_strided_slice %362 {offsets = [0, 32], sizes = [2, 32], strides = [1, 1]} : vector<2x96xf32> to vector<2x32xf32>
    %366 = arith.mulf %365, %308 : vector<2x32xf32>
    %367 = vector.extract_strided_slice %362 {offsets = [0, 0], sizes = [2, 32], strides = [1, 1]} : vector<2x96xf32> to vector<2x32xf32>
    %368 = arith.mulf %367, %364 : vector<2x32xf32>
    %369 = arith.addf %366, %368 : vector<2x32xf32>
    %370 = vector.extract_strided_slice %362 {offsets = [0, 64], sizes = [2, 32], strides = [1, 1]} : vector<2x96xf32> to vector<2x32xf32>
    %371 = math.tanh %369 : vector<2x32xf32>
    %372 = arith.mulf %370, %371 : vector<2x32xf32>
    %c0_169 = arith.constant 0 : index
    %c0_170 = arith.constant 0 : index
    %373 = vector.load %arg7[%c0_169, %c0_170] : memref<32x64xf32, #tpu.memory_space<vmem>>, vector<32x64xf32>
    %cst_171 = arith.constant dense<0.000000e+00> : vector<2x64xf32>
    %374 = tpu.matmul %372, %373, %cst_171 {dimension_numbers = #tpu.dot_dimension_numbers<[1], [0], [0], [1], [0, 0, 1, 1], [], []>} : vector<2x32xf32>, vector<32x64xf32>, vector<2x64xf32> -> vector<2x64xf32>
    %375 = vector.shape_cast %374 : vector<2x64xf32> to vector<2x1x64xf32>
    %c0_172 = arith.constant 0 : index
    %c0_173 = arith.constant 0 : index
    %c0_174 = arith.constant 0 : index
    %376 = vector.load %arg3[%c0_172, %c0_173, %c0_174] : memref<2x16x64xf32, #tpu.memory_space<vmem>>, vector<2x16x64xf32>
    %377 = vector.broadcast %375 : vector<2x1x64xf32> to vector<2x16x64xf32>
    %378 = arith.addf %377, %376 : vector<2x16x64xf32>
    %379 = math.tanh %378 : vector<2x16x64xf32>
    %380 = vector.shape_cast %2 : vector<1x64xf32> to vector<1x1x64xf32>
    %381 = vector.broadcast %380 : vector<1x1x64xf32> to vector<2x16x64xf32>
    %382 = arith.mulf %379, %381 : vector<2x16x64xf32>
    %cst_175 = arith.constant dense<0.000000e+00> : vector<2x16xf32>
    %383 = vector.multi_reduction <add>, %382, %cst_175 [2] : vector<2x16x64xf32> to vector<2x16xf32>
    %384 = arith.addf %383, %0 : vector<2x16xf32>
    %385 = math.exp %384 : vector<2x16xf32>
    %386 = vector.shape_cast %3 : vector<1x64xf32> to vector<1x1x64xf32>
    %387 = vector.broadcast %386 : vector<1x1x64xf32> to vector<2x16x64xf32>
    %388 = arith.mulf %379, %387 : vector<2x16x64xf32>
    %cst_176 = arith.constant dense<0.000000e+00> : vector<2x16xf32>
    %389 = vector.multi_reduction <add>, %388, %cst_176 [2] : vector<2x16x64xf32> to vector<2x16xf32>
    %390 = arith.addf %389, %1 : vector<2x16xf32>
    %391 = math.exp %390 : vector<2x16xf32>
    %cst_177 = arith.constant dense<0.000000e+00> : vector<2xf32>
    %392 = vector.multi_reduction <add>, %385, %cst_177 [1] : vector<2x16xf32> to vector<2xf32>
    %393 = vector.shape_cast %392 : vector<2xf32> to vector<2x1xf32>
    %394 = tpu.reciprocal %393 {approx = true} : vector<2x1xf32> -> vector<2x1xf32>
    %395 = vector.broadcast %394 : vector<2x1xf32> to vector<2x16xf32>
    %396 = arith.mulf %385, %395 : vector<2x16xf32>
    %cst_178 = arith.constant dense<0.000000e+00> : vector<2xf32>
    %397 = vector.multi_reduction <add>, %391, %cst_178 [1] : vector<2x16xf32> to vector<2xf32>
    %398 = vector.shape_cast %397 : vector<2xf32> to vector<2x1xf32>
    %399 = tpu.reciprocal %398 {approx = true} : vector<2x1xf32> -> vector<2x1xf32>
    %400 = vector.broadcast %399 : vector<2x1xf32> to vector<2x16xf32>
    %401 = arith.mulf %391, %400 : vector<2x16xf32>
    %402 = vector.shape_cast %396 : vector<2x16xf32> to vector<2x1x16xf32>
    %c0_179 = arith.constant 0 : index
    %c0_180 = arith.constant 0 : index
    %c0_181 = arith.constant 0 : index
    %403 = vector.load %arg2[%c0_179, %c0_180, %c0_181] : memref<2x16x32xf32, #tpu.memory_space<vmem>>, vector<2x16x32xf32>
    "tpu.trace_start"() <{level = 10 : i32, message = "bqs,bsh->bqh"}> : () -> ()
    %cst_182 = arith.constant dense<0.000000e+00> : vector<2x1x32xf32>
    %404 = tpu.matmul %402, %403, %cst_182 {dimension_numbers = #tpu.dot_dimension_numbers<[2], [1], [1], [2], [0, 0, 0, 1, 1, 2], [0], [0]>} : vector<2x1x16xf32>, vector<2x16x32xf32>, vector<2x1x32xf32> -> vector<2x1x32xf32>
    "tpu.trace_stop"() : () -> ()
    %405 = vector.shape_cast %404 : vector<2x1x32xf32> to vector<2x32xf32>
    %c6 = arith.constant 6 : index
    %c0_183 = arith.constant 0 : index
    %c0_184 = arith.constant 0 : index
    %406 = vector.load %arg0[%c6, %c0_183, %c0_184] : memref<8x2x32xf32, #tpu.memory_space<vmem>>, vector<1x2x32xf32>
    %407 = vector.shape_cast %406 : vector<1x2x32xf32> to vector<2x32xf32>
    %c0_185 = arith.constant 0 : index
    %c0_186 = arith.constant 0 : index
    %408 = vector.load %arg9[%c0_185, %c0_186] : memref<32x32xf32, #tpu.memory_space<vmem>>, vector<32x32xf32>
    %cst_187 = arith.constant dense<0.000000e+00> : vector<2x32xf32>
    %409 = tpu.matmul %405, %408, %cst_187 {dimension_numbers = #tpu.dot_dimension_numbers<[1], [0], [0], [1], [0, 0, 1, 1], [], []>} : vector<2x32xf32>, vector<32x32xf32>, vector<2x32xf32> -> vector<2x32xf32>
    %410 = arith.addf %407, %409 : vector<2x32xf32>
    %c0_188 = arith.constant 0 : index
    %c0_189 = arith.constant 0 : index
    %411 = vector.load %arg10[%c0_188, %c0_189] : memref<32x128xf32, #tpu.memory_space<vmem>>, vector<32x128xf32>
    %cst_190 = arith.constant dense<0.000000e+00> : vector<2x128xf32>
    %412 = tpu.matmul %410, %411, %cst_190 {dimension_numbers = #tpu.dot_dimension_numbers<[1], [0], [0], [1], [0, 0, 1, 1], [], []>} : vector<2x32xf32>, vector<32x128xf32>, vector<2x128xf32> -> vector<2x128xf32>
    %c0_191 = arith.constant 0 : index
    %c0_192 = arith.constant 0 : index
    %413 = vector.load %arg11[%c0_191, %c0_192] : memref<32x128xf32, #tpu.memory_space<vmem>>, vector<32x128xf32>
    %cst_193 = arith.constant dense<0.000000e+00> : vector<2x128xf32>
    %414 = tpu.matmul %372, %413, %cst_193 {dimension_numbers = #tpu.dot_dimension_numbers<[1], [0], [0], [1], [0, 0, 1, 1], [], []>} : vector<2x32xf32>, vector<32x128xf32>, vector<2x128xf32> -> vector<2x128xf32>
    %415 = arith.addf %412, %414 : vector<2x128xf32>
    %416 = vector.broadcast %4 : vector<1x128xf32> to vector<2x128xf32>
    %417 = arith.addf %415, %416 : vector<2x128xf32>
    %418 = vector.extract_strided_slice %417 {offsets = [0, 0], sizes = [2, 96], strides = [1, 1]} : vector<2x128xf32> to vector<2x96xf32>
    %419 = arith.negf %418 : vector<2x96xf32>
    %420 = math.exp %419 : vector<2x96xf32>
    %cst_194 = arith.constant 1.000000e+00 : f32
    %421 = vector.broadcast %cst_194 : f32 to vector<2x96xf32>
    %422 = arith.addf %421, %420 : vector<2x96xf32>
    %423 = arith.divf %421, %422 : vector<2x96xf32>
    %424 = vector.extract_strided_slice %417 {offsets = [0, 96], sizes = [2, 32], strides = [1, 1]} : vector<2x128xf32> to vector<2x32xf32>
    %425 = math.tanh %424 : vector<2x32xf32>
    %426 = vector.extract_strided_slice %423 {offsets = [0, 32], sizes = [2, 32], strides = [1, 1]} : vector<2x96xf32> to vector<2x32xf32>
    %427 = arith.mulf %426, %369 : vector<2x32xf32>
    %428 = vector.extract_strided_slice %423 {offsets = [0, 0], sizes = [2, 32], strides = [1, 1]} : vector<2x96xf32> to vector<2x32xf32>
    %429 = arith.mulf %428, %425 : vector<2x32xf32>
    %430 = arith.addf %427, %429 : vector<2x32xf32>
    %431 = vector.extract_strided_slice %423 {offsets = [0, 64], sizes = [2, 32], strides = [1, 1]} : vector<2x96xf32> to vector<2x32xf32>
    %432 = math.tanh %430 : vector<2x32xf32>
    %433 = arith.mulf %431, %432 : vector<2x32xf32>
    %c0_195 = arith.constant 0 : index
    %c0_196 = arith.constant 0 : index
    %434 = vector.load %arg7[%c0_195, %c0_196] : memref<32x64xf32, #tpu.memory_space<vmem>>, vector<32x64xf32>
    %cst_197 = arith.constant dense<0.000000e+00> : vector<2x64xf32>
    %435 = tpu.matmul %433, %434, %cst_197 {dimension_numbers = #tpu.dot_dimension_numbers<[1], [0], [0], [1], [0, 0, 1, 1], [], []>} : vector<2x32xf32>, vector<32x64xf32>, vector<2x64xf32> -> vector<2x64xf32>
    %436 = vector.shape_cast %435 : vector<2x64xf32> to vector<2x1x64xf32>
    %c0_198 = arith.constant 0 : index
    %c0_199 = arith.constant 0 : index
    %c0_200 = arith.constant 0 : index
    %437 = vector.load %arg3[%c0_198, %c0_199, %c0_200] : memref<2x16x64xf32, #tpu.memory_space<vmem>>, vector<2x16x64xf32>
    %438 = vector.broadcast %436 : vector<2x1x64xf32> to vector<2x16x64xf32>
    %439 = arith.addf %438, %437 : vector<2x16x64xf32>
    %440 = math.tanh %439 : vector<2x16x64xf32>
    %441 = vector.shape_cast %2 : vector<1x64xf32> to vector<1x1x64xf32>
    %442 = vector.broadcast %441 : vector<1x1x64xf32> to vector<2x16x64xf32>
    %443 = arith.mulf %440, %442 : vector<2x16x64xf32>
    %cst_201 = arith.constant dense<0.000000e+00> : vector<2x16xf32>
    %444 = vector.multi_reduction <add>, %443, %cst_201 [2] : vector<2x16x64xf32> to vector<2x16xf32>
    %445 = arith.addf %444, %0 : vector<2x16xf32>
    %446 = math.exp %445 : vector<2x16xf32>
    %447 = vector.shape_cast %3 : vector<1x64xf32> to vector<1x1x64xf32>
    %448 = vector.broadcast %447 : vector<1x1x64xf32> to vector<2x16x64xf32>
    %449 = arith.mulf %440, %448 : vector<2x16x64xf32>
    %cst_202 = arith.constant dense<0.000000e+00> : vector<2x16xf32>
    %450 = vector.multi_reduction <add>, %449, %cst_202 [2] : vector<2x16x64xf32> to vector<2x16xf32>
    %451 = arith.addf %450, %1 : vector<2x16xf32>
    %452 = math.exp %451 : vector<2x16xf32>
    %cst_203 = arith.constant dense<0.000000e+00> : vector<2xf32>
    %453 = vector.multi_reduction <add>, %446, %cst_203 [1] : vector<2x16xf32> to vector<2xf32>
    %454 = vector.shape_cast %453 : vector<2xf32> to vector<2x1xf32>
    %455 = tpu.reciprocal %454 {approx = true} : vector<2x1xf32> -> vector<2x1xf32>
    %456 = vector.broadcast %455 : vector<2x1xf32> to vector<2x16xf32>
    %457 = arith.mulf %446, %456 : vector<2x16xf32>
    %cst_204 = arith.constant dense<0.000000e+00> : vector<2xf32>
    %458 = vector.multi_reduction <add>, %452, %cst_204 [1] : vector<2x16xf32> to vector<2xf32>
    %459 = vector.shape_cast %458 : vector<2xf32> to vector<2x1xf32>
    %460 = tpu.reciprocal %459 {approx = true} : vector<2x1xf32> -> vector<2x1xf32>
    %461 = vector.broadcast %460 : vector<2x1xf32> to vector<2x16xf32>
    %462 = arith.mulf %452, %461 : vector<2x16xf32>
    %463 = vector.shape_cast %457 : vector<2x16xf32> to vector<2x1x16xf32>
    %c0_205 = arith.constant 0 : index
    %c0_206 = arith.constant 0 : index
    %c0_207 = arith.constant 0 : index
    %464 = vector.load %arg2[%c0_205, %c0_206, %c0_207] : memref<2x16x32xf32, #tpu.memory_space<vmem>>, vector<2x16x32xf32>
    "tpu.trace_start"() <{level = 10 : i32, message = "bqs,bsh->bqh"}> : () -> ()
    %cst_208 = arith.constant dense<0.000000e+00> : vector<2x1x32xf32>
    %465 = tpu.matmul %463, %464, %cst_208 {dimension_numbers = #tpu.dot_dimension_numbers<[2], [1], [1], [2], [0, 0, 0, 1, 1, 2], [0], [0]>} : vector<2x1x16xf32>, vector<2x16x32xf32>, vector<2x1x32xf32> -> vector<2x1x32xf32>
    "tpu.trace_stop"() : () -> ()
    %466 = vector.shape_cast %465 : vector<2x1x32xf32> to vector<2x32xf32>
    %c7 = arith.constant 7 : index
    %c0_209 = arith.constant 0 : index
    %c0_210 = arith.constant 0 : index
    %467 = vector.load %arg0[%c7, %c0_209, %c0_210] : memref<8x2x32xf32, #tpu.memory_space<vmem>>, vector<1x2x32xf32>
    %468 = vector.shape_cast %467 : vector<1x2x32xf32> to vector<2x32xf32>
    %c0_211 = arith.constant 0 : index
    %c0_212 = arith.constant 0 : index
    %469 = vector.load %arg9[%c0_211, %c0_212] : memref<32x32xf32, #tpu.memory_space<vmem>>, vector<32x32xf32>
    %cst_213 = arith.constant dense<0.000000e+00> : vector<2x32xf32>
    %470 = tpu.matmul %466, %469, %cst_213 {dimension_numbers = #tpu.dot_dimension_numbers<[1], [0], [0], [1], [0, 0, 1, 1], [], []>} : vector<2x32xf32>, vector<32x32xf32>, vector<2x32xf32> -> vector<2x32xf32>
    %471 = arith.addf %468, %470 : vector<2x32xf32>
    %c0_214 = arith.constant 0 : index
    %c0_215 = arith.constant 0 : index
    %472 = vector.load %arg10[%c0_214, %c0_215] : memref<32x128xf32, #tpu.memory_space<vmem>>, vector<32x128xf32>
    %cst_216 = arith.constant dense<0.000000e+00> : vector<2x128xf32>
    %473 = tpu.matmul %471, %472, %cst_216 {dimension_numbers = #tpu.dot_dimension_numbers<[1], [0], [0], [1], [0, 0, 1, 1], [], []>} : vector<2x32xf32>, vector<32x128xf32>, vector<2x128xf32> -> vector<2x128xf32>
    %c0_217 = arith.constant 0 : index
    %c0_218 = arith.constant 0 : index
    %474 = vector.load %arg11[%c0_217, %c0_218] : memref<32x128xf32, #tpu.memory_space<vmem>>, vector<32x128xf32>
    %cst_219 = arith.constant dense<0.000000e+00> : vector<2x128xf32>
    %475 = tpu.matmul %433, %474, %cst_219 {dimension_numbers = #tpu.dot_dimension_numbers<[1], [0], [0], [1], [0, 0, 1, 1], [], []>} : vector<2x32xf32>, vector<32x128xf32>, vector<2x128xf32> -> vector<2x128xf32>
    %476 = arith.addf %473, %475 : vector<2x128xf32>
    %477 = vector.broadcast %4 : vector<1x128xf32> to vector<2x128xf32>
    %478 = arith.addf %476, %477 : vector<2x128xf32>
    %479 = vector.extract_strided_slice %478 {offsets = [0, 0], sizes = [2, 96], strides = [1, 1]} : vector<2x128xf32> to vector<2x96xf32>
    %480 = arith.negf %479 : vector<2x96xf32>
    %481 = math.exp %480 : vector<2x96xf32>
    %cst_220 = arith.constant 1.000000e+00 : f32
    %482 = vector.broadcast %cst_220 : f32 to vector<2x96xf32>
    %483 = arith.addf %482, %481 : vector<2x96xf32>
    %484 = arith.divf %482, %483 : vector<2x96xf32>
    %485 = vector.extract_strided_slice %478 {offsets = [0, 96], sizes = [2, 32], strides = [1, 1]} : vector<2x128xf32> to vector<2x32xf32>
    %486 = math.tanh %485 : vector<2x32xf32>
    %487 = vector.extract_strided_slice %484 {offsets = [0, 32], sizes = [2, 32], strides = [1, 1]} : vector<2x96xf32> to vector<2x32xf32>
    %488 = arith.mulf %487, %430 : vector<2x32xf32>
    %489 = vector.extract_strided_slice %484 {offsets = [0, 0], sizes = [2, 32], strides = [1, 1]} : vector<2x96xf32> to vector<2x32xf32>
    %490 = arith.mulf %489, %486 : vector<2x32xf32>
    %491 = arith.addf %488, %490 : vector<2x32xf32>
    %492 = vector.extract_strided_slice %484 {offsets = [0, 64], sizes = [2, 32], strides = [1, 1]} : vector<2x96xf32> to vector<2x32xf32>
    %493 = math.tanh %491 : vector<2x32xf32>
    %494 = arith.mulf %492, %493 : vector<2x32xf32>
    %495 = tpu.concatenate %67, %128, %189, %250, %311, %372, %433, %494 in 0 : vector<2x32xf32>, vector<2x32xf32>, vector<2x32xf32>, vector<2x32xf32>, vector<2x32xf32>, vector<2x32xf32>, vector<2x32xf32>, vector<2x32xf32> -> vector<16x32xf32>
    %496 = tpu.concatenate %5, %67, %128, %189, %250, %311, %372, %433 in 0 : vector<2x32xf32>, vector<2x32xf32>, vector<2x32xf32>, vector<2x32xf32>, vector<2x32xf32>, vector<2x32xf32>, vector<2x32xf32>, vector<2x32xf32> -> vector<16x32xf32>
    %497 = tpu.concatenate %35, %96, %157, %218, %279, %340, %401, %462 in 0 : vector<2x16xf32>, vector<2x16xf32>, vector<2x16xf32>, vector<2x16xf32>, vector<2x16xf32>, vector<2x16xf32>, vector<2x16xf32>, vector<2x16xf32> -> vector<16x16xf32>
    %c0_221 = arith.constant 0 : index
    %c0_222 = arith.constant 0 : index
    %498 = vector.load %arg13[%c0_221, %c0_222] : memref<32x128xf32, #tpu.memory_space<vmem>>, vector<32x128xf32>
    %cst_223 = arith.constant dense<0.000000e+00> : vector<16x128xf32>
    %499 = tpu.matmul %495, %498, %cst_223 {dimension_numbers = #tpu.dot_dimension_numbers<[1], [0], [0], [1], [0, 0, 1, 1], [], []>} : vector<16x32xf32>, vector<32x128xf32>, vector<16x128xf32> -> vector<16x128xf32>
    %c1_224 = arith.constant 1 : index
    %c0_225 = arith.constant 0 : index
    %500 = vector.load %arg12[%c1_224, %c0_225] : memref<2x128xf32, #tpu.memory_space<vmem>>, vector<1x128xf32>
    %501 = vector.broadcast %500 : vector<1x128xf32> to vector<16x128xf32>
    %502 = arith.addf %499, %501 : vector<16x128xf32>
    %cst_226 = arith.constant dense<0xFF800000> : vector<16xf32>
    %503 = vector.multi_reduction <maximumf>, %502, %cst_226 [1] : vector<16x128xf32> to vector<16xf32>
    %504 = vector.shape_cast %503 : vector<16xf32> to vector<16x1xf32>
    %505 = vector.broadcast %504 : vector<16x1xf32> to vector<16x128xf32>
    %506 = arith.subf %502, %505 : vector<16x128xf32>
    %507 = math.exp %506 : vector<16x128xf32>
    %cst_227 = arith.constant dense<0.000000e+00> : vector<16xf32>
    %508 = vector.multi_reduction <add>, %507, %cst_227 [1] : vector<16x128xf32> to vector<16xf32>
    %509 = vector.shape_cast %508 : vector<16xf32> to vector<16x1xf32>
    %510 = tpu.reciprocal %509 {approx = true} : vector<16x1xf32> -> vector<16x1xf32>
    %511 = vector.broadcast %510 : vector<16x1xf32> to vector<16x128xf32>
    %512 = arith.mulf %507, %511 : vector<16x128xf32>
    %513 = tpu.concatenate %497, %497 in 1 : vector<16x16xf32>, vector<16x16xf32> -> vector<16x32xf32>
    %c0_228 = arith.constant 0 : index
    %c0_229 = arith.constant 0 : index
    %514 = vector.load %arg5[%c0_228, %c0_229] : memref<16x32xf32, #tpu.memory_space<vmem>>, vector<16x32xf32>
    %515 = arith.mulf %513, %514 : vector<16x32xf32>
    %c0_230 = arith.constant 0 : index
    %c0_231 = arith.constant 0 : index
    %516 = vector.load %arg6[%c0_230, %c0_231] : memref<32x128xf32, #tpu.memory_space<vmem>>, vector<32x128xf32>
    %cst_232 = arith.constant dense<0.000000e+00> : vector<16x128xf32>
    %517 = tpu.matmul %515, %516, %cst_232 {dimension_numbers = #tpu.dot_dimension_numbers<[1], [0], [0], [1], [0, 0, 1, 1], [], []>} : vector<16x32xf32>, vector<32x128xf32>, vector<16x128xf32> -> vector<16x128xf32>
    %c0_233 = arith.constant 0 : index
    %c0_234 = arith.constant 0 : index
    %518 = vector.load %arg14[%c0_233, %c0_234] : memref<1x33xf32, #tpu.memory_space<vmem>>, vector<1x33xf32>
    %519 = vector.extract_strided_slice %518 {offsets = [0, 0], sizes = [1, 32], strides = [1, 1]} : vector<1x33xf32> to vector<1x32xf32>
    %520 = vector.broadcast %519 : vector<1x32xf32> to vector<16x32xf32>
    %521 = arith.mulf %496, %520 : vector<16x32xf32>
    %cst_235 = arith.constant dense<0.000000e+00> : vector<16xf32>
    %522 = vector.multi_reduction <add>, %521, %cst_235 [1] : vector<16x32xf32> to vector<16xf32>
    %523 = vector.shape_cast %522 : vector<16xf32> to vector<16x1xf32>
    %524 = vector.extract_strided_slice %518 {offsets = [0, 32], sizes = [1, 1], strides = [1, 1]} : vector<1x33xf32> to vector<1x1xf32>
    %525 = vector.broadcast %524 : vector<1x1xf32> to vector<16x1xf32>
    %526 = arith.addf %523, %525 : vector<16x1xf32>
    %527 = arith.negf %526 : vector<16x1xf32>
    %528 = math.exp %527 : vector<16x1xf32>
    %cst_236 = arith.constant 1.000000e+00 : f32
    %529 = vector.broadcast %cst_236 : f32 to vector<16x1xf32>
    %530 = arith.addf %529, %528 : vector<16x1xf32>
    %531 = arith.divf %529, %530 : vector<16x1xf32>
    %532 = vector.broadcast %531 : vector<16x1xf32> to vector<16x128xf32>
    %533 = arith.mulf %532, %512 : vector<16x128xf32>
    %cst_237 = arith.constant 1.000000e+00 : f32
    %534 = vector.broadcast %cst_237 : f32 to vector<16x1xf32>
    %535 = arith.subf %534, %531 : vector<16x1xf32>
    %536 = vector.broadcast %535 : vector<16x1xf32> to vector<16x128xf32>
    %537 = arith.mulf %536, %517 : vector<16x128xf32>
    %538 = arith.addf %533, %537 : vector<16x128xf32>
    %c0_238 = arith.constant 0 : index
    %c0_239 = arith.constant 0 : index
    %539 = vector.load %arg15[%c0_238, %c0_239] : memref<16x128xf32, #tpu.memory_space<vmem>>, vector<16x128xf32>
    tpu.vector_store %arg15[%c0_238, %c0_239], %538 {strides = array<i32>} : memref<16x128xf32, #tpu.memory_space<vmem>>, vector<16x128xf32>,
    %540 = tpu.concatenate %494, %491 in 0 : vector<2x32xf32>, vector<2x32xf32> -> vector<4x32xf32>
    %c0_240 = arith.constant 0 : index
    %c0_241 = arith.constant 0 : index
    %541 = vector.load %arg16[%c0_240, %c0_241] : memref<4x32xf32, #tpu.memory_space<vmem>>, vector<4x32xf32>
    tpu.vector_store %arg16[%c0_240, %c0_241], %540 {strides = array<i32>} : memref<4x32xf32, #tpu.memory_space<vmem>>, vector<4x32xf32>,
    return
  }
}

</mosaic_0001>

<bundles_post_ra>
// kernel: tpu_custom_call.1
= control target key start
LH: loop header
LB: loop body
LE: loop exit
PB: predicated region body
PF: predicated region fallthrough
CT: control target
= control target key end

     0   :  { %s6075_s0 = inlined_call_operand.hbm [shape: f32[8,2,32], index: 0, kind: input, shape index: {}]   ;;  %s6076_s1 = inlined_call_operand.hbm [shape: f32[4,32], index: 1, kind: input, shape index: {}]   ;;  %s6077_s2 = inlined_call_operand.hbm [shape: f32[2,16,32], index: 2, kind: input, shape index: {}]   ;;  %s6078_s3 = inlined_call_operand.hbm [shape: f32[2,16,64], index: 3, kind: input, shape index: {}]   ;;  %s6079_s4 = inlined_call_operand.hbm [shape: f32[4,16], index: 4, kind: input, shape index: {}]   ;;  %s6080_s5 = inlined_call_operand.hbm [shape: f32[16,32], index: 5, kind: input, shape index: {}]   ;;  %s6081_s6 = inlined_call_operand.hbm [shape: f32[32,128], index: 6, kind: input, shape index: {}]   ;;  %s6082_s7 = inlined_call_operand.hbm [shape: f32[32,64], index: 7, kind: input, shape index: {}]   ;;  %s6083_s8 = inlined_call_operand.vmem [shape: f32[2,64], index: 8, kind: input, shape index: {}]   ;;  %s6084_s9 = inlined_call_operand.hbm [shape: f32[32,32], index: 9, kind: input, shape index: {}]   ;;  %s6085_s10 = inlined_call_operand.hbm [shape: f32[32,128], index: 10, kind: input, shape index: {}]   ;;  %s6086_s11 = inlined_call_operand.hbm [shape: f32[32,128], index: 11, kind: input, shape index: {}]   ;;  %s6087_s12 = inlined_call_operand.vmem [shape: f32[2,128], index: 12, kind: input, shape index: {}]   ;;  %s6088_s13 = inlined_call_operand.hbm [shape: f32[32,128], index: 13, kind: input, shape index: {}]   ;;  %s6089_s14 = inlined_call_operand.vmem [shape: f32[1,33], index: 14, kind: input, shape index: {}]   ;;  %s6090_s15 = inlined_call_operand.hbm [shape: f32[16,128], index: 15, kind: output, shape index: {0}]   ;;  %s6091_s16 = inlined_call_operand.hbm [shape: f32[4,32], index: 16, kind: output, shape index: {1}]  }
   0x1   :  { %6103 = sst [smem:[#allocation44_spill]] %s6075_s0 }
   0x2   :  { %22 = vsyncpa [#allocation3], 0 }
   0x3   :  { %23 = vsyncpa [#allocation6], 0 }
   0x4   :  { %24 = vsyncpa [#allocation9], 0 }
   0x5   :  { %25 = vsyncpa [#allocation12], 0 }
   0x6   :  { %26 = vsyncpa [#allocation15], 0 }
   0x7   :  { %27 = vsyncpa [#allocation18], 0 }
   0x8   :  { %28 = vsyncpa [#allocation21], 0 }
   0x9   :  { %29 = vsyncpa [#allocation4], 0  ;;  %s49_s23 = sshll.u32 %s6076_s1, 4  ;;  %s50_s23 = int_to_ptr.hbm [resolvable:$true] %s49_s23 }
   0xa   :  { %30 = vsyncpa [#allocation24], 0  ;;  %s4532_s24 = smov [#allocation5]   ;;  %s72_s28 = sshll.u32 %s6078_s3, 4  ;;  %s73_s28 = int_to_ptr.hbm [resolvable:$true] %s72_s28 }
   0xb   :  { %s51_s25 = sshll.u32 %s4532_s24, 4  ;;  %s4533_s29 = smov [#allocation8]   ;;  %s52_s25 = int_to_ptr.vmem [resolvable:$true] %s51_s25 }
   0xc   :  { %54 = dma.hbm_to_vmem [thread:$0]  %s50_s23, 64, %s52_s25, [#allocation6]  }
   0xd   :  { %s74_s30 = sshll.u32 %s4533_s29, 4  ;;  %s96_s18 = sshll.u32 %s6080_s5, 4  ;;  %s75_s30 = int_to_ptr.vmem [resolvable:$true] %s74_s30  ;;  %s97_s18 = int_to_ptr.hbm [resolvable:$true] %s96_s18 }
   0xe   :  { %s4534_s1 = smov 128   ;;  %s4535_s19 = smov 8  }
   0xf   :  { %80 = dma.hbm_to_vmem [thread:$0]  %s73_s28, 512, %s75_s30, [#allocation9], %s4534_s1, %s4534_s1, %s4535_s19  }
  0x10   :  { %s122_s22 = sshll.u32 %s6082_s7, 4  ;;  %s4536_s3 = smov [#allocation11]   ;;  %s123_s22 = int_to_ptr.hbm [resolvable:$true] %s122_s22 }
  0x11   :  { %s98_s23 = sshll.u32 %s4536_s3, 4  ;;  %s4537_s5 = smov [#allocation14]   ;;  %s99_s23 = int_to_ptr.vmem [resolvable:$true] %s98_s23 }
  0x12   :  { %104 = dma.hbm_to_vmem [thread:$0]  %s97_s18, 256, %s99_s23, [#allocation12], %s4534_s1, %s4534_s1, %s4535_s19  }
  0x13   :  { %s124_s24 = sshll.u32 %s4537_s5, 4  ;;  %s150_s27 = sshll.u32 %s6085_s10, 4  ;;  %s125_s24 = int_to_ptr.vmem [resolvable:$true] %s124_s24  ;;  %s151_s27 = int_to_ptr.hbm [resolvable:$true] %s150_s27 }
  0x14   :  { %130 = dma.hbm_to_vmem [thread:$0]  %s123_s22, 512, %s125_s24, [#allocation15], %s4534_s1, %s4534_s1, %s4535_s19  }
  0x15   :  { %s6104_s29 = sld [smem:[#allocation44_spill]]  ;;  %s4538_s0 = smov [#allocation17]  }
  0x16   :  { %s152_s17 = sshll.u32 %s4538_s0, 4  ;;  %s4539_s18 = smov [#allocation2]   ;;  %s153_s17 = int_to_ptr.vmem [resolvable:$true] %s152_s17 }
  0x17   :  { %158 = dma.hbm_to_vmem [thread:$0]  %s151_s27, 512, %s153_s17, [#allocation18], %s4534_s1, %s4534_s1, %s4535_s19  }
  0x18   :  { %s37_s10 = sshll.u32 %s4539_s18, 4  ;;  %s4540_s20 = smov 32   ;;  %s38_s10 = int_to_ptr.vmem [resolvable:$true] %s37_s10 }
  0x19   :  { %s4541_s21 = smov 2   ;;  %s59_s23 = sshll.u32 %s6077_s2, 4  ;;  %s60_s23 = int_to_ptr.hbm [resolvable:$true] %s59_s23 }
  0x1a   :  { %s4542_s5 = smov [#allocation7]   ;;  %s86_s27 = sshll.u32 %s6079_s4, 4  ;;  %s87_s27 = int_to_ptr.hbm [resolvable:$true] %s86_s27 }
  0x1b   :  { %s35_s30 = sshll.u32 %s6104_s29, 4  ;;  %s61_s24 = sshll.u32 %s4542_s5, 4  ;;  %s36_s30 = int_to_ptr.hbm [resolvable:$true] %s35_s30  ;;  %s62_s24 = int_to_ptr.vmem [resolvable:$true] %s61_s24 }
  0x1c   :  { %43 = dma.hbm_to_vmem [thread:$0]  %s36_s30, 256, %s38_s10, [#allocation3], %s4540_s20, %s4540_s20, %s4541_s21  }
  0x1d   :  { %67 = dma.hbm_to_vmem [thread:$0]  %s60_s23, 512, %s62_s24, [#allocation6], %s4534_s1, %s4534_s1, %s4535_s19  }
  0x1e   :  { %s4543_s7 = smov [#allocation10]   ;;  %s109_s0 = sshll.u32 %s6081_s6, 4  ;;  %s110_s0 = int_to_ptr.hbm [resolvable:$true] %s109_s0 }
  0x1f   :  { %s88_s28 = sshll.u32 %s4543_s7, 4  ;;  %s137_s18 = sshll.u32 %s6084_s9, 4  ;;  %s89_s28 = int_to_ptr.vmem [resolvable:$true] %s88_s28  ;;  %s138_s18 = int_to_ptr.hbm [resolvable:$true] %s137_s18 }
  0x20   :  { %91 = dma.hbm_to_vmem [thread:$0]  %s87_s27, 64, %s89_s28, [#allocation9]  }
  0x21   :  { %s4544_s10 = smov [#allocation13]   ;;  %s4545_s21 = smov [#allocation16]  }
  0x22   :  { %s111_s4 = sshll.u32 %s4544_s10, 4  ;;  %s139_s22 = sshll.u32 %s4545_s21, 4  ;;  %s112_s4 = int_to_ptr.vmem [resolvable:$true] %s111_s4  ;;  %s140_s22 = int_to_ptr.vmem [resolvable:$true] %s139_s22 }
  0x23   :  { %117 = dma.hbm_to_vmem [thread:$0]  %s110_s0, 512, %s112_s4, [#allocation12], %s4534_s1, %s4534_s1, %s4535_s19  }
  0x24   :  { %s163_s6 = sshll.u32 %s6086_s11, 4  ;;  %s178_s24 = sshll.u32 %s6088_s13, 4  ;;  %s164_s6 = int_to_ptr.hbm [resolvable:$true] %s163_s6  ;;  %s179_s24 = int_to_ptr.hbm [resolvable:$true] %s178_s24 }
  0x25   :  { %145 = dma.hbm_to_vmem [thread:$0]  %s138_s18, 512, %s140_s22, [#allocation15], %s4534_s1, %s4534_s1, %s4535_s19  }
  0x26   :  { %s4546_s25 = smov [#allocation19]   ;;  %s4547_s27 = smov [#allocation20]  }
  0x27   :  { %s165_s26 = sshll.u32 %s4546_s25, 4  ;;  %s180_s11 = sshll.u32 %s4547_s27, 4  ;;  %s166_s26 = int_to_ptr.vmem [resolvable:$true] %s165_s26  ;;  %s181_s11 = int_to_ptr.vmem [resolvable:$true] %s180_s11 }
  0x28   :  { %171 = dma.hbm_to_vmem [thread:$0]  %s164_s6, 512, %s166_s26, [#allocation18], %s4534_s1, %s4534_s1, %s4535_s19  }
  0x29   :  { %186 = dma.hbm_to_vmem [thread:$0]  %s179_s24, 512, %s181_s11, [#allocation21], %s4534_s1, %s4534_s1, %s4535_s19  }
  0x2a   :  { %4514 = dma.done.wait [#allocation3], 256  }
  0x2b   :  { %4515 = vsyncadd [#allocation3], 4294967040 }
  0x2c   :  { %4516 = dma.done.wait [#allocation6], 576  }
  0x2d   :  { %4517 = vsyncadd [#allocation6], 4294966720 }
  0x2e   :  { %4518 = dma.done.wait [#allocation9], 576  }
  0x2f   :  { %4519 = vsyncadd [#allocation9], 4294966720 }
  0x30   :  { %4520 = dma.done.wait [#allocation12], 768  }
  0x31   :  { %4521 = vsyncadd [#allocation12], 4294966528 }
  0x32   :  { %4522 = dma.done.wait [#allocation15], 1024  }
  0x33   :  { %4523 = vsyncadd [#allocation15], 4294966272 }
  0x34   :  { %4524 = dma.done.wait [#allocation18], 1024  }
  0x35   :  { %4525 = vsyncadd [#allocation18], 4294966272 }
  0x36   :  { %4526 = dma.done.wait [#allocation21], 512  }
  0x37   :  { %4527 = vsyncadd [#allocation21], 4294966784  ;;  %v4704_v0 = vld [vmem:[#allocation14 + $0x18] sm:$0xff]  ;;  %v4706_v1 = vld [vmem:[#allocation14 + $0x10] sm:$0xff]  ;;  %vm248_vm0 = vcmask 261120   ;;  %v310_v5 = vlaneseq  ;;  %vm295_vm1 = vcmask 523264  }
  0x38   :  { %264 = vmatpush.msra.mxu0 %v4704_v0  ;;  %v4709_v2 = vld [vmem:[#allocation14 + $0x8] sm:$0xff]  ;;  %v4712_v3 = vld [vmem:[#allocation14] sm:$0xff]  ;;  %v4731_v14 = vld [vmem:[#allocation8 + $0x8] sm:$0xff]  ;;  %v6092_v36 = vmov 0   ;;  %vm432_vm2 = vcmask 130112   ;;  %vm437_vm3 = vcmask 1041409  }
  0x39   :  { %v4715_v4 = vld [vmem:[#allocation5] sm:$0x3]  ;;  %v4721_v6 = vshrl.u32 %v310_v5, 7  ;;  %v237_v8 = vld [vmem:[#allocation10] sm:$0x3]  ;;  %v4733_v15 = vld [vmem:[#allocation8 + $0x10] sm:$0xff] }
  0x3a   :  { %265 = vmatpush.msra.mxu0 %v4706_v1  ;;  %v309_v9 = vperm.slane %v237_v8, 0  ;;  %v4729_v11 = vld [vmem:[#allocation8] sm:$0xff]  ;;  %v4736_v18 = vld [vmem:[#allocation8 + $0x18] sm:$0xff]  ;;  %v4744_v22 = vld [vmem:[%s6083_s8] ss:$0 sm:$0xff]  ;;  %v322_v35 = vperm.slane %v237_v8, 1 }
  0x3b   :  { %3848 = vset.pattern.permute.xlu2 %v4721_v6  ;;  %3850 = vset.pattern.permute.xlu0 %v4721_v6  ;;  %v4726_v7 = vadd.s32 8, %v4721_v6  ;;  %v4783_v60 = vand.u32 127, %v310_v5  ;;  %vm440_vm4 = vcmask 123904   ;;  %vm506_vm5 = vcmask 130048   ;;  %s4549_s30 = smov 64   ;;  %s4550_s23 = smov 16  }
  0x3c   :  { %266 = vmatpush.msra.mxu0 %v4709_v2  ;;  %s3743_s26 = sshll.u32 %s6091_s16, 4  ;;  %s4553_s27 = smov [#allocation22]   ;;  %s3744_s26 = int_to_ptr.hbm [resolvable:$true] %s3743_s26 }
  0x3d   :  { %3851 = vset.pattern.permute.xlu1 %v4726_v7  ;;  %v4786_v61 = vadd.s32 4294967288, %v4783_v60  ;;  %s3727_s11 = sshll.u32 %s4553_s27, 4  ;;  %s3729_s28 = sshll.u32 %s6090_s15, 4  ;;  %s3728_s11 = int_to_ptr.vmem [resolvable:$true] %s3727_s11  ;;  %s3730_s28 = int_to_ptr.hbm [resolvable:$true] %s3729_s28 }
  0x3e   :  { %267 = vmatpush.msra.mxu0 %v4712_v3 }
  0x3f   :  { %3764 = vmatmul.msk.f32.vlgmr.msra.gmra.mxu0 %vm248_vm0, %v4715_v4 }
  0x43   :  { %314 = vperm.xlu2 %3848, %v309_v9  }
  0x4b   :  { %3849 = vset.pattern.permute.xlu2 %v4726_v7 }
  0x53   :  { %320 = vperm.xlu2 %3849, %v309_v9  }
  0x5b   :  { %3852 = vset.pattern.permute.xlu2 %v6092_v36 }
  0x9d   :  { %v4770_v37 = vpop.permute.xlu2 %314 }
  0xad   :  { %v4773_v41 = vpop.permute.xlu2 %320 }
  0xbc   :  { %v269_v10 = vpop.f32.mrf.mxu0 }
  0xbd   :  { %v273_v12 = vrot.slane %v269_v10, 1  ;;  %v278_v13 = vperm.slane %v269_v10, 0 }
  0xbf   :  { %v279_v16 = vperm.slane %v273_v12, 0  ;;  %v282_v17 = vadd.f32 %v278_v13, %v4729_v11  ;;  %v283_v19 = vadd.f32 %v278_v13, %v4731_v14 }
  0xc1   :  { %v284_v20 = vadd.f32 %v279_v16, %v4733_v15  ;;  %3869 = vtanh.f32 %v282_v17  ;;  %v285_v21 = vadd.f32 %v279_v16, %v4736_v18 }
  0xc3   :  { %3871 = vtanh.f32 %v284_v20 }
  0xc4   :  { %3873 = vtanh.f32 %v283_v19 }
  0xc5   :  { %3875 = vtanh.f32 %v285_v21 }
  0xc7   :  { %v4747_v23 = vpop.eup %3869 }
  0xc8   :  { %v291_v24 = vmul.f32 %v4747_v23, %v4744_v22 }
  0xc9   :  { %v4751_v25 = vpop.eup %3871 }
  0xca   :  { %v296_v26 = vsel %vm295_vm1, %v291_v24, 0.0  ;;  %v293_v27 = vmul.f32 %v4751_v25, %v4744_v22  ;;  %v4756_v28 = vpop.eup %3873 }
  0xcb   :  { %297 = vadd.xlane.f32.xlu0 %v296_v26  ;;  %v4759_v30 = vpop.eup %3875  ;;  %v292_v31 = vmul.f32 %v4756_v28, %v4744_v22 }
  0xcc   :  { %v302_v29 = vsel %vm295_vm1, %v293_v27, 0.0  ;;  %v294_v32 = vmul.f32 %v4759_v30, %v4744_v22 }
  0xcd   :  { %303 = vadd.xlane.f32.xlu1 %v302_v29  ;;  %v299_v33 = vsel %vm295_vm1, %v292_v31, 0.0  ;;  %v4796_v31 = vld [vmem:[#allocation7 + $0x8] sm:$0xff] }
  0xce   :  { %v305_v34 = vsel %vm295_vm1, %v294_v32, 0.0  ;;  %v4798_v32 = vld [vmem:[#allocation7] sm:$0xff]  ;;  %523 = vmatpush.msrb.mxu0 %v4796_v31 }
  0xd0   :  { %524 = vmatpush.msrb.mxu0 %v4798_v32 }
  0xd2   :  { %709 = vmatpush.msra.mxu0 %v4704_v0 }
  0xd3   :  { %300 = vadd.xlane.f32.xlu0 %v299_v33  ;;  %v4804_v33 = vld [vmem:[#allocation7 + $0x18] sm:$0xff] }
  0xd4   :  { %710 = vmatpush.msra.mxu0 %v4706_v1  ;;  %556 = vmatpush.msra.mxu3 %v4804_v33 }
  0xd5   :  { %306 = vadd.xlane.f32.xlu1 %v305_v34  ;;  %v4806_v34 = vld [vmem:[#allocation7 + $0x10] sm:$0xff] }
  0xd6   :  { %711 = vmatpush.msra.mxu0 %v4709_v2  ;;  %557 = vmatpush.msra.mxu3 %v4806_v34 }
  0xd8   :  { %712 = vmatpush.msra.mxu0 %v4712_v3 }
  0xe7   :  { %327 = vperm.xlu0 %3850, %v322_v35  }
  0xee   :  { %333 = vperm.xlu1 %3851, %v322_v35  }
  0xef   :  { %3853 = vset.pattern.permute.xlu0 %v6092_v36 }
  0xf6   :  { %3854 = vset.pattern.permute.xlu1 %v6092_v36 }
 0x13e   :  { %v298_v38 = vpop.xlane.xlu0 %297 }
 0x13f   :  { %v339_v39 = vadd.f32 %v4770_v37, %v298_v38 }
 0x140   :  { %v304_v46 = vpop.xlane.xlu1 %303 }
 0x141   :  { %v343_v40 = vmul.f32 1.442695, %v339_v39 }
 0x143   :  { %3877 = vpow2.f32 %v343_v40 }
 0x146   :  { %v301_v42 = vpop.xlane.xlu0 %300 }
 0x147   :  { %v340_v43 = vadd.f32 %v4773_v41, %v301_v42 }
 0x148   :  { %v307_v48 = vpop.xlane.xlu1 %306 }
 0x149   :  { %v3878_v44 = vpop.eup %3877  ;;  %v345_v45 = vmul.f32 1.442695, %v340_v43 }
 0x14a   :  { %416 = vperm.xlu2 %3852, %v3878_v44  }
 0x14b   :  { %3879 = vpow2.f32 %v345_v45 }
 0x151   :  { %v3880_v47 = vpop.eup %3879 }
 0x152   :  { %419 = vperm.xlu2 %3852, %v3880_v47  }
 0x159   :  { %v4776_v49 = vpop.permute.xlu0 %327 }
 0x15a   :  { %v341_v50 = vadd.f32 %v4776_v49, %v304_v46 }
 0x15c   :  { %v347_v51 = vmul.f32 1.442695, %v341_v50  ;;  %v4822_v50 = vld [vmem:[#allocation16 + $0x10] sm:$0xff] }
 0x15e   :  { %3881 = vpow2.f32 %v347_v51  ;;  %v4826_v51 = vld [vmem:[#allocation16 + $0x8] sm:$0xff] }
 0x160   :  { %v4779_v52 = vpop.permute.xlu1 %333 }
 0x161   :  { %v342_v53 = vadd.f32 %v4779_v52, %v307_v48  ;;  %v4820_v48 = vld [vmem:[#allocation16 + $0x18] sm:$0xff] }
 0x162   :  { %585 = vmatpush.msrb.mxu3 %v4820_v48 }
 0x163   :  { %v349_v54 = vmul.f32 1.442695, %v342_v53  ;;  %v4828_v53 = vld [vmem:[#allocation16] sm:$0xff] }
 0x164   :  { %v3882_v55 = vpop.eup %3881  ;;  %586 = vmatpush.msrb.mxu3 %v4822_v50 }
 0x165   :  { %422 = vperm.xlu2 %3852, %v3882_v55   ;;  %3883 = vpow2.f32 %v349_v54  ;;  %v4832_v54 = vld [vmem:[#allocation17 + $0x18] sm:$0xff] }
 0x166   :  { %587 = vmatpush.msrb.mxu3 %v4826_v51  ;;  %637 = vmatpush.msra.mxu2 %v4832_v54 }
 0x168   :  { %588 = vmatpush.msrb.mxu3 %v4828_v53 }
 0x16b   :  { %v3884_v56 = vpop.eup %3883 }
 0x16d   :  { %425 = vperm.xlu2 %3852, %v3884_v56  }
 0x1a4   :  { %v417_v57 = vpop.permute.xlu2 %416 }
 0x1a5   :  { %v429_v8 = vperm.slane %v417_v57, %v4783_v60 }
 0x1ac   :  { %v420_v58 = vpop.permute.xlu2 %419 }
 0x1ad   :  { %v431_v62 = vperm.slane %v420_v58, %v4786_v61 }
 0x1af   :  { %v433_v12 = vsel %vm432_vm2, %v431_v62, %v429_v8  ;;  %v4844_v62 = vld [vmem:[#allocation17 + $0x8] sm:$0xff]  ;;  %v4849_v8 = vld [vmem:[#allocation17] sm:$0xff] }
 0x1bf   :  { %v423_v59 = vpop.permute.xlu2 %422 }
 0x1c0   :  { %v434_v9 = vperm.slane %v423_v59, %v4783_v60 }
 0x1c7   :  { %v426_v63 = vpop.permute.xlu2 %425 }
 0x1c8   :  { %v435_v10 = vperm.slane %v426_v63, %v4786_v61  ;;  %v4847_v63 = vld [vmem:[#allocation19 + $0x18] sm:$0xff] }
 0x1c9   :  { %614 = vmatpush.msra.mxu1 %v4847_v63 }
 0x1ca   :  { %v436_v5 = vsel %vm432_vm2, %v435_v10, %v434_v9  ;;  %v4855_v9 = vld [vmem:[#allocation19 + $0x10] sm:$0xff]  ;;  %v4857_v10 = vld [vmem:[#allocation19 + $0x8] sm:$0xff] }
 0x1cb   :  { %v438_v13 = vsel %vm437_vm3, %v436_v5, %v433_v12  ;;  %615 = vmatpush.msra.mxu1 %v4855_v9  ;;  %v243_v12 = vld [vmem:[#allocation5 + $0x2] sm:$0x3]  ;;  %v4862_v5 = vld [vmem:[#allocation19] sm:$0xff] }
 0x1cc   :  { %v441_v16 = vsel %vm440_vm4, %v438_v13, 0.0  ;;  %v562_v13 = vld [vmem:[#allocation2] sm:$0x3] }
 0x1cd   :  { %442 = vadd.xlane.f32.xlu1 %v441_v16  ;;  %616 = vmatpush.msra.mxu1 %v4857_v10 }
 0x1cf   :  { %617 = vmatpush.msra.mxu1 %v4862_v5 }
 0x1d0   :  { %3768 = vmatmul.msk.f32.vlgmr.msra.gmra.mxu1 %vm248_vm0, %v4715_v4 }
 0x1d1   :  { %929 = vmatpush.msrb.mxu1 %v4804_v33 }
 0x1d3   :  { %930 = vmatpush.msrb.mxu1 %v4806_v34 }
 0x1d5   :  { %1078 = vmatpush.msra.mxu1 %v4704_v0  ;;  %v4887_v0 = vld [vmem:[%s6087_s12] ss:$0 sm:$0xff] }
 0x1d7   :  { %1079 = vmatpush.msra.mxu1 %v4706_v1 }
 0x1d9   :  { %1080 = vmatpush.msra.mxu1 %v4709_v2 }
 0x1db   :  { %1081 = vmatpush.msra.mxu1 %v4712_v3 }
 0x240   :  { %v443_v17 = vpop.xlane.xlu1 %442 }
 0x241   :  { %3885 = vrcp.f32 %v443_v17 }
 0x247   :  { %v3886_v19 = vpop.eup %3885 }
 0x248   :  { %v447_v20 = vperm.slane %v3886_v19, 1  ;;  %v446_v26 = vperm.slane %v3886_v19, 0 }
 0x24a   :  { %v453_v21 = vmul.f32 %v3884_v56, %v447_v20  ;;  %v452_v24 = vmul.f32 %v3882_v55, %v447_v20  ;;  %v450_v27 = vmul.f32 %v3878_v44, %v446_v26  ;;  %v451_v29 = vmul.f32 %v3880_v47, %v446_v26  ;;  %v4834_v55 = vld [vmem:[#allocation17 + $0x10] sm:$0xff] }
 0x24b   :  { %638 = vmatpush.msra.mxu2 %v4834_v55 }
 0x24c   :  { %535 = vperm.xlu0 %3853, %v453_v21   ;;  %532 = vperm.xlu2 %3852, %v452_v24  }
 0x24d   :  { %639 = vmatpush.msra.mxu2 %v4844_v62  ;;  %v619_v4 = vpop.f32.mrf.mxu1 }
 0x24f   :  { %640 = vmatpush.msra.mxu2 %v4849_v8 }
 0x251   :  { %959 = vmatpush.msrb.mxu2 %v4820_v48 }
 0x253   :  { %960 = vmatpush.msrb.mxu2 %v4822_v50 }
 0x254   :  { %498 = vperm.xlu2 %3852, %v450_v27  }
 0x255   :  { %961 = vmatpush.msrb.mxu2 %v4826_v51 }
 0x257   :  { %962 = vmatpush.msrb.mxu2 %v4828_v53 }
 0x25c   :  { %501 = vperm.xlu2 %3852, %v451_v29  }
 0x264   :  { %668 = vrot.lane.b32.xlu2 %v243_v12, %s4540_s20 }
 0x2a6   :  { %v533_v35 = vpop.permute.xlu2 %532 }
 0x2a7   :  { %v537_v45 = vperm.slane %v533_v35, %v4783_v60 }
 0x2ae   :  { %v499_v38 = vpop.permute.xlu2 %498 }
 0x2af   :  { %v503_v40 = vperm.slane %v499_v38, %v4783_v60 }
 0x2b6   :  { %v502_v39 = vpop.permute.xlu2 %501 }
 0x2b7   :  { %v504_v42 = vperm.slane %v502_v39, %v4786_v61 }
 0x2b9   :  { %v505_v43 = vsel %vm432_vm2, %v504_v42, %v503_v40 }
 0x2ba   :  { %3765 = vmatmul.msk.f32.vlgmr.msrb.gmra.mxu0 %vm506_vm5, %v505_v43 }
 0x2bb   :  { %988 = vmatpush.msrb.mxu0 %v4847_v63 }
 0x2bd   :  { %989 = vmatpush.msrb.mxu0 %v4855_v9 }
 0x2be   :  { %v536_v44 = vpop.permute.xlu0 %535 }
 0x2bf   :  { %v538_v46 = vperm.slane %v536_v44, %v4786_v61  ;;  %990 = vmatpush.msrb.mxu0 %v4857_v10 }
 0x2c1   :  { %v539_v47 = vsel %vm432_vm2, %v538_v46, %v537_v45  ;;  %991 = vmatpush.msrb.mxu0 %v4862_v5  ;;  %v669_v45 = vpop.permute.xlu2 %668 }
 0x2c2   :  { %3766 = vmatmul.msk.f32.vlgmr.msra.gmra.mxu3 %vm506_vm5, %v539_v47 }
 0x2c3   :  { %896 = vmatpush.msra.mxu3 %v4796_v31 }
 0x2c5   :  { %897 = vmatpush.msra.mxu3 %v4798_v32 }
 0x337   :  { %v526_v58 = vpop.f32.mrf.mxu0 }
 0x345   :  { %v559_v56 = vpop.f32.mrf.mxu3 }
 0x346   :  { %v569_v57 = vrot.slane %v559_v56, 7 }
 0x348   :  { %v570_v59 = vsel %vm437_vm3, %v569_v57, %v526_v58 }
 0x349   :  { %3767 = vmatmul.msk.f32.vlgmr.msrb.gmra.mxu3 %vm248_vm0, %v570_v59 }
 0x34a   :  { %1011 = vmatpush.msrb.mxu3 %v4832_v54 }
 0x34c   :  { %1012 = vmatpush.msrb.mxu3 %v4834_v55 }
 0x34e   :  { %1013 = vmatpush.msrb.mxu3 %v4844_v62 }
 0x350   :  { %1014 = vmatpush.msrb.mxu3 %v4849_v8 }
 0x3cc   :  { %v590_v16 = vpop.f32.mrf.mxu3 }
 0x3cd   :  { %v593_v17 = vadd.f32 %v590_v16, %v562_v13 }
 0x3cf   :  { %3769 = vmatmul.msk.f32.vlgmr.msra.gmra.mxu2 %vm248_vm0, %v593_v17 }
 0x3d0   :  { %1265 = vmatpush.msra.mxu2 %v4796_v31 }
 0x3d2   :  { %1266 = vmatpush.msra.mxu2 %v4798_v32 }
 0x452   :  { %v642_v1 = vpop.f32.mrf.mxu2 }
 0x453   :  { %v643_v19 = vadd.f32 %v642_v1, %v619_v4 }
 0x455   :  { %v646_v2 = vadd.f32 %v4887_v0, %v643_v19 }
 0x457   :  { %3887 = vtanh.f32 %v646_v2  ;;  %v3770_v20 = vmul.f32 -1.442695, %v646_v2 }
 0x459   :  { %3889 = vpow2.f32 %v3770_v20 }
 0x45d   :  { %v3888_v3 = vpop.eup %3887 }
 0x45e   :  { %673 = vrot.lane.b32.xlu0 %v3888_v3, %s4540_s20 }
 0x45f   :  { %v3890_v21 = vpop.eup %3889 }
 0x460   :  { %v650_v24 = vadd.f32 1.0, %v3890_v21 }
 0x462   :  { %3891 = vrcp.f32 %v650_v24  ;;  %v662_v35 = vand.u32 2147483648, %v650_v24  ;;  %vm656_vm7 = vweird.f32 %v650_v24  ;;  %v660_v38 = vand.u32 2147483647, %v650_v24 }
 0x464   :  { %v663_v40 = vor.u32 1.1754944e-38, %v662_v35  ;;  %vm661_vm9 = vcmp.eq.f32.partialorder %v660_v38, 8.507059e+37 }
 0x468   :  { %v3892_v26 = vpop.eup %3891 }
 0x469   :  { %v652_v27 = vmul.f32 %v3892_v26, %v650_v24  ;;  %vm657_vm6 = vweird.f32 %v3892_v26 }
 0x46a   :  { %vm658_vm8 = vmor %vm656_vm7, %vm657_vm6 }
 0x46b   :  { %v653_v29 = vsub.f32 1.0, %v652_v27 }
 0x46d   :  { %v654_v31 = vmul.f32 %v3892_v26, %v653_v29 }
 0x46f   :  { %v655_v32 = vadd.f32 %v3892_v26, %v654_v31 }
 0x471   :  { %v659_v39 = vsel %vm658_vm8, %v3892_v26, %v655_v32  ;;  %vm3284_vm8 = vcmask 1041408  }
 0x472   :  { %v664_v42 = vsel %vm661_vm9, %v663_v40, %v659_v39  ;;  %vm3286_vm9 = vcmask 1043456  }
 0x473   :  { %v671_v46 = vmul.f32 %v669_v45, %v664_v42 }
 0x4d0   :  { %v674_v43 = vpop.permute.xlu0 %673 }
 0x4d1   :  { %v676_v44 = vmul.f32 %v674_v43, %v664_v42 }
 0x4d3   :  { %678 = vrot.lane.b32.xlu0 %v676_v44, %s4540_s20 }
 0x545   :  { %v679_v47 = vpop.permute.xlu0 %678 }
 0x546   :  { %v4892_v56 = vadd.f32 %v679_v47, %v671_v46 }
 0x548   :  { %3893 = vtanh.f32 %v4892_v56 }
 0x54e   :  { %v3894_v57 = vpop.eup %3893 }
 0x54f   :  { %684 = vrot.lane.b32.xlu2 %v3894_v57, %s4540_s20 }
 0x5a9   :  { %v685_v58 = vpop.permute.xlu2 %684 }
 0x5aa   :  { %v4896_v59 = vmul.f32 %v685_v58, %v664_v42 }
 0x5ac   :  { %6105 = vst [vmem:[#allocation34_spill] sm:$0xff] %v4896_v59  ;;  %693 = vrot.lane.b32.xlu1 %v4896_v59, %s4549_s30 }
 0x61e   :  { %v694_v12 = vpop.permute.xlu1 %693 }
 0x61f   :  { %3771 = vmatmul.msk.f32.vlgmr.msra.gmra.mxu0 %vm248_vm0, %v694_v12 }
 0x620   :  { %1298 = vmatpush.msra.mxu0 %v4804_v33 }
 0x622   :  { %1299 = vmatpush.msra.mxu0 %v4806_v34 }
 0x627   :  { %3775 = vmatmul.msk.f32.vlgmr.msrb.gmra.mxu0 %vm248_vm0, %v694_v12 }
 0x69c   :  { %v714_v13 = vpop.f32.mrf.mxu0 }
 0x69d   :  { %v718_v16 = vrot.slane %v714_v13, 1  ;;  %v723_v17 = vperm.slane %v714_v13, 0 }
 0x69f   :  { %v724_v4 = vperm.slane %v718_v16, 0  ;;  %v727_v1 = vadd.f32 %v723_v17, %v4729_v11  ;;  %v728_v19 = vadd.f32 %v723_v17, %v4731_v14 }
 0x6a1   :  { %v729_v2 = vadd.f32 %v724_v4, %v4733_v15  ;;  %3895 = vtanh.f32 %v727_v1  ;;  %v730_v3 = vadd.f32 %v724_v4, %v4736_v18 }
 0x6a2   :  { %3897 = vtanh.f32 %v728_v19 }
 0x6a3   :  { %3899 = vtanh.f32 %v729_v2 }
 0x6a4   :  { %3901 = vtanh.f32 %v730_v3 }
 0x6a7   :  { %v4908_v33 = vpop.eup %3895 }
 0x6a8   :  { %v4910_v34 = vpop.eup %3897  ;;  %v735_v20 = vmul.f32 %v4908_v33, %v4744_v22 }
 0x6a9   :  { %v4914_v21 = vpop.eup %3899  ;;  %v736_v24 = vmul.f32 %v4910_v34, %v4744_v22 }
 0x6aa   :  { %v739_v26 = vsel %vm295_vm1, %v735_v20, 0.0  ;;  %v737_v27 = vmul.f32 %v4914_v21, %v4744_v22  ;;  %v4922_v31 = vpop.eup %3901 }
 0x6ab   :  { %v742_v29 = vsel %vm295_vm1, %v736_v24, 0.0  ;;  %740 = vadd.xlane.f32.xlu0 %v739_v26  ;;  %v738_v35 = vmul.f32 %v4922_v31, %v4744_v22 }
 0x6ac   :  { %743 = vadd.xlane.f32.xlu2 %v742_v29  ;;  %v745_v32 = vsel %vm295_vm1, %v737_v27, 0.0 }
 0x6ad   :  { %746 = vadd.xlane.f32.xlu1 %v745_v32  ;;  %v748_v38 = vsel %vm295_vm1, %v738_v35, 0.0 }
 0x6b4   :  { %749 = vadd.xlane.f32.xlu2 %v748_v38 }
 0x71e   :  { %v741_v39 = vpop.xlane.xlu0 %740 }
 0x71f   :  { %v744_v40 = vpop.xlane.xlu2 %743  ;;  %v751_v42 = vadd.f32 %v741_v39, %v4770_v37 }
 0x720   :  { %v752_v43 = vadd.f32 %v744_v40, %v4773_v41  ;;  %v747_v44 = vpop.xlane.xlu1 %746 }
 0x721   :  { %v755_v45 = vmul.f32 1.442695, %v751_v42  ;;  %v753_v47 = vadd.f32 %v747_v44, %v4776_v49 }
 0x722   :  { %v757_v46 = vmul.f32 1.442695, %v752_v43 }
 0x723   :  { %3903 = vpow2.f32 %v755_v45  ;;  %v759_v57 = vmul.f32 1.442695, %v753_v47 }
 0x724   :  { %3905 = vpow2.f32 %v757_v46 }
 0x725   :  { %3907 = vpow2.f32 %v759_v57 }
 0x727   :  { %v750_v58 = vpop.xlane.xlu2 %749 }
 0x728   :  { %v754_v12 = vadd.f32 %v750_v58, %v4779_v52 }
 0x729   :  { %v3904_v13 = vpop.eup %3903 }
 0x72a   :  { %v3906_v16 = vpop.eup %3905  ;;  %v761_v17 = vmul.f32 1.442695, %v754_v12  ;;  %796 = vperm.xlu0 %3853, %v3904_v13  }
 0x72b   :  { %799 = vperm.xlu2 %3852, %v3906_v16   ;;  %v3908_v4 = vpop.eup %3907 }
 0x72c   :  { %3909 = vpow2.f32 %v761_v17 }
 0x732   :  { %v3910_v1 = vpop.eup %3909  ;;  %802 = vperm.xlu0 %3853, %v3908_v4  }
 0x733   :  { %805 = vperm.xlu1 %3854, %v3910_v1  }
 0x785   :  { %v800_v2 = vpop.permute.xlu2 %799 }
 0x786   :  { %v808_v27 = vperm.slane %v800_v2, %v4786_v61 }
 0x79c   :  { %v797_v19 = vpop.permute.xlu0 %796 }
 0x79d   :  { %v807_v3 = vperm.slane %v797_v19, %v4783_v60 }
 0x79f   :  { %v809_v32 = vsel %vm432_vm2, %v808_v27, %v807_v3  ;;  %v993_v27 = vpop.f32.mrf.mxu0 }
 0x7a4   :  { %v803_v20 = vpop.permute.xlu0 %802 }
 0x7a5   :  { %v810_v24 = vperm.slane %v803_v20, %v4783_v60  ;;  %v806_v26 = vpop.permute.xlu1 %805  ;;  %v936_v20 = vld [vmem:[#allocation2 + $0x2] sm:$0x3] }
 0x7a6   :  { %v811_v29 = vperm.slane %v806_v26, %v4786_v61 }
 0x7a8   :  { %v812_v35 = vsel %vm432_vm2, %v811_v29, %v810_v24 }
 0x7a9   :  { %v813_v38 = vsel %vm437_vm3, %v812_v35, %v809_v32 }
 0x7aa   :  { %v815_v39 = vsel %vm440_vm4, %v813_v38, 0.0 }
 0x7ab   :  { %816 = vadd.xlane.f32.xlu0 %v815_v39 }
 0x81e   :  { %v817_v40 = vpop.xlane.xlu0 %816 }
 0x81f   :  { %3911 = vrcp.f32 %v817_v40 }
 0x825   :  { %v3912_v42 = vpop.eup %3911 }
 0x826   :  { %v821_v43 = vperm.slane %v3912_v42, 1  ;;  %v820_v44 = vperm.slane %v3912_v42, 0 }
 0x828   :  { %v826_v45 = vmul.f32 %v3908_v4, %v821_v43  ;;  %v824_v46 = vmul.f32 %v3904_v13, %v820_v44  ;;  %v825_v47 = vmul.f32 %v3906_v16, %v820_v44  ;;  %v827_v57 = vmul.f32 %v3910_v1, %v821_v43 }
 0x82a   :  { %905 = vperm.xlu1 %3854, %v826_v45   ;;  %872 = vperm.xlu2 %3852, %v824_v46  }
 0x832   :  { %875 = vperm.xlu2 %3852, %v825_v47  }
 0x83a   :  { %908 = vperm.xlu2 %3852, %v827_v57  }
 0x884   :  { %v873_v58 = vpop.permute.xlu2 %872 }
 0x885   :  { %v877_v17 = vperm.slane %v873_v58, %v4783_v60 }
 0x88c   :  { %v876_v12 = vpop.permute.xlu2 %875 }
 0x88d   :  { %v878_v19 = vperm.slane %v876_v12, %v4786_v61 }
 0x88f   :  { %v879_v2 = vsel %vm432_vm2, %v878_v19, %v877_v17 }
 0x890   :  { %3772 = vmatmul.msk.f32.vlgmr.msra.gmra.mxu3 %vm506_vm5, %v879_v2 }
 0x891   :  { %1328 = vmatpush.msra.mxu3 %v4820_v48 }
 0x893   :  { %1329 = vmatpush.msra.mxu3 %v4822_v50 }
 0x894   :  { %v909_v13 = vpop.permute.xlu2 %908 }
 0x895   :  { %1330 = vmatpush.msra.mxu3 %v4826_v51  ;;  %v911_v4 = vperm.slane %v909_v13, %v4786_v61 }
 0x897   :  { %1331 = vmatpush.msra.mxu3 %v4828_v53 }
 0x89c   :  { %v906_v16 = vpop.permute.xlu1 %905 }
 0x89d   :  { %v910_v1 = vperm.slane %v906_v16, %v4783_v60 }
 0x89f   :  { %v912_v3 = vsel %vm432_vm2, %v911_v4, %v910_v1 }
 0x8a0   :  { %3773 = vmatmul.msk.f32.vlgmr.msrb.gmra.mxu1 %vm506_vm5, %v912_v3 }
 0x8a1   :  { %1357 = vmatpush.msrb.mxu1 %v4847_v63 }
 0x8a3   :  { %1358 = vmatpush.msrb.mxu1 %v4855_v9 }
 0x8a5   :  { %1359 = vmatpush.msrb.mxu1 %v4857_v10 }
 0x8a7   :  { %1360 = vmatpush.msrb.mxu1 %v4862_v5 }
 0x913   :  { %v899_v51 = vpop.f32.mrf.mxu3 }
 0x91d   :  { %v932_v48 = vpop.f32.mrf.mxu1 }
 0x91e   :  { %v943_v50 = vrot.slane %v932_v48, 7 }
 0x920   :  { %v944_v53 = vsel %vm437_vm3, %v943_v50, %v899_v51 }
 0x921   :  { %3774 = vmatmul.msk.f32.vlgmr.msrb.gmra.mxu2 %vm248_vm0, %v944_v53 }
 0x922   :  { %1380 = vmatpush.msrb.mxu2 %v4832_v54 }
 0x924   :  { %1381 = vmatpush.msrb.mxu2 %v4834_v55 }
 0x926   :  { %1382 = vmatpush.msrb.mxu2 %v4844_v62 }
 0x928   :  { %1383 = vmatpush.msrb.mxu2 %v4849_v8 }
 0x9a4   :  { %v964_v24 = vpop.f32.mrf.mxu2 }
 0x9a5   :  { %v967_v26 = vadd.f32 %v964_v24, %v936_v20 }
 0x9a7   :  { %3776 = vmatmul.msk.f32.vlgmr.msrb.gmra.mxu3 %vm248_vm0, %v967_v26 }
 0xa2a   :  { %v1016_v29 = vpop.f32.mrf.mxu3 }
 0xa2b   :  { %v1017_v32 = vadd.f32 %v1016_v29, %v993_v27 }
 0xa2d   :  { %v1019_v35 = vadd.f32 %v4887_v0, %v1017_v32 }
 0xa2f   :  { %3913 = vtanh.f32 %v1019_v35  ;;  %v3777_v54 = vmul.f32 -1.442695, %v1019_v35 }
 0xa31   :  { %3915 = vpow2.f32 %v3777_v54 }
 0xa35   :  { %v3914_v38 = vpop.eup %3913 }
 0xa36   :  { %1042 = vrot.lane.b32.xlu1 %v3914_v38, %s4540_s20 }
 0xa37   :  { %v3916_v55 = vpop.eup %3915 }
 0xa38   :  { %v1023_v62 = vadd.f32 1.0, %v3916_v55 }
 0xa3a   :  { %3917 = vrcp.f32 %v1023_v62  ;;  %v1035_v44 = vand.u32 2147483648, %v1023_v62  ;;  %vm1029_vm11 = vweird.f32 %v1023_v62  ;;  %v1033_v45 = vand.u32 2147483647, %v1023_v62 }
 0xa3c   :  { %v1036_v47 = vor.u32 1.1754944e-38, %v1035_v44  ;;  %vm1034_vm13 = vcmp.eq.f32.partialorder %v1033_v45, 8.507059e+37 }
 0xa40   :  { %v3918_v8 = vpop.eup %3917 }
 0xa41   :  { %v1025_v39 = vmul.f32 %v3918_v8, %v1023_v62  ;;  %vm1030_vm10 = vweird.f32 %v3918_v8 }
 0xa42   :  { %vm1031_vm12 = vmor %vm1029_vm11, %vm1030_vm10 }
 0xa43   :  { %v1026_v40 = vsub.f32 1.0, %v1025_v39 }
 0xa45   :  { %v1027_v42 = vmul.f32 %v3918_v8, %v1026_v40 }
 0xa47   :  { %v1028_v43 = vadd.f32 %v3918_v8, %v1027_v42 }
 0xa49   :  { %v1032_v46 = vsel %vm1031_vm12, %v3918_v8, %v1028_v43 }
 0xa4a   :  { %v1037_v58 = vsel %vm1034_vm13, %v1036_v47, %v1032_v46 }
 0xa4b   :  { %v1040_v17 = vmul.f32 %v1037_v58, %v4892_v56 }
 0xaa8   :  { %v1043_v57 = vpop.permute.xlu1 %1042 }
 0xaa9   :  { %v1045_v12 = vmul.f32 %v1043_v57, %v1037_v58 }
 0xaab   :  { %1047 = vrot.lane.b32.xlu2 %v1045_v12, %s4540_s20 }
 0xb05   :  { %v1048_v19 = vpop.permute.xlu2 %1047 }
 0xb06   :  { %v4967_v2 = vadd.f32 %v1048_v19, %v1040_v17 }
 0xb08   :  { %3919 = vtanh.f32 %v4967_v2 }
 0xb0e   :  { %v3920_v13 = vpop.eup %3919 }
 0xb0f   :  { %1053 = vrot.lane.b32.xlu1 %v3920_v13, %s4540_s20 }
 0xb81   :  { %v1054_v16 = vpop.permute.xlu1 %1053 }
 0xb82   :  { %v4971_v4 = vmul.f32 %v1054_v16, %v1037_v58 }
 0xb84   :  { %6106 = vst [vmem:[#allocation35_spill] sm:$0xff] %v4971_v4  ;;  %1062 = vrot.lane.b32.xlu2 %v4971_v4, %s4549_s30 }
 0xbde   :  { %v1063_v1 = vpop.permute.xlu2 %1062 }
 0xbdf   :  { %3778 = vmatmul.msk.f32.vlgmr.msra.gmra.mxu1 %vm248_vm0, %v1063_v1 }
 0xbe7   :  { %3782 = vmatmul.msk.f32.vlgmr.msrb.gmra.mxu1 %vm248_vm0, %v1063_v1 }
 0xc5c   :  { %v1083_v56 = vpop.f32.mrf.mxu1 }
 0xc5d   :  { %v1087_v3 = vrot.slane %v1083_v56, 1  ;;  %v1092_v48 = vperm.slane %v1083_v56, 0 }
 0xc5f   :  { %v1093_v50 = vperm.slane %v1087_v3, 0  ;;  %v1096_v51 = vadd.f32 %v1092_v48, %v4729_v11  ;;  %v1097_v53 = vadd.f32 %v1092_v48, %v4731_v14 }
 0xc61   :  { %v1098_v20 = vadd.f32 %v1093_v50, %v4733_v15  ;;  %3921 = vtanh.f32 %v1096_v51  ;;  %v1099_v24 = vadd.f32 %v1093_v50, %v4736_v18 }
 0xc62   :  { %3923 = vtanh.f32 %v1097_v53 }
 0xc63   :  { %3925 = vtanh.f32 %v1098_v20 }
 0xc64   :  { %3927 = vtanh.f32 %v1099_v24 }
 0xc67   :  { %v4981_v26 = vpop.eup %3921 }
 0xc68   :  { %v4983_v27 = vpop.eup %3923  ;;  %v1104_v29 = vmul.f32 %v4981_v26, %v4744_v22 }
 0xc69   :  { %v4987_v32 = vpop.eup %3925  ;;  %v1105_v11 = vmul.f32 %v4983_v27, %v4744_v22 }
 0xc6a   :  { %v1108_v14 = vsel %vm295_vm1, %v1104_v29, 0.0  ;;  %v1106_v15 = vmul.f32 %v4987_v32, %v4744_v22  ;;  %v4995_v35 = vpop.eup %3927 }
 0xc6b   :  { %v1111_v18 = vsel %vm295_vm1, %v1105_v11, 0.0  ;;  %1109 = vadd.xlane.f32.xlu1 %v1108_v14  ;;  %v1107_v54 = vmul.f32 %v4995_v35, %v4744_v22 }
 0xc6c   :  { %1112 = vadd.xlane.f32.xlu0 %v1111_v18  ;;  %v1114_v38 = vsel %vm295_vm1, %v1106_v15, 0.0 }
 0xc6d   :  { %1115 = vadd.xlane.f32.xlu2 %v1114_v38  ;;  %v1117_v55 = vsel %vm295_vm1, %v1107_v54, 0.0 }
 0xc74   :  { %1118 = vadd.xlane.f32.xlu0 %v1117_v55 }
 0xcde   :  { %v1110_v62 = vpop.xlane.xlu1 %1109 }
 0xcdf   :  { %v1113_v8 = vpop.xlane.xlu0 %1112  ;;  %v1120_v39 = vadd.f32 %v1110_v62, %v4770_v37 }
 0xce0   :  { %v1116_v40 = vpop.xlane.xlu2 %1115  ;;  %v1121_v44 = vadd.f32 %v1113_v8, %v4773_v41 }
 0xce1   :  { %v1124_v42 = vmul.f32 1.442695, %v1120_v39  ;;  %v1122_v43 = vadd.f32 %v1116_v40, %v4776_v49 }
 0xce2   :  { %v1126_v46 = vmul.f32 1.442695, %v1121_v44 }
 0xce3   :  { %3929 = vpow2.f32 %v1124_v42  ;;  %v1128_v45 = vmul.f32 1.442695, %v1122_v43 }
 0xce5   :  { %3931 = vpow2.f32 %v1128_v45 }
 0xce6   :  { %3933 = vpow2.f32 %v1126_v46 }
 0xce7   :  { %v1119_v47 = vpop.xlane.xlu0 %1118 }
 0xce8   :  { %v1123_v22 = vadd.f32 %v1119_v47, %v4779_v52 }
 0xce9   :  { %v3930_v57 = vpop.eup %3929 }
 0xcea   :  { %v1130_v58 = vmul.f32 1.442695, %v1123_v22  ;;  %1165 = vperm.xlu0 %3853, %v3930_v57  }
 0xceb   :  { %v3932_v12 = vpop.eup %3931 }
 0xcec   :  { %3935 = vpow2.f32 %v1130_v58  ;;  %1171 = vperm.xlu1 %3854, %v3932_v12   ;;  %v3934_v17 = vpop.eup %3933 }
 0xcf2   :  { %v3936_v19 = vpop.eup %3935  ;;  %1168 = vperm.xlu0 %3853, %v3934_v17  }
 0xcf3   :  { %1174 = vperm.xlu2 %3852, %v3936_v19  }
 0xd4d   :  { %v1175_v1 = vpop.permute.xlu2 %1174 }
 0xd4e   :  { %v1180_v48 = vperm.slane %v1175_v1, %v4786_v61  ;;  %v1362_v1 = vpop.f32.mrf.mxu1 }
 0xd5c   :  { %v1166_v13 = vpop.permute.xlu0 %1165 }
 0xd5d   :  { %v1176_v50 = vperm.slane %v1166_v13, %v4783_v60 }
 0xd5e   :  { %v1172_v16 = vpop.permute.xlu1 %1171 }
 0xd5f   :  { %v1179_v56 = vperm.slane %v1172_v16, %v4783_v60 }
 0xd61   :  { %v1181_v20 = vsel %vm432_vm2, %v1180_v48, %v1179_v56 }
 0xd64   :  { %v1169_v3 = vpop.permute.xlu0 %1168 }
 0xd65   :  { %v1177_v51 = vperm.slane %v1169_v3, %v4786_v61 }
 0xd67   :  { %v1178_v53 = vsel %vm432_vm2, %v1177_v51, %v1176_v50 }
 0xd68   :  { %v1182_v24 = vsel %vm437_vm3, %v1181_v20, %v1178_v53 }
 0xd69   :  { %v1184_v29 = vsel %vm440_vm4, %v1182_v24, 0.0 }
 0xd6a   :  { %1185 = vadd.xlane.f32.xlu0 %v1184_v29 }
 0xddd   :  { %v1186_v11 = vpop.xlane.xlu0 %1185 }
 0xdde   :  { %3937 = vrcp.f32 %v1186_v11 }
 0xde4   :  { %v3938_v14 = vpop.eup %3937 }
 0xde5   :  { %v1189_v15 = vperm.slane %v3938_v14, 0  ;;  %v1190_v54 = vperm.slane %v3938_v14, 1 }
 0xde7   :  { %v1194_v18 = vmul.f32 %v3934_v17, %v1189_v15  ;;  %v1193_v38 = vmul.f32 %v3930_v57, %v1189_v15  ;;  %v1196_v55 = vmul.f32 %v3936_v19, %v1190_v54  ;;  %v1195_v62 = vmul.f32 %v3932_v12, %v1190_v54  ;;  %v1305_v19 = vld [vmem:[#allocation2 + $0x4] sm:$0x3] }
 0xde9   :  { %1244 = vperm.xlu2 %3852, %v1194_v18   ;;  %1241 = vperm.xlu1 %3854, %v1193_v38  }
 0xdf1   :  { %1277 = vperm.xlu2 %3852, %v1196_v55   ;;  %1274 = vperm.xlu1 %3854, %v1195_v62  }
 0xe43   :  { %v1245_v8 = vpop.permute.xlu2 %1244 }
 0xe44   :  { %v1247_v40 = vperm.slane %v1245_v8, %v4786_v61 }
 0xe4b   :  { %v1278_v44 = vpop.permute.xlu2 %1277 }
 0xe4c   :  { %v1280_v46 = vperm.slane %v1278_v44, %v4786_v61 }
 0xe5b   :  { %v1242_v39 = vpop.permute.xlu1 %1241 }
 0xe5c   :  { %v1246_v42 = vperm.slane %v1242_v39, %v4783_v60 }
 0xe5e   :  { %v1248_v43 = vsel %vm432_vm2, %v1247_v40, %v1246_v42 }
 0xe5f   :  { %3779 = vmatmul.msk.f32.vlgmr.msra.gmra.mxu2 %vm506_vm5, %v1248_v43 }
 0xe63   :  { %v1275_v45 = vpop.permute.xlu1 %1274 }
 0xe64   :  { %v1279_v47 = vperm.slane %v1275_v45, %v4783_v60  ;;  %v5032_v45 = vld [vmem:[#allocation14 + $0x18] sm:$0xff] }
 0xe65   :  { %1447 = vmatpush.msrb.mxu0 %v5032_v45 }
 0xe66   :  { %v1281_v22 = vsel %vm432_vm2, %v1280_v46, %v1279_v47  ;;  %v5034_v46 = vld [vmem:[#allocation14 + $0x10] sm:$0xff]  ;;  %v5037_v47 = vld [vmem:[#allocation14 + $0x8] sm:$0xff] }
 0xe67   :  { %3780 = vmatmul.msk.f32.vlgmr.msra.gmra.mxu0 %vm506_vm5, %v1281_v22  ;;  %v5040_v22 = vld [vmem:[#allocation14] sm:$0xff] }
 0xe68   :  { %1448 = vmatpush.msrb.mxu0 %v5034_v46 }
 0xe6a   :  { %1449 = vmatpush.msrb.mxu0 %v5037_v47 }
 0xe6c   :  { %1450 = vmatpush.msrb.mxu0 %v5040_v22 }
 0xe6e   :  { %1726 = vmatpush.msra.mxu0 %v4847_v63 }
 0xe70   :  { %1727 = vmatpush.msra.mxu0 %v4855_v9 }
 0xe72   :  { %1728 = vmatpush.msra.mxu0 %v4857_v10 }
 0xe74   :  { %1729 = vmatpush.msra.mxu0 %v4862_v5 }
 0xee2   :  { %v1268_v12 = vpop.f32.mrf.mxu2 }
 0xee4   :  { %v1301_v57 = vpop.f32.mrf.mxu0 }
 0xee5   :  { %v1312_v58 = vrot.slane %v1301_v57, 7 }
 0xee7   :  { %v1313_v17 = vsel %vm437_vm3, %v1312_v58, %v1268_v12 }
 0xee8   :  { %3781 = vmatmul.msk.f32.vlgmr.msra.gmra.mxu3 %vm248_vm0, %v1313_v17  ;;  %v5061_v17 = vld [vmem:[#allocation8] sm:$0xff] }
 0xf6b   :  { %v1333_v13 = vpop.f32.mrf.mxu3 }
 0xf6c   :  { %v1336_v16 = vadd.f32 %v1333_v13, %v1305_v19  ;;  %v5063_v19 = vld [vmem:[#allocation8 + $0x8] sm:$0xff] }
 0xf6e   :  { %3783 = vmatmul.msk.f32.vlgmr.msrb.gmra.mxu2 %vm248_vm0, %v1336_v16 }
 0xff1   :  { %v1385_v56 = vpop.f32.mrf.mxu2 }
 0xff2   :  { %v1386_v3 = vadd.f32 %v1385_v56, %v1362_v1  ;;  %v5065_v1 = vld [vmem:[#allocation8 + $0x10] sm:$0xff]  ;;  %v5067_v56 = vld [vmem:[#allocation8 + $0x18] sm:$0xff] }
 0xff4   :  { %v1388_v48 = vadd.f32 %v4887_v0, %v1386_v3 }
 0xff6   :  { %3939 = vtanh.f32 %v1388_v48  ;;  %v3784_v51 = vmul.f32 -1.442695, %v1388_v48 }
 0xff8   :  { %3941 = vpow2.f32 %v3784_v51 }
 0xffc   :  { %v3940_v50 = vpop.eup %3939 }
 0xffd   :  { %1411 = vrot.lane.b32.xlu1 %v3940_v50, %s4540_s20 }
 0xffe   :  { %v3942_v53 = vpop.eup %3941 }
 0xfff   :  { %v1392_v20 = vadd.f32 1.0, %v3942_v53 }
0x1001   :  { %3943 = vrcp.f32 %v1392_v20  ;;  %v1404_v18 = vand.u32 2147483648, %v1392_v20  ;;  %vm1398_vm15 = vweird.f32 %v1392_v20  ;;  %v1402_v38 = vand.u32 2147483647, %v1392_v20 }
0x1003   :  { %v1405_v55 = vor.u32 1.1754944e-38, %v1404_v18  ;;  %vm1403_vm7 = vcmp.eq.f32.partialorder %v1402_v38, 8.507059e+37 }
0x1007   :  { %v3944_v24 = vpop.eup %3943 }
0x1008   :  { %v1394_v29 = vmul.f32 %v3944_v24, %v1392_v20  ;;  %vm1399_vm14 = vweird.f32 %v3944_v24 }
0x1009   :  { %vm1400_vm6 = vmor %vm1398_vm15, %vm1399_vm14  ;;  %vm3288_vm14 = vcmask 1045504  }
0x100a   :  { %v1395_v11 = vsub.f32 1.0, %v1394_v29  ;;  %v5080_v29 = vld [vmem:[%s6083_s8] ss:$0 sm:$0xff] }
0x100c   :  { %v1396_v14 = vmul.f32 %v3944_v24, %v1395_v11 }
0x100e   :  { %v1397_v15 = vadd.f32 %v3944_v24, %v1396_v14 }
0x1010   :  { %v1401_v54 = vsel %vm1400_vm6, %v3944_v24, %v1397_v15 }
0x1011   :  { %v1406_v8 = vsel %vm1403_vm7, %v1405_v55, %v1401_v54 }
0x1012   :  { %v1409_v40 = vmul.f32 %v1406_v8, %v4967_v2  ;;  %v3271_v2 = vrot.slane %v4971_v4, 6 }
0x1014   :  { %v3285_v63 = vsel %vm3284_vm8, %v4896_v59, %v3271_v2 }
0x106f   :  { %v1412_v62 = vpop.permute.xlu1 %1411 }
0x1070   :  { %v1414_v39 = vmul.f32 %v1412_v62, %v1406_v8 }
0x1072   :  { %1416 = vrot.lane.b32.xlu2 %v1414_v39, %s4540_s20 }
0x10cc   :  { %v1417_v42 = vpop.permute.xlu2 %1416 }
0x10cd   :  { %v5028_v43 = vadd.f32 %v1417_v42, %v1409_v40 }
0x10cf   :  { %3945 = vtanh.f32 %v5028_v43 }
0x10d5   :  { %v3946_v44 = vpop.eup %3945 }
0x10d6   :  { %1422 = vrot.lane.b32.xlu0 %v3946_v44, %s4540_s20 }
0x1148   :  { %v1423_v57 = vpop.permute.xlu0 %1422 }
0x1149   :  { %v5049_v58 = vmul.f32 %v1423_v57, %v1406_v8 }
0x114b   :  { %6107 = vst [vmem:[#allocation36_spill] sm:$0xff] %v5049_v58  ;;  %v3273_v12 = vrot.slane %v5049_v58, 4  ;;  %1431 = vrot.lane.b32.xlu1 %v5049_v58, %s4549_s30 }
0x114d   :  { %v5057_v9 = vsel %vm3286_vm9, %v3285_v63, %v3273_v12 }
0x11bd   :  { %v1432_v10 = vpop.permute.xlu1 %1431 }
0x11be   :  { %3785 = vmatmul.msk.f32.vlgmr.msrb.gmra.mxu0 %vm248_vm0, %v1432_v10 }
0x11c6   :  { %3789 = vmatmul.msk.f32.vlgmr.msra.gmra.mxu0 %vm248_vm0, %v1432_v10 }
0x123b   :  { %v1452_v5 = vpop.f32.mrf.mxu0 }
0x123c   :  { %v1456_v13 = vrot.slane %v1452_v5, 1  ;;  %v1461_v16 = vperm.slane %v1452_v5, 0 }
0x123e   :  { %v1462_v3 = vperm.slane %v1456_v13, 0  ;;  %v1465_v48 = vadd.f32 %v1461_v16, %v5061_v17  ;;  %v1466_v50 = vadd.f32 %v1461_v16, %v5063_v19 }
0x1240   :  { %v1467_v51 = vadd.f32 %v1462_v3, %v5065_v1  ;;  %v1468_v53 = vadd.f32 %v1462_v3, %v5067_v56  ;;  %3947 = vtanh.f32 %v1465_v48 }
0x1241   :  { %3949 = vtanh.f32 %v1466_v50 }
0x1242   :  { %3951 = vtanh.f32 %v1467_v51 }
0x1243   :  { %3953 = vtanh.f32 %v1468_v53 }
0x1246   :  { %v5073_v20 = vpop.eup %3947 }
0x1247   :  { %v5075_v24 = vpop.eup %3949  ;;  %v1473_v11 = vmul.f32 %v5080_v29, %v5073_v20 }
0x1248   :  { %v5084_v14 = vpop.eup %3951  ;;  %v1474_v15 = vmul.f32 %v5080_v29, %v5075_v24 }
0x1249   :  { %v1477_v18 = vsel %vm295_vm1, %v1473_v11, 0.0  ;;  %v1475_v38 = vmul.f32 %v5080_v29, %v5084_v14  ;;  %v5091_v54 = vpop.eup %3953 }
0x124a   :  { %v1480_v55 = vsel %vm295_vm1, %v1474_v15, 0.0  ;;  %1478 = vadd.xlane.f32.xlu2 %v1477_v18  ;;  %v1476_v8 = vmul.f32 %v5080_v29, %v5091_v54 }
0x124b   :  { %1481 = vadd.xlane.f32.xlu1 %v1480_v55  ;;  %v1483_v62 = vsel %vm295_vm1, %v1475_v38, 0.0 }
0x124c   :  { %1484 = vadd.xlane.f32.xlu0 %v1483_v62  ;;  %v1486_v39 = vsel %vm295_vm1, %v1476_v8, 0.0 }
0x1252   :  { %1487 = vadd.xlane.f32.xlu2 %v1486_v39 }
0x12bd   :  { %v1479_v40 = vpop.xlane.xlu2 %1478 }
0x12be   :  { %v1482_v42 = vpop.xlane.xlu1 %1481  ;;  %v1489_v44 = vadd.f32 %v1479_v40, %v4770_v37 }
0x12bf   :  { %v1490_v2 = vadd.f32 %v1482_v42, %v4773_v41  ;;  %v1485_v57 = vpop.xlane.xlu0 %1484 }
0x12c0   :  { %v1493_v12 = vmul.f32 1.442695, %v1489_v44  ;;  %v1491_v63 = vadd.f32 %v1485_v57, %v4776_v49 }
0x12c1   :  { %v1495_v10 = vmul.f32 1.442695, %v1490_v2 }
0x12c2   :  { %3955 = vpow2.f32 %v1493_v12  ;;  %v1497_v5 = vmul.f32 1.442695, %v1491_v63 }
0x12c3   :  { %3957 = vpow2.f32 %v1495_v10 }
0x12c4   :  { %3959 = vpow2.f32 %v1497_v5 }
0x12c5   :  { %v1488_v13 = vpop.xlane.xlu2 %1487 }
0x12c6   :  { %v1492_v16 = vadd.f32 %v1488_v13, %v4779_v52 }
0x12c8   :  { %v3956_v3 = vpop.eup %3955  ;;  %v1499_v48 = vmul.f32 1.442695, %v1492_v16 }
0x12c9   :  { %v3958_v50 = vpop.eup %3957  ;;  %1534 = vperm.xlu2 %3852, %v3956_v3  }
0x12ca   :  { %v3960_v51 = vpop.eup %3959  ;;  %3961 = vpow2.f32 %v1499_v48  ;;  %1537 = vperm.xlu1 %3854, %v3958_v50  }
0x12cb   :  { %1540 = vperm.xlu0 %3853, %v3960_v51  }
0x12d0   :  { %v3962_v53 = vpop.eup %3961 }
0x12d1   :  { %1543 = vperm.xlu2 %3852, %v3962_v53  }
0x1323   :  { %v1535_v11 = vpop.permute.xlu2 %1534 }
0x1324   :  { %v1545_v62 = vperm.slane %v1535_v11, %v4783_v60  ;;  %v5110_v11 = vld [vmem:[#allocation7 + $0x8] sm:$0xff] }
0x1325   :  { %1634 = vmatpush.msrb.mxu3 %v5110_v11 }
0x132b   :  { %v1544_v15 = vpop.permute.xlu2 %1543 }
0x132c   :  { %v1549_v8 = vperm.slane %v1544_v15, %v4786_v61  ;;  %v5113_v15 = vld [vmem:[#allocation7] sm:$0xff] }
0x132d   :  { %1635 = vmatpush.msrb.mxu3 %v5113_v15 }
0x133c   :  { %v1538_v18 = vpop.permute.xlu1 %1537 }
0x133d   :  { %v1546_v38 = vperm.slane %v1538_v18, %v4786_v61  ;;  %v1541_v55 = vpop.permute.xlu0 %1540  ;;  %v5116_v18 = vld [vmem:[#allocation7 + $0x18] sm:$0xff] }
0x133e   :  { %v1548_v39 = vperm.slane %v1541_v55, %v4783_v60  ;;  %1667 = vmatpush.msra.mxu1 %v5116_v18  ;;  %2036 = vmatpush.msrb.mxu0 %v5116_v18 }
0x133f   :  { %v1547_v40 = vsel %vm432_vm2, %v1546_v38, %v1545_v62  ;;  %v5118_v38 = vld [vmem:[#allocation7 + $0x10] sm:$0xff] }
0x1340   :  { %v1550_v42 = vsel %vm432_vm2, %v1549_v8, %v1548_v39  ;;  %1668 = vmatpush.msra.mxu1 %v5118_v38  ;;  %2037 = vmatpush.msrb.mxu0 %v5118_v38 }
0x1341   :  { %v1551_v44 = vsel %vm437_vm3, %v1550_v42, %v1547_v40  ;;  %v5146_v40 = vld [vmem:[#allocation16 + $0x8] sm:$0xff]  ;;  %v5149_v42 = vld [vmem:[#allocation16] sm:$0xff] }
0x1342   :  { %v1553_v2 = vsel %vm440_vm4, %v1551_v44, 0.0  ;;  %1816 = vmatpush.msrb.mxu1 %v5032_v45  ;;  %2185 = vmatpush.msra.mxu0 %v5032_v45  ;;  %v5152_v44 = vld [vmem:[#allocation17 + $0x18] sm:$0xff] }
0x1343   :  { %1554 = vadd.xlane.f32.xlu1 %v1553_v2  ;;  %v5154_v2 = vld [vmem:[#allocation17 + $0x10] sm:$0xff]  ;;  %1749 = vmatpush.msra.mxu3 %v5152_v44 }
0x1344   :  { %1817 = vmatpush.msrb.mxu1 %v5034_v46  ;;  %2186 = vmatpush.msra.mxu0 %v5034_v46 }
0x1345   :  { %1750 = vmatpush.msra.mxu3 %v5154_v2 }
0x1346   :  { %1818 = vmatpush.msrb.mxu1 %v5037_v47  ;;  %2187 = vmatpush.msra.mxu0 %v5037_v47 }
0x1348   :  { %1819 = vmatpush.msrb.mxu1 %v5040_v22  ;;  %2188 = vmatpush.msra.mxu0 %v5040_v22  ;;  %v5143_v22 = vld [vmem:[#allocation16 + $0x10] sm:$0xff] }
0x13b6   :  { %v1555_v57 = vpop.xlane.xlu1 %1554 }
0x13b7   :  { %3963 = vrcp.f32 %v1555_v57  ;;  %v5158_v57 = vld [vmem:[#allocation17 + $0x8] sm:$0xff] }
0x13b8   :  { %1751 = vmatpush.msra.mxu3 %v5158_v57 }
0x13bd   :  { %v3964_v12 = vpop.eup %3963 }
0x13be   :  { %v1558_v63 = vperm.slane %v3964_v12, 0  ;;  %v1559_v13 = vperm.slane %v3964_v12, 1 }
0x13c0   :  { %v1563_v10 = vmul.f32 %v3958_v50, %v1558_v63  ;;  %v1562_v5 = vmul.f32 %v3956_v3, %v1558_v63  ;;  %v1565_v16 = vmul.f32 %v3962_v53, %v1559_v13  ;;  %v1564_v48 = vmul.f32 %v3960_v51, %v1559_v13  ;;  %v5128_v3 = vld [vmem:[#allocation16 + $0x18] sm:$0xff]  ;;  %v5168_v13 = vld [vmem:[#allocation17] sm:$0xff] }
0x13c1   :  { %1697 = vmatpush.msra.mxu2 %v5128_v3  ;;  %1752 = vmatpush.msra.mxu3 %v5168_v13 }
0x13c2   :  { %1613 = vperm.xlu2 %3852, %v1563_v10   ;;  %1610 = vperm.xlu0 %3853, %v1562_v5  }
0x13c3   :  { %1698 = vmatpush.msra.mxu2 %v5143_v22 }
0x13c5   :  { %1699 = vmatpush.msra.mxu2 %v5146_v40 }
0x13c7   :  { %1700 = vmatpush.msra.mxu2 %v5149_v42 }
0x13c9   :  { %2003 = vmatpush.msrb.mxu2 %v5110_v11 }
0x13ca   :  { %1646 = vperm.xlu2 %3852, %v1565_v16   ;;  %1643 = vperm.xlu0 %3853, %v1564_v48   ;;  %v1674_v16 = vld [vmem:[#allocation2 + $0x6] sm:$0x3] }
0x13cb   :  { %2004 = vmatpush.msrb.mxu2 %v5113_v15 }
0x141c   :  { %v1614_v50 = vpop.permute.xlu2 %1613 }
0x141d   :  { %v1616_v45 = vperm.slane %v1614_v50, %v4786_v61 }
0x1424   :  { %v1647_v55 = vpop.permute.xlu2 %1646 }
0x1425   :  { %v1649_v47 = vperm.slane %v1647_v55, %v4786_v61 }
0x1434   :  { %v1611_v51 = vpop.permute.xlu0 %1610 }
0x1435   :  { %v1615_v53 = vperm.slane %v1611_v51, %v4783_v60  ;;  %v1731_v51 = vpop.f32.mrf.mxu0 }
0x1437   :  { %v1617_v46 = vsel %vm432_vm2, %v1616_v45, %v1615_v53 }
0x1438   :  { %3786 = vmatmul.msk.f32.vlgmr.msrb.gmra.mxu3 %vm506_vm5, %v1617_v46 }
0x1439   :  { %2066 = vmatpush.msrb.mxu3 %v5128_v3 }
0x143b   :  { %2067 = vmatpush.msrb.mxu3 %v5143_v22 }
0x143c   :  { %v1644_v62 = vpop.permute.xlu0 %1643 }
0x143d   :  { %v1648_v8 = vperm.slane %v1644_v62, %v4783_v60  ;;  %2068 = vmatpush.msrb.mxu3 %v5146_v40 }
0x143f   :  { %v1650_v39 = vsel %vm432_vm2, %v1649_v47, %v1648_v8  ;;  %2069 = vmatpush.msrb.mxu3 %v5149_v42 }
0x1440   :  { %3787 = vmatmul.msk.f32.vlgmr.msra.gmra.mxu1 %vm506_vm5, %v1650_v39 }
0x14bb   :  { %v1637_v10 = vpop.f32.mrf.mxu3 }
0x14bd   :  { %v1670_v12 = vpop.f32.mrf.mxu1 }
0x14be   :  { %v1681_v63 = vrot.slane %v1670_v12, 7 }
0x14c0   :  { %v1682_v5 = vsel %vm437_vm3, %v1681_v63, %v1637_v10 }
0x14c1   :  { %3788 = vmatmul.msk.f32.vlgmr.msra.gmra.mxu2 %vm248_vm0, %v1682_v5 }
0x14c2   :  { %2118 = vmatpush.msra.mxu2 %v5152_v44 }
0x14c4   :  { %2119 = vmatpush.msra.mxu2 %v5154_v2 }
0x14c6   :  { %2120 = vmatpush.msra.mxu2 %v5158_v57 }
0x14c8   :  { %2121 = vmatpush.msra.mxu2 %v5168_v13 }
0x1544   :  { %v1702_v48 = vpop.f32.mrf.mxu2 }
0x1545   :  { %v1705_v50 = vadd.f32 %v1702_v48, %v1674_v16 }
0x1547   :  { %3790 = vmatmul.msk.f32.vlgmr.msra.gmra.mxu3 %vm248_vm0, %v1705_v50 }
0x1548   :  { %2372 = vmatpush.msra.mxu3 %v5110_v11 }
0x154a   :  { %2373 = vmatpush.msra.mxu3 %v5113_v15 }
0x15ca   :  { %v1754_v45 = vpop.f32.mrf.mxu3 }
0x15cb   :  { %v1755_v53 = vadd.f32 %v1754_v45, %v1731_v51 }
0x15cd   :  { %v1757_v46 = vadd.f32 %v4887_v0, %v1755_v53 }
0x15cf   :  { %3965 = vtanh.f32 %v1757_v46  ;;  %v3791_v62 = vmul.f32 -1.442695, %v1757_v46 }
0x15d1   :  { %3967 = vpow2.f32 %v3791_v62 }
0x15d5   :  { %v3966_v55 = vpop.eup %3965 }
0x15d6   :  { %1780 = vrot.lane.b32.xlu0 %v3966_v55, %s4540_s20 }
0x15d7   :  { %v3968_v47 = vpop.eup %3967 }
0x15d8   :  { %v1761_v8 = vadd.f32 1.0, %v3968_v47 }
0x15da   :  { %3969 = vrcp.f32 %v1761_v8  ;;  %v1773_v15 = vand.u32 2147483648, %v1761_v8  ;;  %vm1767_vm11 = vweird.f32 %v1761_v8  ;;  %v1771_v5 = vand.u32 2147483647, %v1761_v8 }
0x15dc   :  { %v1774_v16 = vor.u32 1.1754944e-38, %v1773_v15  ;;  %vm1772_vm13 = vcmp.eq.f32.partialorder %v1771_v5, 8.507059e+37 }
0x15e0   :  { %v3970_v39 = vpop.eup %3969 }
0x15e1   :  { %v1763_v12 = vmul.f32 %v3970_v39, %v1761_v8  ;;  %vm1768_vm10 = vweird.f32 %v3970_v39 }
0x15e2   :  { %vm1769_vm12 = vmor %vm1767_vm11, %vm1768_vm10 }
0x15e3   :  { %v1764_v63 = vsub.f32 1.0, %v1763_v12  ;;  %v5192_v12 = vld [vmem:[#allocation19 + $0x18] sm:$0xff] }
0x15e4   :  { %2095 = vmatpush.msra.mxu1 %v5192_v12 }
0x15e5   :  { %v1765_v11 = vmul.f32 %v3970_v39, %v1764_v63  ;;  %v5197_v63 = vld [vmem:[#allocation19 + $0x8] sm:$0xff] }
0x15e7   :  { %v1766_v10 = vadd.f32 %v3970_v39, %v1765_v11  ;;  %v5200_v11 = vld [vmem:[#allocation19] sm:$0xff] }
0x15e9   :  { %v1770_v0 = vsel %vm1769_vm12, %v3970_v39, %v1766_v10 }
0x15ea   :  { %v1775_v50 = vsel %vm1772_vm13, %v1774_v16, %v1770_v0 }
0x15eb   :  { %v1778_v45 = vmul.f32 %v1775_v50, %v5028_v43  ;;  %v5194_v43 = vld [vmem:[#allocation19 + $0x10] sm:$0xff] }
0x15ec   :  { %2096 = vmatpush.msra.mxu1 %v5194_v43 }
0x15ee   :  { %2097 = vmatpush.msra.mxu1 %v5197_v63 }
0x15f0   :  { %2098 = vmatpush.msra.mxu1 %v5200_v11 }
0x1648   :  { %v1781_v48 = vpop.permute.xlu0 %1780 }
0x1649   :  { %v1783_v51 = vmul.f32 %v1781_v48, %v1775_v50 }
0x164b   :  { %1785 = vrot.lane.b32.xlu2 %v1783_v51, %s4540_s20 }
0x16a5   :  { %v1786_v53 = vpop.permute.xlu2 %1785 }
0x16a6   :  { %v5183_v46 = vadd.f32 %v1786_v53, %v1778_v45 }
0x16a8   :  { %3971 = vtanh.f32 %v5183_v46 }
0x16ae   :  { %v3972_v55 = vpop.eup %3971 }
0x16af   :  { %1791 = vrot.lane.b32.xlu0 %v3972_v55, %s4540_s20 }
0x1721   :  { %v1792_v62 = vpop.permute.xlu0 %1791 }
0x1722   :  { %v1794_v47 = vmul.f32 %v1792_v62, %v1775_v50 }
0x1724   :  { %v3275_v8 = vrot.slane %v1794_v47, 2  ;;  %1800 = vrot.lane.b32.xlu2 %v1794_v47, %s4549_s30 }
0x1726   :  { %v5190_v39 = vsel %vm3288_vm14, %v5057_v9, %v3275_v8 }
0x1727   :  { %6108 = vst [vmem:[#allocation37_spill] sm:$0xff] %v5190_v39 }
0x177e   :  { %v5204_v10 = vpop.permute.xlu2 %1800 }
0x177f   :  { %6109 = vst [vmem:[#allocation38_spill] sm:$0xff] %v5204_v10  ;;  %3792 = vmatmul.msk.f32.vlgmr.msrb.gmra.mxu1 %vm248_vm0, %v5204_v10 }
0x1780   :  { %2405 = vmatpush.msrb.mxu1 %v5116_v18 }
0x1782   :  { %2406 = vmatpush.msrb.mxu1 %v5118_v38 }
0x1787   :  { %3796 = vmatmul.msk.f32.vlgmr.msra.gmra.mxu1 %vm248_vm0, %v5204_v10 }
0x17fc   :  { %v1821_v9 = vpop.f32.mrf.mxu1 }
0x17fd   :  { %v1825_v15 = vrot.slane %v1821_v9, 1  ;;  %v1830_v5 = vperm.slane %v1821_v9, 0 }
0x17ff   :  { %v1831_v0 = vperm.slane %v1825_v15, 0  ;;  %v1834_v16 = vadd.f32 %v1830_v5, %v5061_v17  ;;  %v1835_v48 = vadd.f32 %v1830_v5, %v5063_v19 }
0x1801   :  { %v1836_v50 = vadd.f32 %v1831_v0, %v5065_v1  ;;  %3973 = vtanh.f32 %v1834_v16  ;;  %v1837_v51 = vadd.f32 %v1831_v0, %v5067_v56 }
0x1802   :  { %3975 = vtanh.f32 %v1835_v48 }
0x1803   :  { %3977 = vtanh.f32 %v1836_v50 }
0x1804   :  { %3979 = vtanh.f32 %v1837_v51 }
0x1807   :  { %v5216_v18 = vpop.eup %3973 }
0x1808   :  { %v5218_v38 = vpop.eup %3975  ;;  %v1842_v45 = vmul.f32 %v5080_v29, %v5216_v18 }
0x1809   :  { %v5222_v53 = vpop.eup %3977  ;;  %v1843_v55 = vmul.f32 %v5080_v29, %v5218_v38 }
0x180a   :  { %6110 = vst [vmem:[#allocation39_spill] sm:$0xff] %v5222_v53  ;;  %v1846_v62 = vsel %vm295_vm1, %v1842_v45, 0.0  ;;  %v1844_v47 = vmul.f32 %v5080_v29, %v5222_v53  ;;  %v5231_v15 = vpop.eup %3979 }
0x180b   :  { %v1849_v8 = vsel %vm295_vm1, %v1843_v55, 0.0  ;;  %1847 = vadd.xlane.f32.xlu0 %v1846_v62  ;;  %6111 = vst [vmem:[#allocation40_spill] sm:$0xff] %v5231_v15  ;;  %v1845_v5 = vmul.f32 %v5080_v29, %v5231_v15 }
0x180c   :  { %1850 = vadd.xlane.f32.xlu2 %v1849_v8  ;;  %v1852_v9 = vsel %vm295_vm1, %v1844_v47, 0.0 }
0x180d   :  { %1853 = vadd.xlane.f32.xlu1 %v1852_v9  ;;  %v1855_v0 = vsel %vm295_vm1, %v1845_v5, 0.0 }
0x1815   :  { %1856 = vadd.xlane.f32.xlu1 %v1855_v0 }
0x187e   :  { %v1848_v16 = vpop.xlane.xlu0 %1847 }
0x187f   :  { %v1851_v48 = vpop.xlane.xlu2 %1850  ;;  %v1858_v50 = vadd.f32 %v1848_v16, %v4770_v37 }
0x1880   :  { %v1859_v51 = vadd.f32 %v1851_v48, %v4773_v41  ;;  %v1854_v45 = vpop.xlane.xlu1 %1853 }
0x1881   :  { %v1862_v55 = vmul.f32 1.442695, %v1858_v50  ;;  %v1860_v62 = vadd.f32 %v1854_v45, %v4776_v49 }
0x1882   :  { %v1864_v47 = vmul.f32 1.442695, %v1859_v51 }
0x1883   :  { %3981 = vpow2.f32 %v1862_v55  ;;  %v1866_v8 = vmul.f32 1.442695, %v1860_v62 }
0x1884   :  { %3983 = vpow2.f32 %v1864_v47 }
0x1885   :  { %3985 = vpow2.f32 %v1866_v8 }
0x1888   :  { %v1857_v9 = vpop.xlane.xlu1 %1856 }
0x1889   :  { %v3982_v36 = vpop.eup %3981  ;;  %v1861_v5 = vadd.f32 %v1857_v9, %v4779_v52 }
0x188a   :  { %v3984_v0 = vpop.eup %3983  ;;  %1903 = vperm.xlu1 %3854, %v3982_v36  }
0x188b   :  { %v3986_v39 = vpop.eup %3985  ;;  %v1868_v10 = vmul.f32 1.442695, %v1861_v5  ;;  %1906 = vperm.xlu0 %3853, %v3984_v0  }
0x188c   :  { %1909 = vperm.xlu2 %3852, %v3986_v39  }
0x188d   :  { %3987 = vpow2.f32 %v1868_v10 }
0x1893   :  { %v3988_v16 = vpop.eup %3987 }
0x1894   :  { %1912 = vperm.xlu1 %3854, %v3988_v16  }
0x18e6   :  { %v1910_v51 = vpop.permute.xlu2 %1909 }
0x18e7   :  { %v1917_v47 = vperm.slane %v1910_v51, %v4783_v60 }
0x18fc   :  { %v1904_v48 = vpop.permute.xlu1 %1903 }
0x18fd   :  { %v1907_v50 = vpop.permute.xlu0 %1906  ;;  %v1914_v55 = vperm.slane %v1904_v48, %v4783_v60 }
0x18fe   :  { %v1915_v45 = vperm.slane %v1907_v50, %v4786_v61 }
0x1900   :  { %v1916_v9 = vsel %vm432_vm2, %v1915_v45, %v1914_v55 }
0x1906   :  { %v1913_v62 = vpop.permute.xlu1 %1912 }
0x1907   :  { %v1918_v8 = vperm.slane %v1913_v62, %v4786_v61 }
0x1909   :  { %v1919_v5 = vsel %vm432_vm2, %v1918_v8, %v1917_v47 }
0x190a   :  { %v1920_v10 = vsel %vm437_vm3, %v1919_v5, %v1916_v9  ;;  %v2100_v9 = vpop.f32.mrf.mxu1 }
0x190b   :  { %v1922_v58 = vsel %vm440_vm4, %v1920_v10, 0.0 }
0x190c   :  { %1923 = vadd.xlane.f32.xlu1 %v1922_v58 }
0x197f   :  { %v1924_v59 = vpop.xlane.xlu1 %1923 }
0x1980   :  { %3989 = vrcp.f32 %v1924_v59 }
0x1986   :  { %v3990_v4 = vpop.eup %3989 }
0x1987   :  { %v1927_v50 = vperm.slane %v3990_v4, 0  ;;  %v1928_v51 = vperm.slane %v3990_v4, 1 }
0x1989   :  { %v1932_v53 = vmul.f32 %v3984_v0, %v1927_v50  ;;  %v1931_v48 = vmul.f32 %v3982_v36, %v1927_v50  ;;  %v1934_v15 = vmul.f32 %v3988_v16, %v1928_v51  ;;  %v1933_v62 = vmul.f32 %v3986_v39, %v1928_v51  ;;  %v5274_v50 = vld [vmem:[%s6087_s12] ss:$0 sm:$0xff] }
0x198b   :  { %1982 = vperm.xlu2 %3852, %v1932_v53   ;;  %1979 = vperm.xlu0 %3853, %v1931_v48  }
0x1993   :  { %2015 = vperm.xlu2 %3852, %v1934_v15   ;;  %2012 = vperm.xlu0 %3853, %v1933_v62  }
0x19e5   :  { %v1983_v45 = vpop.permute.xlu2 %1982 }
0x19e6   :  { %v1985_v47 = vperm.slane %v1983_v45, %v4786_v61 }
0x19ed   :  { %v2016_v36 = vpop.permute.xlu2 %2015 }
0x19ee   :  { %v2018_v4 = vperm.slane %v2016_v36, %v4786_v61 }
0x19fd   :  { %v1980_v55 = vpop.permute.xlu0 %1979 }
0x19fe   :  { %v1984_v8 = vperm.slane %v1980_v55, %v4783_v60 }
0x1a00   :  { %v1986_v58 = vsel %vm432_vm2, %v1985_v47, %v1984_v8 }
0x1a01   :  { %3793 = vmatmul.msk.f32.vlgmr.msrb.gmra.mxu2 %vm506_vm5, %v1986_v58 }
0x1a02   :  { %2435 = vmatpush.msrb.mxu2 %v5128_v3 }
0x1a04   :  { %2436 = vmatpush.msrb.mxu2 %v5143_v22 }
0x1a05   :  { %v2013_v59 = vpop.permute.xlu0 %2012 }
0x1a06   :  { %v2017_v39 = vperm.slane %v2013_v59, %v4783_v60  ;;  %2437 = vmatpush.msrb.mxu2 %v5146_v40  ;;  %v2043_v40 = vld [vmem:[#allocation2 + $0x8] sm:$0x3] }
0x1a08   :  { %v2019_v53 = vsel %vm432_vm2, %v2018_v4, %v2017_v39  ;;  %2438 = vmatpush.msrb.mxu2 %v5149_v42 }
0x1a09   :  { %3794 = vmatmul.msk.f32.vlgmr.msrb.gmra.mxu0 %vm506_vm5, %v2019_v53 }
0x1a0a   :  { %2464 = vmatpush.msrb.mxu0 %v5192_v12 }
0x1a0c   :  { %2465 = vmatpush.msrb.mxu0 %v5194_v43 }
0x1a0e   :  { %2466 = vmatpush.msrb.mxu0 %v5197_v63 }
0x1a10   :  { %2467 = vmatpush.msrb.mxu0 %v5200_v11 }
0x1a84   :  { %v2006_v15 = vpop.f32.mrf.mxu2 }
0x1a86   :  { %v2039_v3 = vpop.f32.mrf.mxu0 }
0x1a87   :  { %v2050_v22 = vrot.slane %v2039_v3, 7 }
0x1a89   :  { %v2051_v0 = vsel %vm437_vm3, %v2050_v22, %v2006_v15 }
0x1a8a   :  { %3795 = vmatmul.msk.f32.vlgmr.msrb.gmra.mxu3 %vm248_vm0, %v2051_v0 }
0x1a8b   :  { %2487 = vmatpush.msrb.mxu3 %v5152_v44 }
0x1a8d   :  { %2488 = vmatpush.msrb.mxu3 %v5154_v2 }
0x1a8f   :  { %2489 = vmatpush.msrb.mxu3 %v5158_v57 }
0x1a91   :  { %2490 = vmatpush.msrb.mxu3 %v5168_v13 }
0x1b0d   :  { %v2071_v42 = vpop.f32.mrf.mxu3 }
0x1b0e   :  { %v2074_v16 = vadd.f32 %v2071_v42, %v2043_v40 }
0x1b10   :  { %3797 = vmatmul.msk.f32.vlgmr.msra.gmra.mxu2 %vm248_vm0, %v2074_v16 }
0x1b93   :  { %v2123_v5 = vpop.f32.mrf.mxu2 }
0x1b94   :  { %v2124_v10 = vadd.f32 %v2123_v5, %v2100_v9 }
0x1b96   :  { %v2126_v44 = vadd.f32 %v5274_v50, %v2124_v10 }
0x1b98   :  { %3991 = vtanh.f32 %v2126_v44  ;;  %v3798_v57 = vmul.f32 -1.442695, %v2126_v44 }
0x1b9a   :  { %3993 = vpow2.f32 %v3798_v57 }
0x1b9e   :  { %v3992_v2 = vpop.eup %3991 }
0x1b9f   :  { %2149 = vrot.lane.b32.xlu0 %v3992_v2, %s4540_s20 }
0x1ba0   :  { %v3994_v13 = vpop.eup %3993 }
0x1ba1   :  { %v2130_v48 = vadd.f32 1.0, %v3994_v13 }
0x1ba3   :  { %3995 = vrcp.f32 %v2130_v48  ;;  %v2142_v8 = vand.u32 2147483648, %v2130_v48  ;;  %vm2136_vm6 = vweird.f32 %v2130_v48  ;;  %v2140_v58 = vand.u32 2147483647, %v2130_v48 }
0x1ba5   :  { %v2143_v59 = vor.u32 1.1754944e-38, %v2142_v8  ;;  %vm2141_vm10 = vcmp.eq.f32.partialorder %v2140_v58, 8.507059e+37 }
0x1ba9   :  { %v3996_v51 = vpop.eup %3995 }
0x1baa   :  { %v2132_v62 = vmul.f32 %v3996_v51, %v2130_v48  ;;  %vm2137_vm15 = vweird.f32 %v3996_v51 }
0x1bab   :  { %vm2138_vm7 = vmor %vm2136_vm6, %vm2137_vm15 }
0x1bac   :  { %v2133_v45 = vsub.f32 1.0, %v2132_v62 }
0x1bae   :  { %v2134_v55 = vmul.f32 %v3996_v51, %v2133_v45 }
0x1bb0   :  { %v2135_v47 = vadd.f32 %v3996_v51, %v2134_v55 }
0x1bb2   :  { %v2139_v36 = vsel %vm2138_vm7, %v3996_v51, %v2135_v47 }
0x1bb3   :  { %v2144_v39 = vsel %vm2141_vm10, %v2143_v59, %v2139_v36 }
0x1bb4   :  { %v2147_v3 = vmul.f32 %v2144_v39, %v5183_v46 }
0x1c11   :  { %v2150_v4 = vpop.permute.xlu0 %2149 }
0x1c12   :  { %v2152_v53 = vmul.f32 %v2150_v4, %v2144_v39 }
0x1c14   :  { %2154 = vrot.lane.b32.xlu2 %v2152_v53, %s4540_s20 }
0x1c6e   :  { %v2155_v22 = vpop.permute.xlu2 %2154 }
0x1c6f   :  { %v5280_v15 = vadd.f32 %v2155_v22, %v2147_v3 }
0x1c71   :  { %3997 = vtanh.f32 %v5280_v15 }
0x1c77   :  { %v3998_v0 = vpop.eup %3997 }
0x1c78   :  { %2160 = vrot.lane.b32.xlu0 %v3998_v0, %s4540_s20 }
0x1cea   :  { %v2161_v40 = vpop.permute.xlu0 %2160 }
0x1ceb   :  { %v5284_v42 = vmul.f32 %v2161_v40, %v2144_v39 }
0x1ced   :  { %2169 = vrot.lane.b32.xlu2 %v5284_v42, %s4549_s30 }
0x1d47   :  { %v2170_v16 = vpop.permute.xlu2 %2169 }
0x1d48   :  { %3799 = vmatmul.msk.f32.vlgmr.msra.gmra.mxu0 %vm248_vm0, %v2170_v16 }
0x1d50   :  { %3803 = vmatmul.msk.f32.vlgmr.msrb.gmra.mxu0 %vm248_vm0, %v2170_v16 }
0x1dc5   :  { %v2190_v46 = vpop.f32.mrf.mxu0 }
0x1dc6   :  { %v2194_v9 = vrot.slane %v2190_v46, 1  ;;  %v2199_v5 = vperm.slane %v2190_v46, 0 }
0x1dc8   :  { %v2200_v10 = vperm.slane %v2194_v9, 0  ;;  %v2203_v44 = vadd.f32 %v2199_v5, %v5061_v17  ;;  %v2204_v2 = vadd.f32 %v2199_v5, %v5063_v19 }
0x1dca   :  { %v2205_v57 = vadd.f32 %v2200_v10, %v5065_v1  ;;  %3999 = vtanh.f32 %v2203_v44  ;;  %v2206_v13 = vadd.f32 %v2200_v10, %v5067_v56 }
0x1dcb   :  { %4001 = vtanh.f32 %v2204_v2 }
0x1dcc   :  { %4003 = vtanh.f32 %v2205_v57 }
0x1dcd   :  { %4005 = vtanh.f32 %v2206_v13 }
0x1dd0   :  { %v5294_v48 = vpop.eup %3999 }
0x1dd1   :  { %v5296_v51 = vpop.eup %4001  ;;  %v2211_v62 = vmul.f32 %v5080_v29, %v5294_v48 }
0x1dd2   :  { %v5300_v45 = vpop.eup %4003  ;;  %v2212_v17 = vmul.f32 %v5080_v29, %v5296_v51 }
0x1dd3   :  { %v2215_v19 = vsel %vm295_vm1, %v2211_v62, 0.0  ;;  %v2213_v1 = vmul.f32 %v5080_v29, %v5300_v45  ;;  %v5308_v55 = vpop.eup %4005 }
0x1dd4   :  { %v2218_v56 = vsel %vm295_vm1, %v2212_v17, 0.0  ;;  %2216 = vadd.xlane.f32.xlu0 %v2215_v19  ;;  %v2214_v8 = vmul.f32 %v5080_v29, %v5308_v55 }
0x1dd5   :  { %2219 = vadd.xlane.f32.xlu1 %v2218_v56  ;;  %v2221_v47 = vsel %vm295_vm1, %v2213_v1, 0.0 }
0x1dd6   :  { %2222 = vadd.xlane.f32.xlu2 %v2221_v47  ;;  %v2224_v58 = vsel %vm295_vm1, %v2214_v8, 0.0 }
0x1ddd   :  { %2225 = vadd.xlane.f32.xlu1 %v2224_v58 }
0x1e47   :  { %v2217_v36 = vpop.xlane.xlu0 %2216 }
0x1e48   :  { %v2220_v59 = vpop.xlane.xlu1 %2219  ;;  %v2227_v4 = vadd.f32 %v2217_v36, %v4770_v37 }
0x1e49   :  { %v2228_v39 = vadd.f32 %v2220_v59, %v4773_v41  ;;  %v2223_v53 = vpop.xlane.xlu2 %2222 }
0x1e4a   :  { %v2231_v3 = vmul.f32 1.442695, %v2227_v4  ;;  %v2229_v0 = vadd.f32 %v2223_v53, %v4776_v49 }
0x1e4b   :  { %v2233_v22 = vmul.f32 1.442695, %v2228_v39 }
0x1e4c   :  { %4007 = vpow2.f32 %v2231_v3  ;;  %v2235_v40 = vmul.f32 1.442695, %v2229_v0 }
0x1e4d   :  { %4009 = vpow2.f32 %v2233_v22 }
0x1e4e   :  { %4011 = vpow2.f32 %v2235_v40 }
0x1e50   :  { %v2226_v16 = vpop.xlane.xlu1 %2225 }
0x1e51   :  { %v2230_v46 = vadd.f32 %v2226_v16, %v4779_v52 }
0x1e52   :  { %v4008_v9 = vpop.eup %4007 }
0x1e53   :  { %v4010_v5 = vpop.eup %4009  ;;  %v2237_v10 = vmul.f32 1.442695, %v2230_v46  ;;  %2272 = vperm.xlu1 %3854, %v4008_v9  }
0x1e54   :  { %2275 = vperm.xlu0 %3853, %v4010_v5   ;;  %v4012_v44 = vpop.eup %4011 }
0x1e55   :  { %4013 = vpow2.f32 %v2237_v10 }
0x1e5b   :  { %v4014_v2 = vpop.eup %4013  ;;  %2278 = vperm.xlu1 %3854, %v4012_v44  }
0x1e5c   :  { %2281 = vperm.xlu2 %3852, %v4014_v2  }
0x1eb6   :  { %v2282_v62 = vpop.permute.xlu2 %2281 }
0x1eb7   :  { %v2287_v56 = vperm.slane %v2282_v62, %v4786_v61 }
0x1ec5   :  { %v2273_v57 = vpop.permute.xlu1 %2272 }
0x1ec6   :  { %v2276_v13 = vpop.permute.xlu0 %2275  ;;  %v2283_v19 = vperm.slane %v2273_v57, %v4783_v60 }
0x1ec7   :  { %v2284_v17 = vperm.slane %v2276_v13, %v4786_v61 }
0x1ec9   :  { %v2285_v8 = vsel %vm432_vm2, %v2284_v17, %v2283_v19 }
0x1ecd   :  { %v2279_v1 = vpop.permute.xlu1 %2278 }
0x1ece   :  { %v2286_v47 = vperm.slane %v2279_v1, %v4783_v60 }
0x1ed0   :  { %v2288_v58 = vsel %vm432_vm2, %v2287_v56, %v2286_v47 }
0x1ed1   :  { %v2289_v36 = vsel %vm437_vm3, %v2288_v58, %v2285_v8  ;;  %v2412_v8 = vld [vmem:[#allocation2 + $0xa] sm:$0x3] }
0x1ed2   :  { %v2291_v59 = vsel %vm440_vm4, %v2289_v36, 0.0 }
0x1ed3   :  { %2292 = vadd.xlane.f32.xlu1 %v2291_v59  ;;  %v2469_v59 = vpop.f32.mrf.mxu0 }
0x1f46   :  { %v2293_v4 = vpop.xlane.xlu1 %2292 }
0x1f47   :  { %4015 = vrcp.f32 %v2293_v4 }
0x1f4d   :  { %v4016_v39 = vpop.eup %4015 }
0x1f4e   :  { %v2297_v53 = vperm.slane %v4016_v39, 1  ;;  %v2296_v3 = vperm.slane %v4016_v39, 0 }
0x1f50   :  { %v2302_v22 = vmul.f32 %v4012_v44, %v2297_v53  ;;  %v2300_v0 = vmul.f32 %v4008_v9, %v2296_v3  ;;  %v2301_v40 = vmul.f32 %v4010_v5, %v2296_v3  ;;  %v2303_v16 = vmul.f32 %v4014_v2, %v2297_v53 }
0x1f52   :  { %2381 = vperm.xlu2 %3852, %v2302_v22   ;;  %2348 = vperm.xlu0 %3853, %v2300_v0  }
0x1f5a   :  { %2351 = vperm.xlu0 %3853, %v2301_v40  }
0x1f62   :  { %2384 = vperm.xlu0 %3853, %v2303_v16  }
0x1fac   :  { %v2382_v17 = vpop.permute.xlu2 %2381 }
0x1fad   :  { %v2386_v9 = vperm.slane %v2382_v17, %v4783_v60 }
0x1fc4   :  { %v2349_v46 = vpop.permute.xlu0 %2348 }
0x1fc5   :  { %v2353_v57 = vperm.slane %v2349_v46, %v4783_v60 }
0x1fcc   :  { %v2352_v10 = vpop.permute.xlu0 %2351 }
0x1fcd   :  { %v2354_v13 = vperm.slane %v2352_v10, %v4786_v61 }
0x1fcf   :  { %v2355_v62 = vsel %vm432_vm2, %v2354_v13, %v2353_v57 }
0x1fd0   :  { %3800 = vmatmul.msk.f32.vlgmr.msra.gmra.mxu3 %vm506_vm5, %v2355_v62 }
0x1fd4   :  { %v2385_v19 = vpop.permute.xlu0 %2384 }
0x1fd5   :  { %v2387_v44 = vperm.slane %v2385_v19, %v4786_v61 }
0x1fd7   :  { %v2388_v5 = vsel %vm432_vm2, %v2387_v44, %v2386_v9 }
0x1fd8   :  { %3801 = vmatmul.msk.f32.vlgmr.msrb.gmra.mxu1 %vm506_vm5, %v2388_v5 }
0x2053   :  { %v2375_v56 = vpop.f32.mrf.mxu3 }
0x2055   :  { %v2408_v2 = vpop.f32.mrf.mxu1 }
0x2056   :  { %v2419_v1 = vrot.slane %v2408_v2, 7 }
0x2058   :  { %v2420_v47 = vsel %vm437_vm3, %v2419_v1, %v2375_v56 }
0x2059   :  { %3802 = vmatmul.msk.f32.vlgmr.msrb.gmra.mxu2 %vm248_vm0, %v2420_v47 }
0x20dc   :  { %v2440_v58 = vpop.f32.mrf.mxu2 }
0x20dd   :  { %v2443_v36 = vadd.f32 %v2440_v58, %v2412_v8  ;;  %v5345_v58 = vld [vmem:[#allocation14 + $0x18] sm:$0xff] }
0x20de   :  { %2554 = vmatpush.msra.mxu1 %v5345_v58 }
0x20df   :  { %3804 = vmatmul.msk.f32.vlgmr.msrb.gmra.mxu3 %vm248_vm0, %v2443_v36  ;;  %v5347_v36 = vld [vmem:[#allocation14 + $0x10] sm:$0xff] }
0x20e0   :  { %2555 = vmatpush.msra.mxu1 %v5347_v36 }
0x2162   :  { %v2492_v4 = vpop.f32.mrf.mxu3 }
0x2163   :  { %v2493_v39 = vadd.f32 %v2492_v4, %v2469_v59  ;;  %v5350_v59 = vld [vmem:[#allocation14 + $0x8] sm:$0xff]  ;;  %v5353_v4 = vld [vmem:[#allocation14] sm:$0xff] }
0x2164   :  { %2556 = vmatpush.msra.mxu1 %v5350_v59 }
0x2165   :  { %v2495_v53 = vadd.f32 %v5274_v50, %v2493_v39 }
0x2166   :  { %2557 = vmatpush.msra.mxu1 %v5353_v4 }
0x2167   :  { %4017 = vtanh.f32 %v2495_v53  ;;  %v3805_v22 = vmul.f32 -1.442695, %v2495_v53 }
0x2168   :  { %2833 = vmatpush.msrb.mxu1 %v5192_v12  ;;  %v5369_v12 = vld [vmem:[#allocation8 + $0x8] sm:$0xff] }
0x2169   :  { %4019 = vpow2.f32 %v3805_v22  ;;  %v5367_v22 = vld [vmem:[#allocation8] sm:$0xff] }
0x216a   :  { %2834 = vmatpush.msrb.mxu1 %v5194_v43 }
0x216c   :  { %2835 = vmatpush.msrb.mxu1 %v5197_v63 }
0x216d   :  { %v4018_v3 = vpop.eup %4017 }
0x216e   :  { %2518 = vrot.lane.b32.xlu2 %v4018_v3, %s4540_s20  ;;  %2836 = vmatpush.msrb.mxu1 %v5200_v11  ;;  %v5373_v11 = vld [vmem:[#allocation8 + $0x18] sm:$0xff] }
0x216f   :  { %v4020_v0 = vpop.eup %4019 }
0x2170   :  { %v2499_v40 = vadd.f32 1.0, %v4020_v0  ;;  %v5371_v0 = vld [vmem:[#allocation8 + $0x10] sm:$0xff] }
0x2172   :  { %4021 = vrcp.f32 %v2499_v40  ;;  %v2511_v62 = vand.u32 2147483648, %v2499_v40  ;;  %vm2505_vm12 = vweird.f32 %v2499_v40  ;;  %v2509_v17 = vand.u32 2147483647, %v2499_v40 }
0x2174   :  { %v2512_v9 = vor.u32 1.1754944e-38, %v2511_v62  ;;  %vm2510_vm15 = vcmp.eq.f32.partialorder %v2509_v17, 8.507059e+37 }
0x2178   :  { %v4022_v16 = vpop.eup %4021 }
0x2179   :  { %v2501_v46 = vmul.f32 %v4022_v16, %v2499_v40  ;;  %vm2506_vm11 = vweird.f32 %v4022_v16 }
0x217a   :  { %vm2507_vm13 = vmor %vm2505_vm12, %vm2506_vm11 }
0x217b   :  { %v2502_v10 = vsub.f32 1.0, %v2501_v46 }
0x217d   :  { %v2503_v57 = vmul.f32 %v4022_v16, %v2502_v10 }
0x217f   :  { %v2504_v13 = vadd.f32 %v4022_v16, %v2503_v57 }
0x2181   :  { %v2508_v19 = vsel %vm2507_vm13, %v4022_v16, %v2504_v13 }
0x2182   :  { %v2513_v5 = vsel %vm2510_vm15, %v2512_v9, %v2508_v19 }
0x2183   :  { %v2516_v1 = vmul.f32 %v2513_v5, %v5280_v15 }
0x21c8   :  { %v2519_v44 = vpop.permute.xlu2 %2518 }
0x21c9   :  { %v2521_v2 = vmul.f32 %v2519_v44, %v2513_v5 }
0x21cb   :  { %2523 = vrot.lane.b32.xlu0 %v2521_v2, %s4540_s20 }
0x223d   :  { %v2524_v56 = vpop.permute.xlu0 %2523 }
0x223e   :  { %v5341_v47 = vadd.f32 %v2524_v56, %v2516_v1 }
0x2240   :  { %4023 = vtanh.f32 %v5341_v47 }
0x2246   :  { %v4024_v8 = vpop.eup %4023 }
0x2247   :  { %2529 = vrot.lane.b32.xlu2 %v4024_v8, %s4540_s20  ;;  %v5399_v8 = vld [vmem:[%s6083_s8] ss:$0 sm:$0xff] }
0x22a1   :  { %v2530_v15 = vpop.permute.xlu2 %2529 }
0x22a2   :  { %v5361_v39 = vmul.f32 %v2530_v15, %v2513_v5 }
0x22a4   :  { %2538 = vrot.lane.b32.xlu0 %v5361_v39, %s4549_s30 }
0x2316   :  { %v2539_v53 = vpop.permute.xlu0 %2538 }
0x2317   :  { %3806 = vmatmul.msk.f32.vlgmr.msra.gmra.mxu1 %vm248_vm0, %v2539_v53 }
0x231f   :  { %3810 = vmatmul.msk.f32.vlgmr.msrb.gmra.mxu1 %vm248_vm0, %v2539_v53 }
0x2394   :  { %v2559_v3 = vpop.f32.mrf.mxu1 }
0x2395   :  { %v2563_v43 = vrot.slane %v2559_v3, 1  ;;  %v2568_v63 = vperm.slane %v2559_v3, 0 }
0x2397   :  { %v2569_v40 = vperm.slane %v2563_v43, 0  ;;  %v2572_v16 = vadd.f32 %v2568_v63, %v5367_v22  ;;  %v2573_v46 = vadd.f32 %v2568_v63, %v5369_v12 }
0x2399   :  { %v2574_v10 = vadd.f32 %v2569_v40, %v5371_v0  ;;  %v2575_v57 = vadd.f32 %v2569_v40, %v5373_v11  ;;  %4025 = vtanh.f32 %v2572_v16 }
0x239a   :  { %4027 = vtanh.f32 %v2573_v46 }
0x239b   :  { %4029 = vtanh.f32 %v2574_v10 }
0x239c   :  { %4031 = vtanh.f32 %v2575_v57 }
0x239f   :  { %v5379_v13 = vpop.eup %4025 }
0x23a0   :  { %v5381_v62 = vpop.eup %4027  ;;  %v2580_v17 = vmul.f32 %v5080_v29, %v5379_v13 }
0x23a1   :  { %6112 = vst [vmem:[#allocation41_spill] sm:$0xff] %v5381_v62  ;;  %v5385_v19 = vpop.eup %4029  ;;  %v2581_v9 = vmul.f32 %v5080_v29, %v5381_v62 }
0x23a2   :  { %6113 = vst [vmem:[#allocation42_spill] sm:$0xff] %v5385_v19  ;;  %v2584_v44 = vsel %vm295_vm1, %v2580_v17, 0.0  ;;  %v2582_v5 = vmul.f32 %v5080_v29, %v5385_v19  ;;  %v5392_v2 = vpop.eup %4031 }
0x23a3   :  { %6114 = vst [vmem:[#allocation43_spill] sm:$0xff] %v5392_v2  ;;  %v2587_v1 = vsel %vm295_vm1, %v2581_v9, 0.0  ;;  %2585 = vadd.xlane.f32.xlu1 %v2584_v44  ;;  %v2583_v15 = vmul.f32 %v5399_v8, %v5392_v2 }
0x23a4   :  { %2588 = vadd.xlane.f32.xlu2 %v2587_v1  ;;  %v2590_v56 = vsel %vm295_vm1, %v2582_v5, 0.0 }
0x23a5   :  { %2591 = vadd.xlane.f32.xlu0 %v2590_v56  ;;  %v2593_v53 = vsel %vm295_vm1, %v2583_v15, 0.0 }
0x23ab   :  { %2594 = vadd.xlane.f32.xlu1 %v2593_v53 }
0x2416   :  { %v2586_v29 = vpop.xlane.xlu1 %2585 }
0x2417   :  { %v2589_v3 = vpop.xlane.xlu2 %2588  ;;  %v2596_v43 = vadd.f32 %v2586_v29, %v4770_v37 }
0x2418   :  { %v2592_v63 = vpop.xlane.xlu0 %2591  ;;  %v2597_v46 = vadd.f32 %v2589_v3, %v4773_v41 }
0x2419   :  { %v2600_v40 = vmul.f32 1.442695, %v2596_v43  ;;  %v2598_v16 = vadd.f32 %v2592_v63, %v4776_v49 }
0x241a   :  { %v2602_v57 = vmul.f32 1.442695, %v2597_v46 }
0x241b   :  { %4033 = vpow2.f32 %v2600_v40  ;;  %v2604_v10 = vmul.f32 1.442695, %v2598_v16 }
0x241d   :  { %4035 = vpow2.f32 %v2604_v10 }
0x241e   :  { %v2595_v17 = vpop.xlane.xlu1 %2594  ;;  %4037 = vpow2.f32 %v2602_v57 }
0x241f   :  { %v2599_v9 = vadd.f32 %v2595_v17, %v4779_v52 }
0x2421   :  { %v4034_v44 = vpop.eup %4033  ;;  %v2606_v5 = vmul.f32 1.442695, %v2599_v9 }
0x2422   :  { %2641 = vperm.xlu1 %3854, %v4034_v44  }
0x2423   :  { %v4036_v1 = vpop.eup %4035  ;;  %4039 = vpow2.f32 %v2606_v5 }
0x2424   :  { %2647 = vperm.xlu2 %3852, %v4036_v1   ;;  %v4038_v56 = vpop.eup %4037 }
0x2429   :  { %v4040_v15 = vpop.eup %4039 }
0x242a   :  { %2644 = vperm.xlu1 %3854, %v4038_v56   ;;  %2650 = vperm.xlu0 %3853, %v4040_v15  }
0x247e   :  { %v2648_v29 = vpop.permute.xlu2 %2647 }
0x247f   :  { %v2655_v63 = vperm.slane %v2648_v29, %v4783_v60 }
0x2494   :  { %v2642_v53 = vpop.permute.xlu1 %2641 }
0x2495   :  { %v2652_v40 = vperm.slane %v2642_v53, %v4783_v60 }
0x249c   :  { %v2645_v3 = vpop.permute.xlu1 %2644  ;;  %v2651_v43 = vpop.permute.xlu0 %2650 }
0x249d   :  { %v2653_v16 = vperm.slane %v2645_v3, %v4786_v61  ;;  %v2656_v46 = vperm.slane %v2651_v43, %v4786_v61 }
0x249f   :  { %v2654_v10 = vsel %vm432_vm2, %v2653_v16, %v2652_v40  ;;  %v2657_v57 = vsel %vm432_vm2, %v2656_v46, %v2655_v63  ;;  %v2711_v40 = vld [vmem:[#allocation7 + $0x8] sm:$0xff]  ;;  %v2710_v63 = vld [vmem:[#allocation7] sm:$0xff]  ;;  %v2713_v16 = vld [vmem:[#allocation7 + $0x18] sm:$0xff] }
0x24a0   :  { %v2658_v17 = vsel %vm437_vm3, %v2657_v57, %v2654_v10  ;;  %2741 = vmatpush.msra.mxu2 %v2711_v40  ;;  %v2712_v46 = vld [vmem:[#allocation7 + $0x10] sm:$0xff]  ;;  %2774 = vmatpush.msra.mxu0 %v2713_v16  ;;  %v2783_v57 = vld [vmem:[#allocation16 + $0x8] sm:$0xff] }
0x24a1   :  { %v2660_v9 = vsel %vm440_vm4, %v2658_v17, 0.0  ;;  %3143 = vmatpush.msra.mxu1 %v2713_v16  ;;  %v2782_v17 = vld [vmem:[#allocation16] sm:$0xff] }
0x24a2   :  { %2661 = vadd.xlane.f32.xlu1 %v2660_v9  ;;  %2742 = vmatpush.msra.mxu2 %v2710_v63  ;;  %v2816_v9 = vld [vmem:[#allocation17 + $0x18] sm:$0xff] }
0x24a3   :  { %2775 = vmatpush.msra.mxu0 %v2712_v46  ;;  %3144 = vmatpush.msra.mxu1 %v2712_v46  ;;  %v2813_v46 = vld [vmem:[#allocation17] sm:$0xff] }
0x24a4   :  { %2856 = vmatpush.msrb.mxu2 %v2816_v9 }
0x24a5   :  { %2923 = vmatpush.msrb.mxu0 %v5345_v58 }
0x24a7   :  { %2924 = vmatpush.msrb.mxu0 %v5347_v36 }
0x24a9   :  { %2925 = vmatpush.msrb.mxu0 %v5350_v59 }
0x24ab   :  { %2926 = vmatpush.msrb.mxu0 %v5353_v4  ;;  %v2784_v4 = vld [vmem:[#allocation16 + $0x10] sm:$0xff] }
0x2515   :  { %v2662_v5 = vpop.xlane.xlu1 %2661 }
0x2516   :  { %4041 = vrcp.f32 %v2662_v5  ;;  %v2815_v5 = vld [vmem:[#allocation17 + $0x10] sm:$0xff] }
0x2517   :  { %2857 = vmatpush.msrb.mxu2 %v2815_v5 }
0x251c   :  { %v4042_v19 = vpop.eup %4041 }
0x251d   :  { %v2665_v62 = vperm.slane %v4042_v19, 0  ;;  %v2666_v53 = vperm.slane %v4042_v19, 1 }
0x251f   :  { %v2670_v29 = vmul.f32 %v4038_v56, %v2665_v62  ;;  %v2669_v2 = vmul.f32 %v4034_v44, %v2665_v62  ;;  %v2672_v3 = vmul.f32 %v4040_v15, %v2666_v53  ;;  %v2671_v43 = vmul.f32 %v4036_v1, %v2666_v53  ;;  %v2785_v62 = vld [vmem:[#allocation16 + $0x18] sm:$0xff] }
0x2520   :  { %2804 = vmatpush.msra.mxu3 %v2785_v62 }
0x2521   :  { %2720 = vperm.xlu0 %3853, %v2670_v29   ;;  %2717 = vperm.xlu2 %3852, %v2669_v2   ;;  %v2814_v29 = vld [vmem:[#allocation17 + $0x8] sm:$0xff] }
0x2522   :  { %2805 = vmatpush.msra.mxu3 %v2784_v4  ;;  %2858 = vmatpush.msrb.mxu2 %v2814_v29 }
0x2524   :  { %2806 = vmatpush.msra.mxu3 %v2783_v57  ;;  %2859 = vmatpush.msrb.mxu2 %v2813_v46 }
0x2526   :  { %2807 = vmatpush.msra.mxu3 %v2782_v17 }
0x2528   :  { %3110 = vmatpush.msrb.mxu3 %v2711_v40  ;;  %v2781_v40 = vld [vmem:[#allocation2 + $0xc] sm:$0x3] }
0x2529   :  { %2753 = vperm.xlu0 %3853, %v2672_v3   ;;  %2750 = vperm.xlu2 %3852, %v2671_v43  }
0x252a   :  { %3111 = vmatpush.msrb.mxu3 %v2710_v63 }
0x257b   :  { %v2718_v19 = vpop.permute.xlu2 %2717 }
0x257c   :  { %v2722_v44 = vperm.slane %v2718_v19, %v4783_v60 }
0x2583   :  { %v2751_v15 = vpop.permute.xlu2 %2750 }
0x2584   :  { %v2755_v36 = vperm.slane %v2751_v15, %v4783_v60 }
0x2593   :  { %v2721_v2 = vpop.permute.xlu0 %2720 }
0x2594   :  { %v2723_v1 = vperm.slane %v2721_v2, %v4786_v61  ;;  %v2838_v2 = vpop.f32.mrf.mxu1 }
0x2596   :  { %v2724_v56 = vsel %vm432_vm2, %v2723_v1, %v2722_v44 }
0x2597   :  { %3807 = vmatmul.msk.f32.vlgmr.msra.gmra.mxu2 %vm506_vm5, %v2724_v56 }
0x2598   :  { %3173 = vmatpush.msra.mxu2 %v2785_v62 }
0x259a   :  { %3174 = vmatpush.msra.mxu2 %v2784_v4 }
0x259b   :  { %v2754_v58 = vpop.permute.xlu0 %2753 }
0x259c   :  { %v2756_v10 = vperm.slane %v2754_v58, %v4786_v61  ;;  %3175 = vmatpush.msra.mxu2 %v2783_v57 }
0x259e   :  { %v2757_v59 = vsel %vm432_vm2, %v2756_v10, %v2755_v36  ;;  %3176 = vmatpush.msra.mxu2 %v2782_v17 }
0x259f   :  { %3808 = vmatmul.msk.f32.vlgmr.msra.gmra.mxu0 %vm506_vm5, %v2757_v59 }
0x261a   :  { %v2744_v43 = vpop.f32.mrf.mxu2 }
0x261c   :  { %v2777_v53 = vpop.f32.mrf.mxu0 }
0x261d   :  { %v2788_v3 = vrot.slane %v2777_v53, 7 }
0x261f   :  { %v2789_v16 = vsel %vm437_vm3, %v2788_v3, %v2744_v43 }
0x2620   :  { %3809 = vmatmul.msk.f32.vlgmr.msra.gmra.mxu3 %vm248_vm0, %v2789_v16 }
0x2621   :  { %3225 = vmatpush.msra.mxu3 %v2816_v9 }
0x2623   :  { %3226 = vmatpush.msra.mxu3 %v2815_v5 }
0x2625   :  { %3227 = vmatpush.msra.mxu3 %v2814_v29 }
0x2627   :  { %3228 = vmatpush.msra.mxu3 %v2813_v46 }
0x26a3   :  { %v2809_v63 = vpop.f32.mrf.mxu3 }
0x26a4   :  { %v2812_v19 = vadd.f32 %v2809_v63, %v2781_v40 }
0x26a6   :  { %3811 = vmatmul.msk.f32.vlgmr.msrb.gmra.mxu2 %vm248_vm0, %v2812_v19  ;;  %v3277_v19 = vrot.slane %v5361_v39, 6 }
0x2729   :  { %v2861_v44 = vpop.f32.mrf.mxu2 }
0x272a   :  { %v2862_v1 = vadd.f32 %v2861_v44, %v2838_v2 }
0x272c   :  { %v2864_v56 = vadd.f32 %v5274_v50, %v2862_v1 }
0x272e   :  { %4043 = vtanh.f32 %v2864_v56  ;;  %v3812_v58 = vmul.f32 -1.442695, %v2864_v56 }
0x2730   :  { %4045 = vpow2.f32 %v3812_v58  ;;  %v3188_v58 = vld [vmem:[#allocation19 + $0x10] sm:$0xff] }
0x2734   :  { %v4044_v15 = vpop.eup %4043 }
0x2735   :  { %2887 = vrot.lane.b32.xlu2 %v4044_v15, %s4540_s20  ;;  %v3189_v15 = vld [vmem:[#allocation19 + $0x18] sm:$0xff] }
0x2736   :  { %v4046_v62 = vpop.eup %4045  ;;  %3202 = vmatpush.msra.mxu0 %v3189_v15 }
0x2737   :  { %v2868_v36 = vadd.f32 1.0, %v4046_v62  ;;  %v3187_v62 = vld [vmem:[#allocation19 + $0x8] sm:$0xff] }
0x2738   :  { %3203 = vmatpush.msra.mxu0 %v3188_v58 }
0x2739   :  { %4047 = vrcp.f32 %v2868_v36  ;;  %v2880_v9 = vand.u32 2147483648, %v2868_v36  ;;  %vm2874_vm7 = vweird.f32 %v2868_v36  ;;  %v2878_v5 = vand.u32 2147483647, %v2868_v36 }
0x273a   :  { %3204 = vmatpush.msra.mxu0 %v3187_v62 }
0x273b   :  { %v2881_v29 = vor.u32 1.1754944e-38, %v2880_v9  ;;  %vm2879_vm11 = vcmp.eq.f32.partialorder %v2878_v5, 8.507059e+37 }
0x273f   :  { %v4048_v10 = vpop.eup %4047 }
0x2740   :  { %v2870_v59 = vmul.f32 %v4048_v10, %v2868_v36  ;;  %vm2875_vm6 = vweird.f32 %v4048_v10  ;;  %v3186_v36 = vld [vmem:[#allocation19] sm:$0xff] }
0x2741   :  { %vm2876_vm10 = vmor %vm2874_vm7, %vm2875_vm6  ;;  %3205 = vmatpush.msra.mxu0 %v3186_v36  ;;  %vm3420_vm7 = vcmask 1047559  }
0x2742   :  { %v2871_v4 = vsub.f32 1.0, %v2870_v59 }
0x2744   :  { %v2872_v57 = vmul.f32 %v4048_v10, %v2871_v4 }
0x2746   :  { %v2873_v17 = vadd.f32 %v4048_v10, %v2872_v57 }
0x2748   :  { %v2877_v50 = vsel %vm2876_vm10, %v4048_v10, %v2873_v17 }
0x2749   :  { %v2882_v3 = vsel %vm2879_vm11, %v2881_v29, %v2877_v50 }
0x274a   :  { %v2885_v16 = vmul.f32 %v2882_v3, %v5341_v47  ;;  %v3290_v47 = vsel %vm3284_vm8, %v5284_v42, %v3277_v19 }
0x278f   :  { %v2888_v53 = vpop.permute.xlu2 %2887 }
0x2790   :  { %v2890_v43 = vmul.f32 %v2888_v53, %v2882_v3 }
0x2792   :  { %2892 = vrot.lane.b32.xlu0 %v2890_v43, %s4540_s20 }
0x2804   :  { %v2893_v46 = vpop.permute.xlu0 %2892 }
0x2805   :  { %v5435_v40 = vadd.f32 %v2893_v46, %v2885_v16  ;;  %v5472_v46 = vld [vmem:[%s6083_s8 + $0x1] ss:$0 sm:$0xff] }
0x2806   :  { %v354_v19 = vmul.f32 %v4751_v25, %v5472_v46  ;;  %v355_v25 = vmul.f32 %v4759_v30, %v5472_v46 }
0x2807   :  { %4049 = vtanh.f32 %v5435_v40 }
0x2808   :  { %v362_v15 = vsel %vm295_vm1, %v354_v19, 0.0 }
0x280d   :  { %v4050_v63 = vpop.eup %4049 }
0x280e   :  { %2898 = vrot.lane.b32.xlu2 %v4050_v63, %s4540_s20 }
0x2868   :  { %v2899_v2 = vpop.permute.xlu2 %2898 }
0x2869   :  { %v5440_v44 = vmul.f32 %v2899_v2, %v2882_v3  ;;  %v353_v2 = vmul.f32 %v4756_v28, %v5472_v46  ;;  %v365_v28 = vsel %vm295_vm1, %v355_v25, 0.0 }
0x286b   :  { %v3279_v1 = vrot.slane %v5440_v44, 4  ;;  %2907 = vrot.lane.b32.xlu1 %v5440_v44, %s4549_s30  ;;  %v359_v58 = vsel %vm295_vm1, %v353_v2, 0.0 }
0x286d   :  { %v5448_v56 = vsel %vm3286_vm9, %v3290_v47, %v3279_v1  ;;  %v352_v1 = vmul.f32 %v4747_v23, %v5472_v46 }
0x286f   :  { %v356_v62 = vsel %vm295_vm1, %v352_v1, 0.0  ;;  %v6115_v1 = vmov 0  }
0x28dd   :  { %v2908_v10 = vpop.permute.xlu1 %2907 }
0x28de   :  { %3813 = vmatmul.msk.f32.vlgmr.msrb.gmra.mxu0 %vm248_vm0, %v2908_v10 }
0x28e6   :  { %3817 = vmatmul.msk.f32.vlgmr.msra.gmra.mxu0 %vm248_vm0, %v2908_v10 }
0x295b   :  { %v2928_v59 = vpop.f32.mrf.mxu0 }
0x295c   :  { %v2932_v4 = vrot.slane %v2928_v59, 1  ;;  %v2937_v57 = vperm.slane %v2928_v59, 0 }
0x295e   :  { %v2938_v17 = vperm.slane %v2932_v4, 0  ;;  %v2941_v9 = vadd.f32 %v2937_v57, %v5367_v22  ;;  %v2942_v5 = vadd.f32 %v2937_v57, %v5369_v12 }
0x2960   :  { %v2943_v50 = vadd.f32 %v2938_v17, %v5371_v0  ;;  %4051 = vtanh.f32 %v2941_v9  ;;  %v2944_v47 = vadd.f32 %v2938_v17, %v5373_v11 }
0x2961   :  { %4053 = vtanh.f32 %v2942_v5 }
0x2962   :  { %4055 = vtanh.f32 %v2943_v50 }
0x2963   :  { %4057 = vtanh.f32 %v2944_v47 }
0x2966   :  { %v5455_v29 = vpop.eup %4051 }
0x2967   :  { %v5457_v53 = vpop.eup %4053  ;;  %v2949_v3 = vmul.f32 %v5399_v8, %v5455_v29 }
0x2968   :  { %v5461_v43 = vpop.eup %4055  ;;  %v2950_v16 = vmul.f32 %v5399_v8, %v5457_v53 }
0x2969   :  { %v2953_v22 = vsel %vm295_vm1, %v2949_v3, 0.0  ;;  %v2951_v12 = vmul.f32 %v5399_v8, %v5461_v43  ;;  %v5488_v36 = vpop.eup %4057 }
0x296a   :  { %v2956_v0 = vsel %vm295_vm1, %v2950_v16, 0.0  ;;  %2954 = vadd.xlane.f32.xlu0 %v2953_v22  ;;  %v2952_v23 = vmul.f32 %v5399_v8, %v5488_v36 }
0x296b   :  { %2957 = vadd.xlane.f32.xlu2 %v2956_v0  ;;  %v2959_v63 = vsel %vm295_vm1, %v2951_v12, 0.0 }
0x296c   :  { %2960 = vadd.xlane.f32.xlu1 %v2959_v63  ;;  %v2962_v11 = vsel %vm295_vm1, %v2952_v23, 0.0 }
0x2972   :  { %363 = vadd.xlane.f32.xlu0 %v362_v15 }
0x2973   :  { %360 = vadd.xlane.f32.xlu2 %v359_v58 }
0x2974   :  { %357 = vadd.xlane.f32.xlu1 %v356_v62 }
0x297a   :  { %366 = vadd.xlane.f32.xlu0 %v365_v28 }
0x2982   :  { %2963 = vadd.xlane.f32.xlu0 %v2962_v11 }
0x29dd   :  { %v2955_v10 = vpop.xlane.xlu0 %2954 }
0x29de   :  { %v2958_v59 = vpop.xlane.xlu2 %2957  ;;  %v2965_v4 = vadd.f32 %v2955_v10, %v4770_v37 }
0x29df   :  { %v2966_v57 = vadd.f32 %v2958_v59, %v4773_v41  ;;  %v2961_v17 = vpop.xlane.xlu1 %2960  ;;  %v238_v41 = vld [vmem:[#allocation10 + $0x2] sm:$0x3] }
0x29e0   :  { %v2969_v9 = vmul.f32 1.442695, %v2965_v4  ;;  %v2967_v30 = vadd.f32 %v2961_v17, %v4776_v49  ;;  %v369_v0 = vperm.slane %v238_v41, 0  ;;  %v382_v19 = vperm.slane %v238_v41, 1 }
0x29e1   :  { %v2971_v5 = vmul.f32 1.442695, %v2966_v57 }
0x29e2   :  { %4059 = vpow2.f32 %v2969_v9  ;;  %v2973_v50 = vmul.f32 1.442695, %v2967_v30 }
0x29e3   :  { %4061 = vpow2.f32 %v2971_v5 }
0x29e4   :  { %4063 = vpow2.f32 %v2973_v50 }
0x29e5   :  { %v364_v3 = vpop.xlane.xlu0 %363 }
0x29e8   :  { %v5496_v8 = vpop.eup %4059 }
0x29e9   :  { %v5498_v16 = vpop.eup %4061  ;;  %3010 = vperm.xlu2 %3852, %v5496_v8  }
0x29ea   :  { %v5501_v22 = vpop.eup %4063  ;;  %3013 = vperm.xlu0 %3853, %v5498_v16  }
0x29eb   :  { %3016 = vperm.xlu1 %3854, %v5501_v22  }
0x29ed   :  { %v367_v37 = vpop.xlane.xlu0 %366 }
0x29f2   :  { %3855 = vset.pattern.permute.xlu0 %v4721_v6 }
0x29f3   :  { %3856 = vset.pattern.permute.xlu1 %v4726_v7  ;;  %v361_v7 = vpop.xlane.xlu2 %360 }
0x29f5   :  { %v2964_v49 = vpop.xlane.xlu0 %2963 }
0x29f6   :  { %v2968_v12 = vadd.f32 %v2964_v49, %v4779_v52  ;;  %v358_v52 = vpop.xlane.xlu1 %357 }
0x29f8   :  { %v2975_v63 = vmul.f32 1.442695, %v2968_v12 }
0x29fa   :  { %4065 = vpow2.f32 %v2975_v63 }
0x29fb   :  { %380 = vperm.xlu1 %3856, %v369_v0  }
0x2a00   :  { %v5508_v2 = vpop.eup %4065 }
0x2a01   :  { %3019 = vperm.xlu2 %3852, %v5508_v2  }
0x2a03   :  { %393 = vperm.xlu1 %3856, %v382_v19  }
0x2a09   :  { %3857 = vset.pattern.permute.xlu2 %v4721_v6 }
0x2a0b   :  { %3860 = vset.pattern.permute.xlu1 %v6115_v1 }
0x2a11   :  { %387 = vperm.xlu2 %3857, %v382_v19  }
0x2a19   :  { %3858 = vset.pattern.permute.xlu2 %v6115_v1 }
0x2a43   :  { %v3011_v47 = vpop.permute.xlu2 %3010 }
0x2a44   :  { %v3021_v28 = vperm.slane %v3011_v47, %v4783_v60 }
0x2a5b   :  { %v3020_v15 = vpop.permute.xlu2 %3019 }
0x2a5c   :  { %v3014_v58 = vpop.permute.xlu0 %3013  ;;  %v3025_v23 = vperm.slane %v3020_v15, %v4786_v61 }
0x2a5d   :  { %v3022_v62 = vperm.slane %v3014_v58, %v4786_v61  ;;  %v3017_v25 = vpop.permute.xlu1 %3016 }
0x2a5e   :  { %v3024_v11 = vperm.slane %v3017_v25, %v4783_v60 }
0x2a5f   :  { %v3023_v6 = vsel %vm432_vm2, %v3022_v62, %v3021_v28  ;;  %v763_v62 = vmul.f32 %v4908_v33, %v5472_v46 }
0x2a60   :  { %v3026_v10 = vsel %vm432_vm2, %v3025_v23, %v3024_v11 }
0x2a61   :  { %v3027_v59 = vsel %vm437_vm3, %v3026_v10, %v3023_v6 }
0x2a62   :  { %v3029_v4 = vsel %vm440_vm4, %v3027_v59, 0.0 }
0x2a63   :  { %3030 = vadd.xlane.f32.xlu0 %v3029_v4 }
0x2a6b   :  { %v5522_v57 = vpop.permute.xlu2 %387 }
0x2a6c   :  { %v401_v17 = vadd.f32 %v5522_v57, %v364_v3  ;;  %v764_v3 = vmul.f32 %v4910_v34, %v5472_v46 }
0x2a6d   :  { %v5525_v9 = vpop.permute.xlu1 %380 }
0x2a6e   :  { %v407_v30 = vmul.f32 1.442695, %v401_v17  ;;  %v400_v5 = vadd.f32 %v5525_v9, %v361_v7  ;;  %v770_v12 = vsel %vm295_vm1, %v764_v3, 0.0 }
0x2a70   :  { %4067 = vpow2.f32 %v407_v30  ;;  %v405_v50 = vmul.f32 1.442695, %v400_v5 }
0x2a72   :  { %4069 = vpow2.f32 %v405_v50 }
0x2a75   :  { %v5541_v47 = vpop.permute.xlu1 %393 }
0x2a76   :  { %v5528_v41 = vpop.eup %4067  ;;  %v402_v15 = vadd.f32 %v5541_v47, %v367_v37 }
0x2a77   :  { %465 = vperm.xlu1 %3860, %v5528_v41   ;;  %374 = vperm.xlu0 %3855, %v369_v0  }
0x2a78   :  { %v5531_v49 = vpop.eup %4069 }
0x2a7f   :  { %3859 = vset.pattern.permute.xlu0 %v6115_v1  ;;  %v409_v1 = vmul.f32 1.442695, %v402_v15 }
0x2a80   :  { %462 = vperm.xlu0 %3859, %v5531_v49  }
0x2aaa   :  { %771 = vadd.xlane.f32.xlu0 %v770_v12  ;;  %v766_v12 = vmul.f32 %v4922_v31, %v5472_v46 }
0x2ad6   :  { %v3031_v63 = vpop.xlane.xlu0 %3030 }
0x2ae9   :  { %v5538_v19 = vpop.permute.xlu0 %374  ;;  %v466_v59 = vpop.permute.xlu1 %465 }
0x2aea   :  { %v399_v7 = vadd.f32 %v5538_v19, %v358_v52  ;;  %v767_v52 = vsel %vm295_vm1, %v763_v62, 0.0  ;;  %v473_v30 = vperm.slane %v466_v59, %v4783_v60  ;;  %v1133_v59 = vmul.f32 %v4983_v27, %v5472_v46 }
0x2aec   :  { %v403_v0 = vmul.f32 1.442695, %v399_v7  ;;  %v776_v7 = vsel %vm295_vm1, %v766_v12, 0.0 }
0x2aee   :  { %4071 = vpow2.f32 %v403_v0 }
0x2aef   :  { %4073 = vpow2.f32 %v409_v1  ;;  %v765_v1 = vmul.f32 %v4914_v21, %v5472_v46 }
0x2af0   :  { %4075 = vrcp.f32 %v3031_v63 }
0x2af2   :  { %v463_v4 = vpop.permute.xlu0 %462 }
0x2af3   :  { %v471_v5 = vperm.slane %v463_v4, %v4786_v61 }
0x2af4   :  { %v5544_v58 = vpop.eup %4071 }
0x2af5   :  { %459 = vperm.xlu2 %3858, %v5544_v58   ;;  %v5547_v34 = vpop.eup %4073 }
0x2af6   :  { %v4076_v25 = vpop.eup %4075 }
0x2af7   :  { %v3034_v37 = vperm.slane %v4076_v25, 0  ;;  %v3035_v11 = vperm.slane %v4076_v25, 1 }
0x2af9   :  { %v3038_v28 = vmul.f32 %v5496_v8, %v3034_v37  ;;  %v3039_v23 = vmul.f32 %v5498_v16, %v3034_v37  ;;  %v3041_v6 = vmul.f32 %v5508_v2, %v3035_v11  ;;  %v3040_v63 = vmul.f32 %v5501_v22, %v3035_v11 }
0x2afd   :  { %468 = vperm.xlu2 %3858, %v5547_v34  }
0x2b1d   :  { %v772_v31 = vpop.xlane.xlu0 %771 }
0x2b26   :  { %768 = vadd.xlane.f32.xlu2 %v767_v52  ;;  %v773_v52 = vsel %vm295_vm1, %v765_v1, 0.0 }
0x2b3e   :  { %3086 = vperm.xlu2 %3858, %v3038_v28   ;;  %v780_v28 = vadd.f32 %v772_v31, %v5525_v9 }
0x2b46   :  { %3089 = vperm.xlu2 %3858, %v3039_v23  }
0x2b4e   :  { %3122 = vperm.xlu2 %3858, %v3041_v6   ;;  %v785_v6 = vmul.f32 1.442695, %v780_v28 }
0x2b4f   :  { %v460_v10 = vpop.permute.xlu2 %459 }
0x2b50   :  { %v470_v33 = vperm.slane %v460_v10, %v4783_v60 }
0x2b52   :  { %v472_v50 = vsel %vm432_vm2, %v471_v5, %v470_v33 }
0x2b57   :  { %v469_v17 = vpop.permute.xlu2 %468 }
0x2b58   :  { %v474_v8 = vperm.slane %v469_v17, %v4786_v61  ;;  %v1139_v17 = vsel %vm295_vm1, %v1133_v59, 0.0 }
0x2b5a   :  { %v475_v16 = vsel %vm432_vm2, %v474_v8, %v473_v30 }
0x2b5b   :  { %v476_v3 = vsel %vm437_vm3, %v475_v16, %v472_v50 }
0x2b5c   :  { %v478_v2 = vsel %vm440_vm4, %v476_v3, 0.0 }
0x2b5d   :  { %479 = vadd.xlane.f32.xlu1 %v478_v2 }
0x2b76   :  { %3119 = vperm.xlu1 %3860, %v3040_v63  }
0x2b77   :  { %777 = vadd.xlane.f32.xlu2 %v776_v7 }
0x2b99   :  { %v769_v0 = vpop.xlane.xlu2 %768 }
0x2b9a   :  { %v779_v15 = vadd.f32 %v769_v0, %v5538_v19 }
0x2b9c   :  { %v783_v62 = vmul.f32 1.442695, %v779_v15  ;;  %v1132_v15 = vmul.f32 %v4981_v26, %v5472_v46 }
0x2b9e   :  { %4077 = vpow2.f32 %v783_v62  ;;  %v1136_v1 = vsel %vm295_vm1, %v1132_v15, 0.0  ;;  %v1135_v62 = vmul.f32 %v4995_v35, %v5472_v46 }
0x2b9f   :  { %4079 = vpow2.f32 %v785_v6 }
0x2ba0   :  { %774 = vadd.xlane.f32.xlu1 %v773_v52  ;;  %v1145_v52 = vsel %vm295_vm1, %v1135_v62, 0.0 }
0x2ba1   :  { %v3087_v25 = vpop.permute.xlu2 %3086 }
0x2ba2   :  { %v3091_v23 = vperm.slane %v3087_v25, %v4783_v60 }
0x2ba4   :  { %v5572_v37 = vpop.eup %4077 }
0x2ba5   :  { %833 = vperm.xlu0 %3859, %v5572_v37   ;;  %v5580_v10 = vpop.eup %4079 }
0x2ba9   :  { %v3090_v22 = vpop.permute.xlu2 %3089 }
0x2baa   :  { %v3092_v11 = vperm.slane %v3090_v22, %v4786_v61 }
0x2bac   :  { %v3093_v21 = vsel %vm432_vm2, %v3092_v11, %v3091_v23 }
0x2bad   :  { %3814 = vmatmul.msk.f32.vlgmr.msrb.gmra.mxu3 %vm506_vm5, %v3093_v21 }
0x2bb1   :  { %v3123_v33 = vpop.permute.xlu2 %3122 }
0x2bb2   :  { %v3125_v5 = vperm.slane %v3123_v33, %v4786_v61 }
0x2bb9   :  { %836 = vperm.xlu1 %3860, %v5580_v10  }
0x2bd0   :  { %v5585_v4 = vpop.xlane.xlu1 %479 }
0x2be3   :  { %1140 = vadd.xlane.f32.xlu1 %v1139_v17 }
0x2be8   :  { %v3120_v30 = vpop.permute.xlu1 %3119 }
0x2be9   :  { %v3124_v8 = vperm.slane %v3120_v30, %v4783_v60 }
0x2bea   :  { %v778_v50 = vpop.xlane.xlu2 %777 }
0x2beb   :  { %v3126_v16 = vsel %vm432_vm2, %v3125_v5, %v3124_v8  ;;  %v782_v3 = vadd.f32 %v778_v50, %v5541_v47  ;;  %v1134_v50 = vmul.f32 %v4987_v32, %v5472_v46 }
0x2bec   :  { %3815 = vmatmul.msk.f32.vlgmr.msra.gmra.mxu1 %vm506_vm5, %v3126_v16 }
0x2bed   :  { %v789_v2 = vmul.f32 1.442695, %v782_v3  ;;  %v1142_v16 = vsel %vm295_vm1, %v1134_v50, 0.0 }
0x2bef   :  { %4081 = vpow2.f32 %v789_v2 }
0x2bf5   :  { %v5593_v27 = vpop.eup %4081 }
0x2bf6   :  { %842 = vperm.xlu0 %3859, %v5593_v27  }
0x2c13   :  { %v775_v12 = vpop.xlane.xlu1 %774 }
0x2c14   :  { %v781_v63 = vadd.f32 %v775_v12, %v5522_v57 }
0x2c16   :  { %v787_v7 = vmul.f32 1.442695, %v781_v63 }
0x2c17   :  { %v834_v23 = vpop.permute.xlu0 %833 }
0x2c18   :  { %4083 = vpow2.f32 %v787_v7  ;;  %v844_v59 = vperm.slane %v834_v23, %v4783_v60 }
0x2c1e   :  { %v5597_v0 = vpop.eup %4083 }
0x2c1f   :  { %839 = vperm.xlu2 %3858, %v5597_v0  }
0x2c2b   :  { %v837_v11 = vpop.permute.xlu1 %836 }
0x2c2c   :  { %v845_v26 = vperm.slane %v837_v11, %v4786_v61 }
0x2c2e   :  { %v846_v17 = vsel %vm432_vm2, %v845_v26, %v844_v59 }
0x2c30   :  { %v3113_v22 = vpop.f32.mrf.mxu3 }
0x2c48   :  { %1137 = vadd.xlane.f32.xlu2 %v1136_v1 }
0x2c50   :  { %1146 = vadd.xlane.f32.xlu2 %v1145_v52 }
0x2c56   :  { %v1141_v3 = vpop.xlane.xlu1 %1140 }
0x2c57   :  { %v1149_v2 = vadd.f32 %v1141_v3, %v5525_v9 }
0x2c59   :  { %v1154_v12 = vmul.f32 1.442695, %v1149_v2 }
0x2c5b   :  { %4085 = vpow2.f32 %v1154_v12 }
0x2c61   :  { %v5620_v63 = vpop.eup %4085 }
0x2c68   :  { %v843_v21 = vpop.permute.xlu0 %842 }
0x2c69   :  { %v3146_v25 = vpop.f32.mrf.mxu1  ;;  %v848_v35 = vperm.slane %v843_v21, %v4786_v61  ;;  %v1502_v21 = vmul.f32 %v5075_v24, %v5472_v46  ;;  %v1504_v24 = vmul.f32 %v5091_v54, %v5472_v46 }
0x2c6a   :  { %v3157_v31 = vrot.slane %v3146_v25, 7 }
0x2c6b   :  { %v1508_v26 = vsel %vm295_vm1, %v1502_v21, 0.0 }
0x2c6c   :  { %v3158_v28 = vsel %vm437_vm3, %v3157_v31, %v3113_v22  ;;  %v3150_v22 = vld [vmem:[#allocation2 + $0xe] sm:$0x3] }
0x2c6d   :  { %3816 = vmatmul.msk.f32.vlgmr.msra.gmra.mxu2 %vm248_vm0, %v3158_v28 }
0x2c79   :  { %v840_v6 = vpop.permute.xlu2 %839 }
0x2c7a   :  { %v847_v33 = vperm.slane %v840_v6, %v4783_v60 }
0x2c7c   :  { %v849_v30 = vsel %vm432_vm2, %v848_v35, %v847_v33 }
0x2c7d   :  { %v850_v5 = vsel %vm437_vm3, %v849_v30, %v846_v17  ;;  %v1501_v17 = vmul.f32 %v5073_v20, %v5472_v46 }
0x2c7e   :  { %v852_v8 = vsel %vm440_vm4, %v850_v5, 0.0  ;;  %v1514_v5 = vsel %vm295_vm1, %v1504_v24, 0.0 }
0x2c7f   :  { %853 = vadd.xlane.f32.xlu0 %v852_v8  ;;  %v1505_v30 = vsel %vm295_vm1, %v1501_v17, 0.0 }
0x2c87   :  { %1143 = vadd.xlane.f32.xlu0 %v1142_v16 }
0x2c9b   :  { %1205 = vperm.xlu0 %3859, %v5620_v63  }
0x2cbb   :  { %v1138_v7 = vpop.xlane.xlu2 %1137 }
0x2cbc   :  { %v1148_v15 = vadd.f32 %v1138_v7, %v5538_v19 }
0x2cbe   :  { %v1152_v1 = vmul.f32 1.442695, %v1148_v15 }
0x2cc0   :  { %4087 = vpow2.f32 %v1152_v1 }
0x2cc3   :  { %v1147_v62 = vpop.xlane.xlu2 %1146 }
0x2cc4   :  { %v1151_v32 = vadd.f32 %v1147_v62, %v5541_v47 }
0x2cc6   :  { %v5625_v52 = vpop.eup %4087  ;;  %v1158_v25 = vmul.f32 1.442695, %v1151_v32  ;;  %v1503_v32 = vmul.f32 %v5084_v14, %v5472_v46 }
0x2cc7   :  { %1202 = vperm.xlu1 %3860, %v5625_v52  }
0x2cc8   :  { %4089 = vpow2.f32 %v1158_v25  ;;  %v1511_v25 = vsel %vm295_vm1, %v1503_v32, 0.0 }
0x2cce   :  { %v5628_v31 = vpop.eup %4089 }
0x2ccf   :  { %1211 = vperm.xlu1 %3860, %v5628_v31  }
0x2cf0   :  { %v3178_v28 = vpop.f32.mrf.mxu2 }
0x2cf1   :  { %v3181_v23 = vadd.f32 %v3178_v28, %v3150_v22 }
0x2cf2   :  { %v5631_v11 = vpop.xlane.xlu0 %853 }
0x2cf3   :  { %3818 = vmatmul.msk.f32.vlgmr.msra.gmra.mxu3 %vm248_vm0, %v3181_v23 }
0x2cf9   :  { %1509 = vadd.xlane.f32.xlu1 %v1508_v26 }
0x2cfa   :  { %v1144_v6 = vpop.xlane.xlu0 %1143 }
0x2cfb   :  { %v1150_v59 = vadd.f32 %v1144_v6, %v5522_v57 }
0x2cfd   :  { %v1156_v35 = vmul.f32 1.442695, %v1150_v59 }
0x2cff   :  { %4091 = vpow2.f32 %v1156_v35 }
0x2d05   :  { %v5638_v33 = vpop.eup %4091 }
0x2d06   :  { %1208 = vperm.xlu2 %3858, %v5638_v33  }
0x2d0d   :  { %v1206_v50 = vpop.permute.xlu0 %1205 }
0x2d0e   :  { %v1214_v12 = vperm.slane %v1206_v50, %v4786_v61 }
0x2d2f   :  { %1506 = vadd.xlane.f32.xlu2 %v1505_v30 }
0x2d37   :  { %1515 = vadd.xlane.f32.xlu2 %v1514_v5 }
0x2d39   :  { %v1203_v8 = vpop.permute.xlu1 %1202 }
0x2d3a   :  { %v1213_v3 = vperm.slane %v1203_v8, %v4783_v60  ;;  %v1871_v8 = vmul.f32 %v5218_v38, %v5472_v46  ;;  %v6116_v38 = vld [vmem:[#allocation40_spill] sm:$0xff] }
0x2d3c   :  { %v1215_v15 = vsel %vm432_vm2, %v1214_v12, %v1213_v3  ;;  %v1877_v50 = vsel %vm295_vm1, %v1871_v8, 0.0 }
0x2d41   :  { %v1212_v16 = vpop.permute.xlu1 %1211 }
0x2d42   :  { %v1217_v7 = vperm.slane %v1212_v16, %v4786_v61 }
0x2d60   :  { %v1209_v2 = vpop.permute.xlu2 %1208 }
0x2d61   :  { %v1216_v20 = vperm.slane %v1209_v2, %v4783_v60 }
0x2d63   :  { %v1218_v1 = vsel %vm432_vm2, %v1217_v7, %v1216_v20  ;;  %v1870_v7 = vmul.f32 %v5216_v18, %v5472_v46 }
0x2d64   :  { %v1219_v54 = vsel %vm437_vm3, %v1218_v1, %v1215_v15  ;;  %v1873_v15 = vmul.f32 %v6116_v38, %v5472_v46 }
0x2d65   :  { %v1221_v62 = vsel %vm440_vm4, %v1219_v54, 0.0  ;;  %v1874_v20 = vsel %vm295_vm1, %v1870_v7, 0.0 }
0x2d66   :  { %1222 = vadd.xlane.f32.xlu0 %v1221_v62  ;;  %v1883_v1 = vsel %vm295_vm1, %v1873_v15, 0.0 }
0x2d6c   :  { %v1510_v22 = vpop.xlane.xlu1 %1509 }
0x2d6d   :  { %v1518_v28 = vadd.f32 %v1510_v22, %v5525_v9 }
0x2d6e   :  { %1512 = vadd.xlane.f32.xlu0 %v1511_v25 }
0x2d6f   :  { %v1523_v23 = vmul.f32 1.442695, %v1518_v28 }
0x2d71   :  { %4093 = vpow2.f32 %v1523_v23 }
0x2d77   :  { %v5659_v21 = vpop.eup %4093 }
0x2d82   :  { %1574 = vperm.xlu0 %3859, %v5659_v21  }
0x2da2   :  { %v1507_v26 = vpop.xlane.xlu2 %1506 }
0x2da3   :  { %v1517_v6 = vadd.f32 %v1507_v26, %v5538_v19 }
0x2da5   :  { %v1521_v59 = vmul.f32 1.442695, %v1517_v6 }
0x2da7   :  { %4095 = vpow2.f32 %v1521_v59 }
0x2daa   :  { %v1516_v35 = vpop.xlane.xlu2 %1515 }
0x2dab   :  { %v1520_v14 = vadd.f32 %v1516_v35, %v5541_v47 }
0x2dad   :  { %v5664_v17 = vpop.eup %4095  ;;  %v1527_v30 = vmul.f32 1.442695, %v1520_v14  ;;  %v6117_v14 = vld [vmem:[#allocation39_spill] sm:$0xff] }
0x2dae   :  { %1571 = vperm.xlu1 %3860, %v5664_v17  }
0x2daf   :  { %4097 = vpow2.f32 %v1527_v30  ;;  %v1872_v30 = vmul.f32 %v6117_v14, %v5472_v46 }
0x2db1   :  { %v1880_v8 = vsel %vm295_vm1, %v1872_v30, 0.0 }
0x2db5   :  { %v5667_v24 = vpop.eup %4097 }
0x2db6   :  { %1580 = vperm.xlu0 %3859, %v5667_v24  }
0x2dd9   :  { %v5670_v5 = vpop.xlane.xlu0 %1222 }
0x2de0   :  { %1878 = vadd.xlane.f32.xlu0 %v1877_v50 }
0x2de1   :  { %v1513_v16 = vpop.xlane.xlu0 %1512 }
0x2de2   :  { %v1519_v3 = vadd.f32 %v1513_v16, %v5522_v57 }
0x2de4   :  { %v1525_v2 = vmul.f32 1.442695, %v1519_v3 }
0x2de6   :  { %4099 = vpow2.f32 %v1525_v2 }
0x2dec   :  { %v5676_v12 = vpop.eup %4099 }
0x2ded   :  { %1577 = vperm.xlu2 %3858, %v5676_v12  }
0x2df4   :  { %v1575_v54 = vpop.permute.xlu0 %1574 }
0x2df5   :  { %v1583_v28 = vperm.slane %v1575_v54, %v4786_v61  ;;  %v2239_v54 = vmul.f32 %v5294_v48, %v5472_v46 }
0x2e16   :  { %1875 = vadd.xlane.f32.xlu2 %v1874_v20 }
0x2e1e   :  { %1884 = vadd.xlane.f32.xlu2 %v1883_v1 }
0x2e20   :  { %v1572_v62 = vpop.permute.xlu1 %1571 }
0x2e21   :  { %v1582_v25 = vperm.slane %v1572_v62, %v4783_v60 }
0x2e23   :  { %v1584_v26 = vsel %vm432_vm2, %v1583_v28, %v1582_v25  ;;  %v2243_v25 = vsel %vm295_vm1, %v2239_v54, 0.0 }
0x2e28   :  { %v1581_v32 = vpop.permute.xlu0 %1580 }
0x2e29   :  { %v1586_v23 = vperm.slane %v1581_v32, %v4786_v61 }
0x2e47   :  { %v1578_v22 = vpop.permute.xlu2 %1577 }
0x2e48   :  { %v1585_v18 = vperm.slane %v1578_v22, %v4783_v60  ;;  %v2242_v22 = vmul.f32 %v5308_v55, %v5472_v46  ;;  %v2240_v55 = vmul.f32 %v5296_v51, %v5472_v46 }
0x2e4a   :  { %v1587_v6 = vsel %vm432_vm2, %v1586_v23, %v1585_v18  ;;  %v2252_v23 = vsel %vm295_vm1, %v2242_v22, 0.0 }
0x2e4b   :  { %v1588_v59 = vsel %vm437_vm3, %v1587_v6, %v1584_v26 }
0x2e4c   :  { %v1590_v35 = vsel %vm440_vm4, %v1588_v59, 0.0 }
0x2e4d   :  { %1591 = vadd.xlane.f32.xlu1 %v1590_v35  ;;  %v2246_v35 = vsel %vm295_vm1, %v2240_v55, 0.0  ;;  %v2241_v55 = vmul.f32 %v5300_v45, %v5472_v46 }
0x2e53   :  { %v1879_v50 = vpop.xlane.xlu0 %1878 }
0x2e54   :  { %v1887_v16 = vadd.f32 %v1879_v50, %v5525_v9 }
0x2e55   :  { %1881 = vadd.xlane.f32.xlu1 %v1880_v8 }
0x2e56   :  { %v1892_v3 = vmul.f32 1.442695, %v1887_v16 }
0x2e58   :  { %4101 = vpow2.f32 %v1892_v3 }
0x2e5e   :  { %v5697_v2 = vpop.eup %4101 }
0x2e6e   :  { %1943 = vperm.xlu1 %3860, %v5697_v2  }
0x2e89   :  { %v1876_v7 = vpop.xlane.xlu2 %1875 }
0x2e8a   :  { %v1886_v20 = vadd.f32 %v1876_v7, %v5538_v19 }
0x2e8c   :  { %v1890_v38 = vmul.f32 1.442695, %v1886_v20 }
0x2e8e   :  { %4103 = vpow2.f32 %v1890_v38 }
0x2e91   :  { %v1885_v15 = vpop.xlane.xlu2 %1884 }
0x2e92   :  { %v1889_v1 = vadd.f32 %v1885_v15, %v5541_v47 }
0x2e94   :  { %v5704_v62 = vpop.eup %4103  ;;  %v1896_v32 = vmul.f32 1.442695, %v1889_v1 }
0x2e95   :  { %1940 = vperm.xlu0 %3859, %v5704_v62  }
0x2e96   :  { %4105 = vpow2.f32 %v1896_v32 }
0x2e98   :  { %2244 = vadd.xlane.f32.xlu1 %v2243_v25 }
0x2e9c   :  { %v5710_v28 = vpop.eup %4105 }
0x2e9d   :  { %1949 = vperm.xlu0 %3859, %v5710_v28  }
0x2ea0   :  { %2253 = vadd.xlane.f32.xlu1 %v2252_v23 }
0x2ec0   :  { %v5714_v48 = vpop.xlane.xlu1 %1591 }
0x2ec8   :  { %v1882_v18 = vpop.xlane.xlu1 %1881 }
0x2ec9   :  { %v1888_v26 = vadd.f32 %v1882_v18, %v5522_v57 }
0x2ecb   :  { %v1894_v6 = vmul.f32 1.442695, %v1888_v26 }
0x2ecd   :  { %4107 = vpow2.f32 %v1894_v6 }
0x2ed3   :  { %v5717_v59 = vpop.eup %4107 }
0x2ed4   :  { %1946 = vperm.xlu2 %3858, %v5717_v59  }
0x2ee0   :  { %v1944_v14 = vpop.permute.xlu1 %1943 }
0x2ee1   :  { %v1952_v32 = vperm.slane %v1944_v14, %v4786_v61  ;;  %v2608_v14 = vmul.f32 %v5379_v13, %v5472_v46  ;;  %v4176_v13 = vld [vmem:[%s6087_s12] ss:$0 sm:$0xff] }
0x2efd   :  { %2247 = vadd.xlane.f32.xlu2 %v2246_v35  ;;  %v2249_v35 = vsel %vm295_vm1, %v2241_v55, 0.0 }
0x2f07   :  { %v1941_v51 = vpop.permute.xlu0 %1940 }
0x2f08   :  { %v1951_v1 = vperm.slane %v1941_v51, %v4783_v60  ;;  %v3207_v51 = vpop.f32.mrf.mxu0 }
0x2f0a   :  { %v1953_v23 = vsel %vm432_vm2, %v1952_v32, %v1951_v1 }
0x2f0b   :  { %v2245_v30 = vpop.xlane.xlu1 %2244 }
0x2f0c   :  { %v2255_v8 = vadd.f32 %v2245_v30, %v5538_v19  ;;  %v2612_v30 = vsel %vm295_vm1, %v2608_v14, 0.0 }
0x2f0e   :  { %v2259_v50 = vmul.f32 1.442695, %v2255_v8  ;;  %v6118_v8 = vld [vmem:[#allocation43_spill] sm:$0xff] }
0x2f0f   :  { %v1950_v15 = vpop.permute.xlu0 %1949 }
0x2f10   :  { %4109 = vpow2.f32 %v2259_v50  ;;  %v1955_v25 = vperm.slane %v1950_v15, %v4786_v61  ;;  %v2611_v50 = vmul.f32 %v6118_v8, %v5472_v46 }
0x2f13   :  { %v2254_v16 = vpop.xlane.xlu1 %2253 }
0x2f14   :  { %v2258_v3 = vadd.f32 %v2254_v16, %v5541_v47  ;;  %v2621_v16 = vsel %vm295_vm1, %v2611_v50, 0.0 }
0x2f16   :  { %v5725_v7 = vpop.eup %4109  ;;  %v2265_v20 = vmul.f32 1.442695, %v2258_v3  ;;  %v2977_v3 = vmul.f32 %v5455_v29, %v5472_v46 }
0x2f17   :  { %2309 = vperm.xlu2 %3858, %v5725_v7  }
0x2f18   :  { %4111 = vpow2.f32 %v2265_v20  ;;  %v2981_v45 = vsel %vm295_vm1, %v2977_v3, 0.0  ;;  %v3230_v20 = vpop.f32.mrf.mxu3 }
0x2f19   :  { %v3231_v15 = vadd.f32 %v3230_v20, %v3207_v51  ;;  %v6119_v51 = vld [vmem:[#allocation41_spill] sm:$0xff] }
0x2f1b   :  { %v3233_v1 = vadd.f32 %v4176_v13, %v3231_v15  ;;  %v2609_v15 = vmul.f32 %v6119_v51, %v5472_v46 }
0x2f1d   :  { %4113 = vtanh.f32 %v3233_v1  ;;  %v2615_v13 = vsel %vm295_vm1, %v2609_v15, 0.0 }
0x2f1e   :  { %v5728_v38 = vpop.eup %4111 }
0x2f1f   :  { %2318 = vperm.xlu2 %3858, %v5728_v38  }
0x2f2e   :  { %v1947_v54 = vpop.permute.xlu2 %1946 }
0x2f2f   :  { %v1954_v22 = vperm.slane %v1947_v54, %v4783_v60  ;;  %v4114_v54 = vpop.eup %4113 }
0x2f31   :  { %v1956_v18 = vsel %vm432_vm2, %v1955_v25, %v1954_v22 }
0x2f32   :  { %v1957_v26 = vsel %vm437_vm3, %v1956_v18, %v1953_v23  ;;  %v2979_v23 = vmul.f32 %v5461_v43, %v5472_v46 }
0x2f33   :  { %v1959_v6 = vsel %vm440_vm4, %v1957_v26, 0.0 }
0x2f34   :  { %1960 = vadd.xlane.f32.xlu0 %v1959_v6  ;;  %v2987_v18 = vsel %vm295_vm1, %v2979_v23, 0.0 }
0x2f3c   :  { %2250 = vadd.xlane.f32.xlu0 %v2249_v35 }
0x2f48   :  { %2613 = vadd.xlane.f32.xlu2 %v2612_v30 }
0x2f50   :  { %2622 = vadd.xlane.f32.xlu2 %v2621_v16 }
0x2f58   :  { %2982 = vadd.xlane.f32.xlu2 %v2981_v45 }
0x2f70   :  { %v2248_v32 = vpop.xlane.xlu2 %2247  ;;  %3256 = vrot.lane.b32.xlu2 %v4114_v54, %s4540_s20 }
0x2f71   :  { %v2256_v25 = vadd.f32 %v2248_v32, %v5525_v9 }
0x2f73   :  { %v2261_v22 = vmul.f32 1.442695, %v2256_v25 }
0x2f75   :  { %4115 = vpow2.f32 %v2261_v22 }
0x2f78   :  { %v2310_v6 = vpop.permute.xlu2 %2309 }
0x2f7b   :  { %v5756_v29 = vpop.eup %4115 }
0x2f7c   :  { %2312 = vperm.xlu0 %3859, %v5756_v29  }
0x2f80   :  { %v2319_v30 = vpop.permute.xlu2 %2318 }
0x2f99   :  { %2988 = vadd.xlane.f32.xlu2 %v2987_v18 }
0x2fa7   :  { %v5762_v26 = vpop.xlane.xlu0 %1960 }
0x2faf   :  { %v2251_v55 = vpop.xlane.xlu0 %2250 }
0x2fb0   :  { %v2257_v35 = vadd.f32 %v2251_v55, %v5522_v57  ;;  %v3819_v55 = vmul.f32 -1.442695, %v3233_v1 }
0x2fb2   :  { %v2263_v14 = vmul.f32 1.442695, %v2257_v35 }
0x2fb4   :  { %4117 = vpow2.f32 %v2263_v14 }
0x2fba   :  { %v5765_v8 = vpop.eup %4117 }
0x2fbb   :  { %2315 = vperm.xlu1 %3860, %v5765_v8   ;;  %v2614_v50 = vpop.xlane.xlu2 %2613 }
0x2fbc   :  { %v2624_v54 = vadd.f32 %v2614_v50, %v5538_v19 }
0x2fbe   :  { %v2628_v32 = vmul.f32 1.442695, %v2624_v54 }
0x2fc3   :  { %v2623_v16 = vpop.xlane.xlu2 %2622 }
0x2fc4   :  { %v2627_v25 = vadd.f32 %v2623_v16, %v5541_v47 }
0x2fc6   :  { %v2634_v22 = vmul.f32 1.442695, %v2627_v25 }
0x2fcb   :  { %v2983_v3 = vpop.xlane.xlu2 %2982 }
0x2fcc   :  { %v2993_v43 = vadd.f32 %v2983_v3, %v5538_v19  ;;  %v2978_v19 = vmul.f32 %v5457_v53, %v5472_v46 }
0x2fce   :  { %v2997_v45 = vmul.f32 1.442695, %v2993_v43  ;;  %v2320_v43 = vperm.slane %v2310_v6, %v4783_v60  ;;  %v2984_v15 = vsel %vm295_vm1, %v2978_v19, 0.0  ;;  %v6120_v6 = vld [vmem:[#allocation42_spill] sm:$0xff] }
0x2fd0   :  { %4119 = vpow2.f32 %v2997_v45  ;;  %v2324_v45 = vperm.slane %v2319_v30, %v4786_v61 }
0x2fd1   :  { %4121 = vpow2.f32 %v2628_v32 }
0x2fd2   :  { %4123 = vpow2.f32 %v2634_v22  ;;  %v2610_v22 = vmul.f32 %v6120_v6, %v5472_v46 }
0x2fd3   :  { %4125 = vpow2.f32 %v3819_v55 }
0x2fd4   :  { %v2618_v55 = vsel %vm295_vm1, %v2610_v22, 0.0 }
0x2fd6   :  { %v5769_v20 = vpop.eup %4119 }
0x2fd7   :  { %3047 = vperm.xlu2 %3858, %v5769_v20   ;;  %v5777_v23 = vpop.eup %4121 }
0x2fd8   :  { %v5780_v18 = vpop.eup %4123 }
0x2fd9   :  { %v4126_v35 = vpop.eup %4125 }
0x2fda   :  { %v3237_v14 = vadd.f32 1.0, %v4126_v35 }
0x2fdc   :  { %4127 = vrcp.f32 %v3237_v14  ;;  %v3249_v19 = vand.u32 2147483648, %v3237_v14  ;;  %vm3243_vm13 = vweird.f32 %v3237_v14 }
0x2fe2   :  { %v4128_v1 = vpop.eup %4127 }
0x2fe3   :  { %v3239_v25 = vmul.f32 %v4128_v1, %v3237_v14  ;;  %vm3244_vm12 = vweird.f32 %v4128_v1 }
0x2fe4   :  { %vm3245_vm15 = vmor %vm3243_vm13, %vm3244_vm12 }
0x2fe5   :  { %2616 = vadd.xlane.f32.xlu1 %v2615_v13  ;;  %v3240_v30 = vsub.f32 1.0, %v3239_v25 }
0x2fe7   :  { %v3241_v35 = vmul.f32 %v4128_v1, %v3240_v30 }
0x2fee   :  { %v2313_v3 = vpop.permute.xlu0 %2312 }
0x2fef   :  { %v2321_v50 = vperm.slane %v2313_v3, %v4786_v61  ;;  %v3242_v3 = vadd.f32 %v4128_v1, %v3241_v35 }
0x2ff1   :  { %v2322_v13 = vsel %vm432_vm2, %v2321_v50, %v2320_v43  ;;  %v3247_v50 = vand.u32 2147483647, %v3237_v14  ;;  %v3250_v43 = vor.u32 1.1754944e-38, %v3249_v19 }
0x2ff3   :  { %vm3248_vm6 = vcmp.eq.f32.partialorder %v3247_v50, 8.507059e+37 }
0x2ffe   :  { %2678 = vperm.xlu1 %3860, %v5777_v23  }
0x3006   :  { %2687 = vperm.xlu1 %3860, %v5780_v18  }
0x302d   :  { %v2316_v16 = vpop.permute.xlu1 %2315 }
0x302e   :  { %v2323_v51 = vperm.slane %v2316_v16, %v4783_v60  ;;  %v3246_v16 = vsel %vm3245_vm15, %v4128_v1, %v3242_v3 }
0x3030   :  { %2985 = vadd.xlane.f32.xlu1 %v2984_v15  ;;  %v2325_v54 = vsel %vm432_vm2, %v2324_v45, %v2323_v51  ;;  %v3257_v45 = vpop.permute.xlu2 %3256  ;;  %v5797_v51 = vsel %vm3248_vm6, %v3250_v43, %v3246_v16 }
0x3031   :  { %v2326_v32 = vsel %vm437_vm3, %v2325_v54, %v2322_v13  ;;  %v3259_v15 = vmul.f32 %v3257_v45, %v5797_v51 }
0x3032   :  { %v2328_v53 = vsel %vm440_vm4, %v2326_v32, 0.0 }
0x3033   :  { %2329 = vadd.xlane.f32.xlu0 %v2328_v53 }
0x303b   :  { %2619 = vadd.xlane.f32.xlu0 %v2618_v55 }
0x3049   :  { %3261 = vrot.lane.b32.xlu1 %v3259_v15, %s4540_s20 }
0x3058   :  { %v2617_v13 = vpop.xlane.xlu1 %2616 }
0x3059   :  { %v2625_v54 = vadd.f32 %v2617_v13, %v5525_v9 }
0x305b   :  { %v2630_v32 = vmul.f32 1.442695, %v2625_v54 }
0x305d   :  { %4129 = vpow2.f32 %v2630_v32  ;;  %v2980_v32 = vmul.f32 %v5488_v36, %v5472_v46  ;;  %v6121_v46 = vld [vmem:[#allocation35_spill] sm:$0xff] }
0x305e   :  { %v3297_v36 = vrot.slane %v6121_v46, 4 }
0x3063   :  { %v5802_v53 = vpop.eup %4129 }
0x3064   :  { %2681 = vperm.xlu0 %3859, %v5802_v53  }
0x3070   :  { %v2679_v30 = vpop.permute.xlu1 %2678 }
0x3071   :  { %v2689_v50 = vperm.slane %v2679_v30, %v4783_v60 }
0x3078   :  { %v2688_v35 = vpop.permute.xlu1 %2687 }
0x3079   :  { %v2693_v16 = vperm.slane %v2688_v35, %v4786_v61 }
0x30a6   :  { %v5805_v14 = vpop.xlane.xlu0 %2329 }
0x30ae   :  { %v2620_v1 = vpop.xlane.xlu0 %2619 }
0x30af   :  { %v2626_v25 = vadd.f32 %v2620_v1, %v5522_v57  ;;  %v2990_v1 = vsel %vm295_vm1, %v2980_v32, 0.0  ;;  %vm3370_vm1 = vcmask 1043459  }
0x30b1   :  { %v2632_v6 = vmul.f32 1.442695, %v2626_v25  ;;  %v2986_v25 = vpop.xlane.xlu1 %2985 }
0x30b3   :  { %4131 = vpow2.f32 %v2632_v6  ;;  %v2994_v6 = vadd.f32 %v2986_v25, %v5525_v9  ;;  %v3306_v9 = vrot.slane %v5284_v42, 6 }
0x30b5   :  { %v2999_v30 = vmul.f32 1.442695, %v2994_v6 }
0x30b7   :  { %4133 = vpow2.f32 %v2999_v30 }
0x30b9   :  { %v5808_v22 = vpop.eup %4131 }
0x30ba   :  { %2684 = vperm.xlu0 %3859, %v5808_v22  }
0x30d6   :  { %v2682_v55 = vpop.permute.xlu0 %2681 }
0x30d7   :  { %v2690_v3 = vperm.slane %v2682_v55, %v4786_v61  ;;  %v2989_v55 = vpop.xlane.xlu2 %2988 }
0x30d8   :  { %v2995_v35 = vadd.f32 %v2989_v55, %v5522_v57  ;;  %v3262_v57 = vpop.permute.xlu1 %3261 }
0x30d9   :  { %v2691_v45 = vsel %vm432_vm2, %v2690_v3, %v2689_v50 }
0x30da   :  { %v3001_v3 = vmul.f32 1.442695, %v2995_v35 }
0x30dc   :  { %4135 = vpow2.f32 %v3001_v3 }
0x30dd   :  { %4137 = vrcp.f32 %v5585_v4 }
0x312c   :  { %v2685_v19 = vpop.permute.xlu0 %2684 }
0x312d   :  { %v2692_v43 = vperm.slane %v2685_v19, %v4783_v60  ;;  %v5824_v19 = vpop.eup %4133 }
0x312e   :  { %v5827_v50 = vpop.eup %4135 }
0x312f   :  { %v2694_v15 = vsel %vm432_vm2, %v2693_v16, %v2692_v43  ;;  %v3254_v16 = vmul.f32 %v5797_v51, %v5435_v40 }
0x3130   :  { %v2695_v13 = vsel %vm437_vm3, %v2694_v15, %v2691_v45  ;;  %v3314_v45 = vrot.slane %v5440_v44, 2  ;;  %v5842_v15 = vpop.eup %4137 }
0x3131   :  { %v2697_v54 = vsel %vm440_vm4, %v2695_v13, 0.0  ;;  %v5836_v43 = vadd.f32 %v3262_v57, %v3254_v16  ;;  %v483_v42 = vperm.slane %v5842_v15, 0  ;;  %v484_v40 = vperm.slane %v5842_v15, 1  ;;  %v6122_v57 = vld [vmem:[#allocation34_spill] sm:$0xff] }
0x3132   :  { %2698 = vadd.xlane.f32.xlu0 %v2697_v54  ;;  %v3293_v16 = vrot.slane %v6122_v57, 6 }
0x3133   :  { %4139 = vtanh.f32 %v5836_v43  ;;  %v488_v54 = vmul.f32 %v5531_v49, %v483_v42  ;;  %v490_v44 = vmul.f32 %v5547_v34, %v484_v40 }
0x3134   :  { %4141 = vrcp.f32 %v5631_v11 }
0x3135   :  { %4143 = vrcp.f32 %v5670_v5 }
0x3136   :  { %4145 = vrcp.f32 %v5714_v48 }
0x3137   :  { %4147 = vrcp.f32 %v5762_v26 }
0x3138   :  { %4149 = vrcp.f32 %v5805_v14 }
0x3139   :  { %v4140_v13 = vpop.eup %4139 }
0x313a   :  { %2991 = vadd.xlane.f32.xlu0 %v2990_v1  ;;  %v5850_v4 = vpop.eup %4141 }
0x313b   :  { %v857_v32 = vperm.slane %v5850_v4, 0  ;;  %v858_v25 = vperm.slane %v5850_v4, 1  ;;  %v5857_v6 = vpop.eup %4143 }
0x313c   :  { %v1226_v34 = vperm.slane %v5857_v6, 0  ;;  %v5864_v30 = vpop.eup %4145 }
0x313d   :  { %v861_v1 = vmul.f32 %v5572_v37, %v857_v32  ;;  %v863_v49 = vmul.f32 %v5597_v0, %v858_v25  ;;  %v1595_v37 = vperm.slane %v5864_v30, 0  ;;  %v1596_v0 = vperm.slane %v5864_v30, 1  ;;  %v5873_v35 = vpop.eup %4147  ;;  %v3526_v30 = vld [vmem:[#allocation20 + $0x8] sm:$0xff] }
0x313e   :  { %v1231_v11 = vmul.f32 %v5620_v63, %v1226_v34 }
0x313f   :  { %v1599_v5 = vmul.f32 %v5664_v17, %v1595_v37  ;;  %v1602_v48 = vmul.f32 %v5667_v24, %v1596_v0  ;;  %v1965_v17 = vperm.slane %v5873_v35, 1 }
0x3141   :  { %v1970_v26 = vmul.f32 %v5717_v59, %v1965_v17 }
0x314e   :  { %3050 = vperm.xlu0 %3859, %v5824_v19  }
0x3156   :  { %3053 = vperm.xlu0 %3859, %v5827_v50  }
0x315e   :  { %3298 = vrot.lane.b32.xlu0 %v3297_v36, %s4549_s30  ;;  %v5879_v36 = vpop.eup %4149 }
0x315f   :  { %v2333_v24 = vperm.slane %v5879_v36, 0 }
0x3166   :  { %3307 = vrot.lane.b32.xlu0 %v3306_v9, %s4549_s30 }
0x316e   :  { %3315 = vrot.lane.b32.xlu0 %v3314_v45, %s4549_s30 }
0x3176   :  { %3267 = vrot.lane.b32.xlu0 %v4140_v13, %s4540_s20  ;;  %v6123_v13 = vld [vmem:[#allocation36_spill] sm:$0xff] }
0x317e   :  { %3332 = vperm.xlu0 %3859, %v488_v54   ;;  %v3301_v54 = vrot.slane %v6123_v13, 2 }
0x3186   :  { %3338 = vperm.xlu0 %3859, %v490_v44  }
0x318e   :  { %3353 = vperm.xlu0 %3859, %v861_v1   ;;  %v3310_v1 = vrot.slane %v5361_v39, 4  ;;  %v1227_v39 = vperm.slane %v5857_v6, 1 }
0x3196   :  { %3359 = vperm.xlu0 %3859, %v863_v49  }
0x319e   :  { %3381 = vperm.xlu0 %3859, %v1231_v11   ;;  %v489_v11 = vmul.f32 %v5528_v41, %v484_v40 }
0x31a5   :  { %v2699_v55 = vpop.xlane.xlu0 %2698 }
0x31a6   :  { %3403 = vperm.xlu0 %3859, %v1599_v5  }
0x31ad   :  { %v2992_v63 = vpop.xlane.xlu0 %2991 }
0x31ae   :  { %v2996_v3 = vadd.f32 %v2992_v63, %v5541_v47  ;;  %3412 = vperm.xlu0 %3859, %v1602_v48   ;;  %v2338_v47 = vmul.f32 %v5756_v29, %v2333_v24 }
0x31b0   :  { %v3003_v46 = vmul.f32 1.442695, %v2996_v3  ;;  %v1232_v3 = vmul.f32 %v5638_v33, %v1227_v39  ;;  %v1971_v33 = vmul.f32 %v5710_v28, %v1965_v17 }
0x31b2   :  { %4151 = vpow2.f32 %v3003_v46 }
0x31b3   :  { %4153 = vrcp.f32 %v2699_v55  ;;  %v862_v55 = vmul.f32 %v5580_v10, %v857_v32 }
0x31b6   :  { %3434 = vperm.xlu0 %3859, %v1970_v26  }
0x31b8   :  { %v5881_v9 = vpop.eup %4151 }
0x31b9   :  { %3056 = vperm.xlu1 %3860, %v5881_v9   ;;  %v5888_v14 = vpop.eup %4153 }
0x31ba   :  { %v2702_v59 = vperm.slane %v5888_v14, 0  ;;  %v2703_v44 = vperm.slane %v5888_v14, 1 }
0x31bc   :  { %v2706_v15 = vmul.f32 %v5777_v23, %v2702_v59  ;;  %v2709_v29 = vmul.f32 %v5780_v18, %v2703_v44  ;;  %v487_v23 = vmul.f32 %v5544_v58, %v483_v42  ;;  %v864_v18 = vmul.f32 %v5593_v27, %v858_v25  ;;  %v3048_v25 = vpop.permute.xlu2 %3047 }
0x31bd   :  { %v1600_v42 = vmul.f32 %v5659_v21, %v1595_v37  ;;  %v1964_v27 = vperm.slane %v5873_v35, 0  ;;  %v3058_v35 = vperm.slane %v3048_v25, %v4783_v60 }
0x31be   :  { %3455 = vperm.xlu0 %3859, %v2338_v47   ;;  %v4177_v47 = vld [vmem:[#allocation5] sm:$0x3] }
0x31bf   :  { %v1968_v40 = vmul.f32 %v5704_v62, %v1964_v27 }
0x31c0   :  { %v3051_v45 = vpop.permute.xlu0 %3050 }
0x31c1   :  { %3294 = vrot.lane.b32.xlu1 %v3293_v16, %s4549_s30  ;;  %v3059_v21 = vperm.slane %v3051_v45, %v4786_v61 }
0x31c3   :  { %v3060_v28 = vsel %vm432_vm2, %v3059_v21, %v3058_v35 }
0x31c6   :  { %3476 = vperm.xlu0 %3859, %v2706_v15   ;;  %v6124_v15 = vld [vmem:[#allocation38_spill] sm:$0xff] }
0x31c8   :  { %v3054_v4 = vpop.permute.xlu0 %3053 }
0x31c9   :  { %3302 = vrot.lane.b32.xlu1 %v3301_v54, %s4549_s30  ;;  %v3061_v62 = vperm.slane %v3054_v4, %v4783_v60  ;;  %v6125_v4 = vld [vmem:[#allocation37_spill] sm:$0xff] }
0x31ce   :  { %3485 = vperm.xlu0 %3859, %v2709_v29  }
0x31d0   :  { %v3299_v49 = vpop.permute.xlu0 %3298 }
0x31d1   :  { %3311 = vrot.lane.b32.xlu1 %v3310_v1, %s4549_s30  ;;  %v1230_v1 = vmul.f32 %v5625_v52, %v1226_v34  ;;  %v2708_v52 = vmul.f32 %v5808_v22, %v2703_v44  ;;  %v3528_v34 = vld [vmem:[#allocation20 + $0x18] sm:$0xff] }
0x31d2   :  { %3553 = vmatpush.msrb.mxu1 %v3528_v34 }
0x31d8   :  { %v3308_v5 = vpop.permute.xlu0 %3307 }
0x31d9   :  { %3329 = vperm.xlu1 %3860, %v487_v23   ;;  %v3321_v13 = vsel %vm3284_vm8, %v6124_v15, %v3308_v5  ;;  %v1601_v23 = vmul.f32 %v5676_v12, %v1596_v0  ;;  %v2337_v5 = vmul.f32 %v5725_v7, %v2333_v24  ;;  %v3525_v0 = vld [vmem:[#allocation20] sm:$0xff] }
0x31e0   :  { %v5905_v48 = vpop.permute.xlu0 %3315 }
0x31e1   :  { %3335 = vperm.xlu1 %3860, %v489_v11   ;;  %v1969_v11 = vmul.f32 %v5697_v2, %v1964_v27  ;;  %v3527_v2 = vld [vmem:[#allocation20 + $0x10] sm:$0xff] }
0x31e2   :  { %3554 = vmatpush.msrb.mxu1 %v3527_v2 }
0x31e4   :  { %3555 = vmatpush.msrb.mxu1 %v3526_v30  ;;  %v6006_v30 = vld [vmem:[%s6089_s14] ss:$0 sm:$0xff] }
0x31e6   :  { %3556 = vmatpush.msrb.mxu1 %v3525_v0 }
0x31e8   :  { %v3268_v63 = vpop.permute.xlu0 %3267 }
0x31e9   :  { %3356 = vperm.xlu1 %3860, %v862_v55   ;;  %v5911_v58 = vmul.f32 %v3268_v63, %v5797_v51  ;;  %v2334_v51 = vperm.slane %v5879_v36, 1 }
0x31eb   :  { %v3282_v41 = vrot.slane %v5911_v58, 2  ;;  %v2339_v32 = vmul.f32 %v5765_v8, %v2334_v51  ;;  %v2340_v6 = vmul.f32 %v5728_v38, %v2334_v51 }
0x31ed   :  { %v3292_v10 = vsel %vm3288_vm14, %v5448_v56, %v3282_v41  ;;  %v2707_v56 = vmul.f32 %v5802_v53, %v2702_v59 }
0x31f0   :  { %v5961_v12 = vpop.permute.xlu0 %3332 }
0x31f1   :  { %3362 = vperm.xlu1 %3860, %v864_v18  }
0x31f8   :  { %v3339_v38 = vpop.permute.xlu0 %3338 }
0x31f9   :  { %3384 = vperm.xlu1 %3860, %v1232_v3  }
0x3200   :  { %v3354_v24 = vpop.permute.xlu0 %3353 }
0x3201   :  { %3535 = vrot.lane.b32.xlu1 %v3292_v10, %s4549_s30 }
0x3208   :  { %v3360_v55 = vpop.permute.xlu0 %3359 }
0x3209   :  { %3406 = vperm.xlu1 %3860, %v1600_v42  }
0x3210   :  { %v3382_v41 = vpop.permute.xlu0 %3381 }
0x3211   :  { %3428 = vperm.xlu1 %3860, %v1968_v40  }
0x3218   :  { %v3404_v51 = vpop.permute.xlu0 %3403 }
0x3219   :  { %3437 = vperm.xlu1 %3860, %v1971_v33   ;;  %v3414_v15 = vperm.slane %v3404_v51, %v4783_v60 }
0x3221   :  { %3458 = vperm.xlu1 %3860, %v2339_v32  }
0x3229   :  { %3479 = vperm.xlu1 %3860, %v2707_v56  }
0x322b   :  { %v3057_v37 = vpop.permute.xlu1 %3056 }
0x322c   :  { %v3062_v46 = vperm.slane %v3057_v37, %v4786_v61  ;;  %v3344_v37 = vperm.slane %v3339_v38, %v4786_v61 }
0x322e   :  { %v3063_v17 = vsel %vm432_vm2, %v3062_v46, %v3061_v62 }
0x322f   :  { %v3064_v8 = vsel %vm437_vm3, %v3063_v17, %v3060_v28  ;;  %v3413_v28 = vpop.permute.xlu0 %3412 }
0x3230   :  { %v3066_v26 = vsel %vm440_vm4, %v3064_v8, 0.0  ;;  %vm3395_vm4 = vcmask 1045509  }
0x3231   :  { %3067 = vadd.xlane.f32.xlu2 %v3066_v26  ;;  %v3390_v26 = vperm.slane %v3382_v41, %v4786_v61 }
0x3233   :  { %v3295_v53 = vpop.permute.xlu1 %3294 }
0x3234   :  { %v3318_v57 = vsel %vm3284_vm8, %v4177_v47, %v3295_v53  ;;  %v3341_v47 = vperm.slane %v5961_v12, %v4786_v61 }
0x3235   :  { %v3319_v16 = vsel %vm3286_vm9, %v3318_v57, %v3299_v49  ;;  %v1233_v49 = vmul.f32 %v5628_v31, %v1227_v39 }
0x323b   :  { %v3303_v59 = vpop.permute.xlu1 %3302 }
0x323c   :  { %v5935_v45 = vsel %vm3288_vm14, %v3319_v16, %v3303_v59 }
0x3243   :  { %v3312_v54 = vpop.permute.xlu1 %3311 }
0x3244   :  { %v5940_v29 = vsel %vm3286_vm9, %v3321_v13, %v3312_v54  ;;  %v3418_v13 = vperm.slane %v3413_v28, %v4786_v61 }
0x3245   :  { %v3323_v38 = vsel %vm3288_vm14, %v5940_v29, %v5905_v48  ;;  %v3712_v48 = vrot.slane %v5836_v43, 6 }
0x3249   :  { %3533 = vrot.lane.b32.xlu2 %v6125_v4, %s4549_s30 }
0x324b   :  { %v5959_v31 = vpop.permute.xlu1 %3329 }
0x324c   :  { %v3340_v17 = vperm.slane %v5959_v31, %v4783_v60 }
0x3251   :  { %3378 = vperm.xlu2 %3858, %v1230_v1  }
0x3253   :  { %v3336_v7 = vpop.permute.xlu1 %3335 }
0x3259   :  { %3387 = vperm.xlu2 %3858, %v1233_v49   ;;  %v3342_v49 = vsel %vm432_vm2, %v3341_v47, %v3340_v17 }
0x325b   :  { %v3357_v36 = vpop.permute.xlu1 %3356 }
0x325c   :  { %v3365_v21 = vperm.slane %v3357_v36, %v4786_v61  ;;  %v3599_v36 = vld [vmem:[#allocation13 + $0x18] sm:$0xff] }
0x325d   :  { %3618 = vmatpush.msrb.mxu2 %v3599_v36  ;;  %v4551_v36 = vmov 32  }
0x3261   :  { %3409 = vperm.xlu2 %3858, %v1601_v23  }
0x3263   :  { %v3363_v14 = vpop.permute.xlu1 %3362 }
0x3264   :  { %v3368_v25 = vperm.slane %v3363_v14, %v4786_v61 }
0x3269   :  { %3431 = vperm.xlu2 %3858, %v1969_v11  }
0x326b   :  { %v3385_v44 = vpop.permute.xlu1 %3384 }
0x326c   :  { %v3392_v35 = vperm.slane %v3385_v44, %v4783_v60 }
0x3271   :  { %3452 = vperm.xlu2 %3858, %v2337_v5  }
0x3273   :  { %v3536_v40 = vpop.permute.xlu1 %3535 }
0x3279   :  { %3461 = vperm.xlu2 %3858, %v2340_v6  }
0x327b   :  { %v3407_v62 = vpop.permute.xlu1 %3406 }
0x327c   :  { %v3415_v59 = vperm.slane %v3407_v62, %v4786_v61 }
0x327e   :  { %v3416_v6 = vsel %vm432_vm2, %v3415_v59, %v3414_v15 }
0x3281   :  { %3482 = vperm.xlu2 %3858, %v2708_v52  }
0x32a4   :  { %v3068_v22 = vpop.xlane.xlu2 %3067 }
0x32a5   :  { %4155 = vrcp.f32 %v3068_v22  ;;  %v3429_v22 = vpop.permute.xlu1 %3428 }
0x32a6   :  { %v3439_v17 = vperm.slane %v3429_v22, %v4783_v60 }
0x32ab   :  { %v4156_v18 = vpop.eup %4155 }
0x32ac   :  { %v3071_v39 = vperm.slane %v4156_v18, 0  ;;  %v3072_v63 = vperm.slane %v4156_v18, 1  ;;  %v3534_v3 = vpop.permute.xlu2 %3533  ;;  %v3435_v18 = vpop.permute.xlu0 %3434 }
0x32ad   :  { %3820 = vmatmul.msk.f32.vlgmr.msrb.gmra.mxu1 %vm248_vm0, %v3534_v3  ;;  %v3438_v3 = vpop.permute.xlu1 %3437 }
0x32ae   :  { %v3077_v10 = vmul.f32 %v5827_v50, %v3072_v63  ;;  %v3076_v42 = vmul.f32 %v5824_v19, %v3071_v39  ;;  %v3075_v27 = vmul.f32 %v5769_v20, %v3071_v39  ;;  %v3078_v32 = vmul.f32 %v5881_v9, %v3072_v63  ;;  %v3598_v39 = vld [vmem:[#allocation13 + $0x10] sm:$0xff]  ;;  %v3596_v63 = vld [vmem:[#allocation13] sm:$0xff] }
0x32af   :  { %v3367_v19 = vperm.slane %v3360_v55, %v4783_v60  ;;  %v3343_v20 = vperm.slane %v3336_v7, %v4783_v60  ;;  %v3364_v9 = vperm.slane %v3354_v24, %v4783_v60  ;;  %v3633_v7 = vmul.f32 %v6006_v30, %v5935_v45  ;;  %3619 = vmatpush.msrb.mxu2 %v3598_v39  ;;  %v3597_v45 = vld [vmem:[#allocation13 + $0x8] sm:$0xff] }
0x32b0   :  { %3506 = vperm.xlu0 %3859, %v3077_v10   ;;  %3503 = vperm.xlu2 %3858, %v3076_v42   ;;  %v3634_v24 = vmul.f32 %v6006_v30, %v3323_v38 }
0x32b1   :  { %3500 = vperm.xlu1 %3860, %v3075_v27   ;;  %v3369_v8 = vsel %vm432_vm2, %v3368_v25, %v3367_v19  ;;  %v3345_v57 = vsel %vm432_vm2, %v3344_v37, %v3343_v20  ;;  %v3366_v16 = vsel %vm432_vm2, %v3365_v21, %v3364_v9  ;;  %v3635_v0 = vsel %vm248_vm0, %v3633_v7, 0.0  ;;  %3620 = vmatpush.msrb.mxu2 %v3597_v45 }
0x32b2   :  { %v3371_v54 = vsel %vm3370_vm1, %v3369_v8, %v3366_v16  ;;  %v3346_v5 = vsel %vm437_vm3, %v3345_v57, %v3342_v49  ;;  %v3638_v14 = vsel %vm248_vm0, %v3634_v24, 0.0 }
0x32b3   :  { %v3519_v31 = vsel %vm3284_vm8, %v3346_v5, %v3371_v54  ;;  %3621 = vmatpush.msrb.mxu2 %v3596_v63 }
0x32b4   :  { %v3379_v33 = vpop.permute.xlu2 %3378  ;;  %v3456_v41 = vpop.permute.xlu0 %3455 }
0x32b5   :  { %3821 = vmatmul.msk.f32.gmra.mxu1 %vm248_vm0, %v3536_v40  ;;  %v3389_v46 = vperm.slane %v3379_v33, %v4783_v60  ;;  %v3459_v10 = vpop.permute.xlu1 %3458  ;;  %v3464_v28 = vperm.slane %v3456_v41, %v4786_v61 }
0x32b6   :  { %v3466_v43 = vperm.slane %v3459_v10, %v4783_v60 }
0x32b7   :  { %v3391_v4 = vsel %vm432_vm2, %v3390_v26, %v3389_v46  ;;  %v3443_v46 = vperm.slane %v3438_v3, %v4786_v61  ;;  %v3442_v26 = vperm.slane %v3435_v18, %v4783_v60 }
0x32b8   :  { %3863 = vset.pattern.permute.xlu2 %v4551_v36  ;;  %3861 = vset.pattern.permute.xlu0 %v4551_v36 }
0x32b9   :  { %3509 = vperm.xlu1 %3860, %v3078_v32   ;;  %v3444_v54 = vsel %vm432_vm2, %v3443_v46, %v3442_v26 }
0x32bc   :  { %v3388_v56 = vpop.permute.xlu2 %3387  ;;  %v3477_v27 = vpop.permute.xlu0 %3476 }
0x32bd   :  { %v3393_v50 = vperm.slane %v3388_v56, %v4786_v61  ;;  %v3480_v40 = vpop.permute.xlu1 %3479  ;;  %v3592_v56 = vld [vmem:[#allocation11] sm:$0xff] }
0x32be   :  { %v3488_v9 = vperm.slane %v3480_v40, %v4786_v61 }
0x32bf   :  { %v3394_v53 = vsel %vm432_vm2, %v3393_v50, %v3392_v35 }
0x32c0   :  { %v3396_v23 = vsel %vm3395_vm4, %v3394_v53, %v3391_v4  ;;  %v3487_v53 = vperm.slane %v3477_v27, %v4783_v60 }
0x32c1   :  { %v3520_v34 = vsel %vm3286_vm9, %v3519_v31, %v3396_v23  ;;  %3862 = vset.pattern.permute.xlu1 %v4551_v36 }
0x32c2   :  { %v3489_v4 = vsel %vm432_vm2, %v3488_v9, %v3487_v53 }
0x32c4   :  { %v3410_v1 = vpop.permute.xlu2 %3409  ;;  %v3486_v51 = vpop.permute.xlu0 %3485 }
0x32c5   :  { %v3417_v11 = vperm.slane %v3410_v1, %v4783_v60  ;;  %v3491_v62 = vperm.slane %v3486_v51, %v4786_v61 }
0x32c7   :  { %v3419_v52 = vsel %vm432_vm2, %v3418_v13, %v3417_v11 }
0x32c8   :  { %v3421_v12 = vsel %vm3420_vm7, %v3419_v52, %v3416_v6 }
0x32c9   :  { %v3521_v2 = vsel %vm3288_vm14, %v3520_v34, %v3421_v12 }
0x32ca   :  { %3584 = vrot.lane.b32.xlu2 %v3521_v2, %s4550_s23 }
0x32cc   :  { %v3432_v55 = vpop.permute.xlu2 %3431 }
0x32cd   :  { %v3440_v21 = vperm.slane %v3432_v55, %v4786_v61 }
0x32cf   :  { %v3441_v16 = vsel %vm432_vm2, %v3440_v21, %v3439_v17 }
0x32d0   :  { %v3445_v52 = vsel %vm437_vm3, %v3444_v54, %v3441_v16 }
0x32d4   :  { %v3453_v44 = vpop.permute.xlu2 %3452 }
0x32d5   :  { %v3463_v37 = vperm.slane %v3453_v44, %v4783_v60 }
0x32d7   :  { %v3465_v59 = vsel %vm432_vm2, %v3464_v28, %v3463_v37  ;;  %v3593_v28 = vld [vmem:[#allocation11 + $0x8] sm:$0xff] }
0x32dc   :  { %v3462_v29 = vpop.permute.xlu2 %3461 }
0x32dd   :  { %v3467_v25 = vperm.slane %v3462_v29, %v4786_v61 }
0x32df   :  { %v3468_v8 = vsel %vm432_vm2, %v3467_v25, %v3466_v43 }
0x32e0   :  { %v3469_v1 = vsel %vm3370_vm1, %v3468_v8, %v3465_v59 }
0x32e1   :  { %v3522_v34 = vsel %vm3284_vm8, %v3445_v52, %v3469_v1 }
0x32e3   :  { %3636 = vadd.xlane.f32.xlu1 %v3635_v0 }
0x32e4   :  { %v3483_v42 = vpop.permute.xlu2 %3482 }
0x32e5   :  { %v3490_v19 = vperm.slane %v3483_v42, %v4783_v60 }
0x32e7   :  { %v3492_v47 = vsel %vm432_vm2, %v3491_v62, %v3490_v19 }
0x32e8   :  { %v3493_v23 = vsel %vm3395_vm4, %v3492_v47, %v3489_v4 }
0x32e9   :  { %v3523_v7 = vsel %vm3286_vm9, %v3522_v34, %v3493_v23 }
0x32f3   :  { %3639 = vadd.xlane.f32.xlu2 %v3638_v14 }
0x330a   :  { %v3504_v33 = vpop.permute.xlu2 %3503 }
0x330b   :  { %3713 = vrot.lane.b32.xlu2 %v3712_v48, %s4540_s20  ;;  %v3512_v11 = vperm.slane %v3504_v33, %v4786_v61 }
0x3322   :  { %v3507_v57 = vpop.permute.xlu0 %3506 }
0x3323   :  { %v3501_v32 = vpop.permute.xlu1 %3500  ;;  %v3514_v5 = vperm.slane %v3507_v57, %v4783_v60 }
0x3324   :  { %v3585_v50 = vpop.permute.xlu2 %3584  ;;  %v3511_v15 = vperm.slane %v3501_v32, %v4783_v60  ;;  %v3868_v60 = vld [vmem:[%s6087_s12 + $0x1] ss:$0 sm:$0xff]  ;;  %s4552_s12 = smov [#allocation23]  }
0x3325   :  { %v3590_v20 = vsel %vm506_vm5, %v3521_v2, %v3585_v50  ;;  %s3741_s5 = sshll.u32 %s4552_s12, 4  ;;  %s3742_s5 = int_to_ptr.vmem [resolvable:$true] %s3741_s5 }
0x3326   :  { %v3594_v35 = vmul.f32 %v3592_v56, %v3590_v20  ;;  %v3513_v31 = vsel %vm432_vm2, %v3512_v11, %v3511_v15 }
0x3328   :  { %3822 = vmatmul.msk.f32.vlgmr.msrb.gmra.mxu2 %vm248_vm0, %v3594_v35 }
0x332a   :  { %v3558_v13 = vpop.f32.mrf.mxu1 }
0x332b   :  { %v3510_v49 = vpop.permute.xlu1 %3509  ;;  %v6056_v55 = vadd.f32 %v3868_v60, %v3558_v13 }
0x332c   :  { %v3515_v6 = vperm.slane %v3510_v49, %v4786_v61 }
0x332e   :  { %v3516_v12 = vsel %vm432_vm2, %v3515_v6, %v3514_v5 }
0x332f   :  { %v3517_v2 = vsel %vm3420_vm7, %v3516_v12, %v3513_v31 }
0x3330   :  { %v3524_v0 = vsel %vm3288_vm14, %v3523_v7, %v3517_v2 }
0x3331   :  { %3586 = vrot.lane.b32.xlu0 %v3524_v0, %s4550_s23 }
0x3332   :  { %v3561_v61 = vpop.f32.mrf.mxu1 }
0x3333   :  { %v3562_v38 = vadd.f32 %v3868_v60, %v3561_v61 }
0x3335   :  { %3566 = vmax.xlane.f32.xlu1 %v3562_v38 }
0x3356   :  { %v3637_v24 = vpop.xlane.xlu1 %3636 }
0x3357   :  { %v3641_v14 = vadd.f32 %v6006_v30, %v3637_v24 }
0x3359   :  { %v3824_v22 = vmul.f32 -1.442695, %v3641_v14 }
0x335b   :  { %4157 = vpow2.f32 %v3824_v22  ;;  %3564 = vmax.xlane.f32.xlu0 %v6056_v55 }
0x3361   :  { %v4158_v44 = vpop.eup %4157 }
0x3362   :  { %v3649_v18 = vadd.f32 1.0, %v4158_v44 }
0x3364   :  { %4159 = vrcp.f32 %v3649_v18  ;;  %v3662_v41 = vand.u32 2147483648, %v3649_v18  ;;  %v3660_v42 = vand.u32 2147483647, %v3649_v18  ;;  %vm3656_vm3 = vweird.f32 %v3649_v18 }
0x3366   :  { %v3640_v39 = vpop.xlane.xlu2 %3639  ;;  %v3663_v51 = vor.u32 1.1754944e-38, %v3662_v41  ;;  %vm3661_vm14 = vcmp.eq.f32.partialorder %v3660_v42, 8.507059e+37 }
0x3367   :  { %v3642_v45 = vadd.f32 %v6006_v30, %v3640_v39 }
0x3369   :  { %v3825_v63 = vmul.f32 -1.442695, %v3642_v45 }
0x336a   :  { %v4160_v3 = vpop.eup %4159 }
0x336b   :  { %v3652_v48 = vmul.f32 %v4160_v3, %v3649_v18  ;;  %4161 = vpow2.f32 %v3825_v63  ;;  %vm3657_vm2 = vweird.f32 %v4160_v3 }
0x336c   :  { %vm3658_vm9 = vmor %vm3656_vm3, %vm3657_vm2 }
0x336d   :  { %v3653_v29 = vsub.f32 1.0, %v3652_v48 }
0x336e   :  { %v3714_v59 = vpop.permute.xlu2 %3713 }
0x336f   :  { %v3654_v10 = vmul.f32 %v4160_v3, %v3653_v29  ;;  %v3716_v15 = vsel %vm3284_vm8, %v5911_v58, %v3714_v59 }
0x3371   :  { %v4162_v27 = vpop.eup %4161  ;;  %v3655_v40 = vadd.f32 %v4160_v3, %v3654_v10 }
0x3372   :  { %v3650_v33 = vadd.f32 1.0, %v4162_v27 }
0x3373   :  { %v3659_v32 = vsel %vm3658_vm9, %v4160_v3, %v3655_v40 }
0x3374   :  { %4163 = vrcp.f32 %v3650_v33  ;;  %v3664_v56 = vsel %vm3661_vm14, %v3663_v51, %v3659_v32  ;;  %v3677_v20 = vand.u32 2147483648, %v3650_v33  ;;  %v3675_v21 = vand.u32 2147483647, %v3650_v33 }
0x3375   :  { %v3693_v30 = vsub.f32 1.0, %v3664_v56  ;;  %vm3671_vm11 = vweird.f32 %v3650_v33 }
0x3376   :  { %v3678_v35 = vor.u32 1.1754944e-38, %v3677_v20  ;;  %vm3676_vm13 = vcmp.eq.f32.partialorder %v3675_v21, 8.507059e+37 }
0x3377   :  { %3697 = vperm.xlu2 %3863, %v3693_v30  }
0x337a   :  { %v4164_v25 = vpop.eup %4163 }
0x337b   :  { %v3667_v50 = vmul.f32 %v4164_v25, %v3650_v33  ;;  %vm3672_vm10 = vweird.f32 %v4164_v25 }
0x337c   :  { %vm3673_vm12 = vmor %vm3671_vm11, %vm3672_vm10 }
0x337d   :  { %v3668_v19 = vsub.f32 1.0, %v3667_v50 }
0x337f   :  { %v3669_v43 = vmul.f32 %v4164_v25, %v3668_v19 }
0x3381   :  { %v3670_v37 = vadd.f32 %v4164_v25, %v3669_v43 }
0x3383   :  { %v3674_v62 = vsel %vm3673_vm12, %v4164_v25, %v3670_v37 }
0x3384   :  { %v3679_v46 = vsel %vm3676_vm13, %v3678_v35, %v3674_v62 }
0x3385   :  { %3688 = vperm.xlu1 %3862, %v3679_v46   ;;  %v3694_v9 = vsub.f32 1.0, %v3679_v46 }
0x3387   :  { %3702 = vperm.xlu2 %3863, %v3694_v9  }
0x33a3   :  { %v3587_v17 = vpop.permute.xlu0 %3586 }
0x33a4   :  { %v3591_v8 = vsel %vm506_vm5, %v3524_v0, %v3587_v17 }
0x33a5   :  { %v3595_v26 = vmul.f32 %v3593_v28, %v3591_v8 }
0x33a7   :  { %3823 = vmatmul.msk.f32.gmra.mxu2 %vm248_vm0, %v3595_v26  ;;  %vm3721_vm0 = vcmask 257024  }
0x33a8   :  { %v3567_v53 = vpop.xlane.xlu1 %3566 }
0x33a9   :  { %v3569_v47 = vsub.f32 %v3562_v38, %v3567_v53 }
0x33ab   :  { %v3572_v57 = vmul.f32 1.442695, %v3569_v47  ;;  %v3623_v23 = vpop.f32.mrf.mxu2 }
0x33ad   :  { %4165 = vpow2.f32 %v3572_v57 }
0x33b3   :  { %v4166_v16 = vpop.eup %4165 }
0x33b4   :  { %3576 = vadd.xlane.f32.xlu1 %v4166_v16 }
0x33cd   :  { %3718 = vrot.lane.b32.xlu1 %v3716_v15, %s4549_s30 }
0x33ce   :  { %v3565_v13 = vpop.xlane.xlu0 %3564 }
0x33cf   :  { %v3568_v54 = vsub.f32 %v6056_v55, %v3565_v13 }
0x33d1   :  { %v3570_v4 = vmul.f32 1.442695, %v3568_v54  ;;  %v3698_v5 = vpop.permute.xlu2 %3697 }
0x33d2   :  { %v3705_v36 = vmul.f32 %v3698_v5, %v3623_v23 }
0x33d3   :  { %4167 = vpow2.f32 %v3570_v4 }
0x33d9   :  { %v4168_v1 = vpop.eup %4167 }
0x33da   :  { %3574 = vadd.xlane.f32.xlu0 %v4168_v1 }
0x33e1   :  { %v3703_v12 = vpop.permute.xlu2 %3702 }
0x33ee   :  { %3683 = vperm.xlu0 %3861, %v3664_v56  }
0x33f7   :  { %v3689_v49 = vpop.permute.xlu1 %3688 }
0x3427   :  { %v3577_v11 = vpop.xlane.xlu1 %3576 }
0x3428   :  { %4169 = vrcp.f32 %v3577_v11 }
0x342a   :  { %v3626_v52 = vpop.f32.mrf.mxu2 }
0x342b   :  { %v3706_v34 = vmul.f32 %v3703_v12, %v3626_v52 }
0x342e   :  { %v4170_v6 = vpop.eup %4169 }
0x342f   :  { %v3581_v31 = vmul.f32 %v4170_v6, %v4166_v16 }
0x3431   :  { %v3692_v58 = vmul.f32 %v3689_v49, %v3581_v31 }
0x3433   :  { %v3708_v2 = vadd.f32 %v3706_v34, %v3692_v58 }
0x3435   :  { %3710 = vst [vmem:[#allocation22 + $0x8] sm:$0xff] %v3708_v2 }
0x343f   :  { %v3719_v7 = vpop.permute.xlu1 %3718 }
0x3440   :  { %3722 = vst.msk [vmem:[#allocation23] sm:$0xf] %vm3721_vm0, %v3719_v7 }
0x3441   :  { %3746 = dma.vmem_to_hbm [thread:$0]  %s3742_s5, 64, %s3744_s26, [#allocation24]  }
0x344d   :  { %v3575_v0 = vpop.xlane.xlu0 %3574 }
0x344e   :  { %4171 = vrcp.f32 %v3575_v0 }
0x3454   :  { %v4172_v60 = vpop.eup %4171 }
0x3455   :  { %v3580_v61 = vmul.f32 %v4172_v60, %v4168_v1 }
0x3460   :  { %v3684_v38 = vpop.permute.xlu0 %3683 }
0x3461   :  { %v3691_v24 = vmul.f32 %v3684_v38, %v3580_v61 }
0x3463   :  { %v3707_v14 = vadd.f32 %v3705_v36, %v3691_v24 }
0x3465   :  { %3709 = vst [vmem:[#allocation22] sm:$0xff] %v3707_v14 }
0x3466   :  { %3735 = dma.vmem_to_hbm [thread:$0]  %s3728_s11, 256, %s3730_s28, [#allocation4], %s4534_s1, %s4534_s1, %s4535_s19  }
0x3467   :  { %4528 = dma.done.wait [#allocation4], 256  }
0x3468   :  { %4529 = vsyncadd [#allocation4], 4294967040 }
0x3469   :  { %4530 = dma.done.wait [#allocation24], 64  }
0x346a   :  { %4531 = vsyncadd [#allocation24], 4294967232 }
0x346b   :  { %3755 = vsyncpa [#allocation3], 1 }
0x346c   :  { %3756 = vsyncpa [#allocation6], 1 }
0x346d   :  { %3757 = vsyncpa [#allocation9], 1 }
0x346e   :  { %3758 = vsyncpa [#allocation12], 1 }
0x346f   :  { %3759 = vsyncpa [#allocation15], 1 }
0x3470   :  { %3760 = vsyncpa [#allocation18], 1 }
0x3471   :  { %3761 = vsyncpa [#allocation21], 1 }
0x3472   :  { %3762 = vsyncpa [#allocation4], 1 }
0x3473   :  { %3763 = vsyncpa [#allocation24], 1 }

</bundles_post_ra>
